<compile_context>
chip_gen: v7x
topology: tpu7x:2x2x1
jax: 0.10.0
libtpu: 0.0.40
codegen_flags: <defaults>
</compile_context>

<pallas_src>
import functools

import numpy as np
import jax
import jax.numpy as jnp
from jax.experimental import pallas as pl
from jax.experimental.pallas import tpu as pltpu

VOCAB = 128          # vocab size == one lane width -> softmax needs no pad mask
EMBED = 32           # embedding dim (only used to build the pre-fused emb@W1)
HIDDEN = 64          # MLP hidden dim
SEQ = 8              # max_length analogue (scaled down from 128)
MAX_TILE_ROWS = 512  # cap so live [RS,V] slabs stay inside v7x's 64 MiB VMEM


_BF16_EUP = None


def _use_bf16_eup():
    """bf16 exp on the EUP + bf16 MXU reduce: v6e/v7x only (v5e has no bf16 EUP)."""
    global _BF16_EUP
    if _BF16_EUP is None:
        try:
            kind = jax.devices()[0].device_kind.lower()
            _BF16_EUP = any(t in kind for t in ("v6", "v7", "7x"))
        except Exception:
            _BF16_EUP = False
    return _BF16_EUP


# ----------------------------------------------------------------------------
# Pallas kernel: fused embedding+MLP + LM head + shifted CE + exp(-loss)
# ----------------------------------------------------------------------------
def _lm_score_kernel(ids_ref, emb_w1_ref, b1_ref, w2_ref, out_ref, *,
                     use_bf16_exp):
    """One grid step: T sequences of S tokens, rows flattened s-major.

    ids_ref    : [S*T, 1] int32  token ids, row = s*T + r  (s-major)
    emb_w1_ref : [V, H]  bf16    pre-fused embedding @ W1
    b1_ref     : [1, H]  f32
    w2_ref     : [H, V]  bf16
    out_ref    : [1, T]  f32     exp(-loss) per sequence (lane-dense block)
    """
    RS = ids_ref.shape[0]
    V = emb_w1_ref.shape[0]
    T = out_ref.shape[1]
    S = RS // T

    ids = ids_ref[...]
    vocab_iota = jax.lax.broadcasted_iota(jnp.int32, (RS, V), 1)
    onehot = (vocab_iota == ids).astype(jnp.bfloat16)              # [RS, V]

    # Fused embedding gather + first MLP layer: one MXU matmul with K=V=128
    # (emb @ W1 pre-fused on the host), f32 accumulation.
    h = jnp.tanh(jnp.dot(onehot, emb_w1_ref[...],
                         preferred_element_type=jnp.float32) + b1_ref[...])
    logits = jnp.dot(h.astype(jnp.bfloat16), w2_ref[...],
                     preferred_element_type=jnp.float32)            # [RS, V]

    # Stable softmax pieces.  V == 128 exactly fills the lane dim; if VOCAB
    # were ever padded, the pad lanes would need a -inf mask before max/exp.
    m = jnp.max(logits, axis=-1, keepdims=True)                     # [RS, 1]
    centered = logits - m
    if use_bf16_exp:
        # v6e/v7x: bf16 EUP exp, vocab reduce on the (otherwise idle) MXU.
        p = jnp.exp(centered.astype(jnp.bfloat16))                  # [RS, V]
        ones_v = jnp.ones((V, 128), jnp.bfloat16)
        sumexp = jnp.dot(p, ones_v,
                         preferred_element_type=jnp.float32)[:, :1]  # [RS, 1]
    else:
        # v5e: no bf16 EUP/VPU path -> stay in f32, reduce on the XLU.
        sumexp = jnp.sum(jnp.exp(centered), axis=-1, keepdims=True)  # [RS, 1]

    # Label gather with the shift folded into a static, tile-aligned T-row
    # slice of the token one-hot (s-major layout: label(s, r) = token(s+1, r)).
    # Accumulate the masked logits over the S-1 scored positions FIRST, then
    # do one tiny [T, V] vocab reduce -- no labels input, no [RS,V]
    # (logits - lse) pass, no (RS,1)->(rows,S) relayout.
    g = onehot[T:2 * T, :] * logits[0:T, :]                         # [T, V]
    seq_m = m[0:T, :]                                               # [T, 1]
    seq_z = sumexp[0:T, :]                                          # [T, 1]
    for s in range(1, S - 1):
        g = g + onehot[(s + 1) * T:(s + 2) * T, :] * logits[s * T:(s + 1) * T, :]
        seq_m = seq_m + m[s * T:(s + 1) * T, :]
        # prod_s(sumexp) <= V**(S-1) = 128**7 -> safe in f32; log taken once.
        seq_z = seq_z * sumexp[s * T:(s + 1) * T, :]
    seq_logit = jnp.sum(g, axis=-1, keepdims=True)                  # [T, 1]

    # Per-sequence mean NLL over the S-1 predicted positions; score = exp(-loss).
    seq_lp = seq_logit - seq_m - jnp.log(seq_z)                     # [T, 1]
    scores = jnp.exp(seq_lp * (1.0 / (S - 1)))
    out_ref[...] = scores.reshape(1, T)


def _choose_tile_rows(n):
    """Rows per grid step: multiple of 128 (lane-dense (1,T) output block),
    >= 2 grid steps when N > 128 (v7x has 2 TensorCores), capped at
    MAX_TILE_ROWS so live [RS, V] slabs fit v7x's 64 MiB VMEM."""
    if n <= 128:
        return 128
    per_core = -(-n // 2)
    t = 128 * (-(-per_core // 128))
    return min(MAX_TILE_ROWS, t)


def lm_scores(ids_np, kparams):
    """ids_np: [N, S] int32 (host) -> scores: [N] f32 (device). One launch."""
    ids_np = np.asarray(ids_np, dtype=np.int32)
    N, S = ids_np.shape
    T = _choose_tile_rows(N)
    n_tiles = max(1, -(-N // T))
    rows = n_tiles * T

    # Host-side layout plumbing (free): pad to full row tiles and flatten each
    # tile s-major (row = s*T + r) so the in-kernel label shift is a static
    # tile-aligned T-row slice and the S-reduction never crosses (8,128) tiles.
    ids_p = np.zeros((n_tiles, T, S), np.int32)
    ids_p.reshape(-1, S)[:N] = ids_np
    ids_sm = jnp.asarray(ids_p.transpose(0, 2, 1).reshape(n_tiles * S * T, 1))

    kernel = functools.partial(_lm_score_kernel, use_bf16_exp=_use_bf16_eup())
    out = pl.pallas_call(
        kernel,
        out_shape=jax.ShapeDtypeStruct((1, rows), jnp.float32),
        grid_spec=pltpu.PrefetchScalarGridSpec(
            num_scalar_prefetch=0,
            grid=(n_tiles,),
            in_specs=[
                pl.BlockSpec((T * S, 1), lambda i: (i, 0)),       # ids (s-major)
                pl.BlockSpec((VOCAB, HIDDEN), lambda i: (0, 0)),  # emb @ W1
                pl.BlockSpec((1, HIDDEN), lambda i: (0, 0)),      # b1
                pl.BlockSpec((HIDDEN, VOCAB), lambda i: (0, 0)),  # w2
            ],
            out_specs=pl.BlockSpec((1, T), lambda i: (0, i)),
        ),
        compiler_params=pltpu.CompilerParams(
            dimension_semantics=("parallel",),        # row tiles shard across TCs
            vmem_limit_bytes=48 * 1024 * 1024),       # explicit budget (v7x: 64 MiB)
    )(ids_sm, kparams["emb_w1"], kparams["b1"], kparams["w2"])
    # Rows beyond N are pad sequences (score of the all-zero sequence); slice off.
    return out[0, :N]


# ----------------------------------------------------------------------------
# Glue: synthetic tokenizer, deterministic params, module-level API
# ----------------------------------------------------------------------------
def tokenize(text: str, max_length: int = SEQ, vocab: int = VOCAB) -> np.ndarray:
    """Deterministic byte-hash tokenizer (stand-in for the HF processor)."""
    b = text.encode("utf-8")
    ids = [(x * 31 + i * 7) % vocab for i, x in enumerate(b)]
    ids = ids[:max_length]
    ids = ids + [0] * (max_length - len(ids))
    return np.array(ids, dtype=np.int32)


def init_params(key):
    k_e, k_w1, k_b1, k_w2 = jax.random.split(key, 4)
    return {
        "embedding": 0.1 * jax.random.normal(k_e, (VOCAB, EMBED), jnp.float32),
        "w1": 0.1 * jax.random.normal(k_w1, (EMBED, HIDDEN), jnp.float32),
        "b1": 0.1 * jax.random.normal(k_b1, (1, HIDDEN), jnp.float32),
        "w2": 0.1 * jax.random.normal(k_w2, (HIDDEN, VOCAB), jnp.float32),
    }


def prepare_kernel_params(params):
    """Pre-fuse embedding @ W1 on the host and cast MXU operands to bf16 once."""
    emb_w1 = (params["embedding"] @ params["w1"]).astype(jnp.bfloat16)  # [V, H]
    return {
        "emb_w1": emb_w1,
        "b1": params["b1"].astype(jnp.float32),
        "w2": params["w2"].astype(jnp.bfloat16),
    }


def preprocess(s: str) -> str:
    return str(s).lower().strip()


def scenery_judge_forward(kparams, question: str, references, prediction: str):
    """Mirrors SceneryJudge.forward: one score = exp(-LM loss) per reference."""
    texts = [f"问题: {question}\n参考答案: {a_gt}\n预测: {prediction}"
             for a_gt in references]
    ids = np.stack([tokenize(t) for t in texts])                    # [R, S]
    return lm_scores(ids, kparams)                                  # one launch


def scenery_judge_compute(kparams, questions, references, predictions):
    """Mirrors SceneryJudge.compute: max score over references per question.

    All questions x references go through ONE kernel launch; the per-question
    max is a single padded gather + max on device (no per-question dispatches).
    """
    # TODO(synk): real HF CausalLM CE masks pad tokens (attention_mask /
    # ignore_index); this synthetic LM scores all S-1 shifted positions.
    texts, counts = [], []
    for q, refs, pred in zip(questions, references, predictions):
        refs_p = [preprocess(r) for r in refs]
        pred_p = preprocess(pred)
        texts.extend(f"问题: {q}\n参考答案: {r}\n预测: {pred_p}" for r in refs_p)
        counts.append(len(refs_p))
    ids = np.stack([tokenize(t) for t in texts])                    # [sum(R), S]
    scores = lm_scores(ids, kparams)                                # one launch

    q_n, r_max = len(counts), max(counts)
    gather_idx = np.zeros((q_n, r_max), np.int32)
    valid = np.zeros((q_n, r_max), bool)
    off = 0
    for qi, c in enumerate(counts):
        gather_idx[qi, :c] = np.arange(off, off + c)
        valid[qi, :c] = True
        off += c
    padded = jnp.where(jnp.asarray(valid),
                       scores[jnp.asarray(gather_idx)], -jnp.inf)
    return jnp.max(padded, axis=1)                                  # [Q] on device


# ----------------------------------------------------------------------------
# Pure-JAX f32 reference (no Pallas) for a correctness sanity check
# ----------------------------------------------------------------------------
def _reference_scores(ids, params):
    emb = params["embedding"][ids]                                  # [N, S, D]
    N, S, D = emb.shape
    h = jnp.tanh(emb.reshape(N * S, D) @ params["w1"] + params["b1"])
    logits = (h @ params["w2"]).reshape(N, S, VOCAB)
    logprobs = jax.nn.log_softmax(logits, axis=-1)
    tok_lp = jnp.take_along_axis(
        logprobs[:, :-1, :], ids[:, 1:, None], axis=-1)[..., 0]     # [N, S-1]
    loss = -jnp.mean(tok_lp, axis=-1)
    return jnp.exp(-loss)


if __name__ == "__main__":
    key = jax.random.PRNGKey(0)
    params = init_params(key)
    kparams = prepare_kernel_params(params)

    question = "图片里是什么场景？"
    references = ["海边的日落", "沙滩上的夕阳"]
    prediction = "海边日落"

    # forward() path: 2 references, one kernel launch
    refs_pp = [preprocess(r) for r in references]
    pred_pp = preprocess(prediction)
    scores = jax.block_until_ready(
        scenery_judge_forward(kparams, question, refs_pp, pred_pp))
    assert scores.shape == (len(references),)

    # sanity check vs pure-JAX f32 reference (kernel uses bf16 MXU operands)
    texts = [f"问题: {question}\n参考答案: {r}\n预测: {pred_pp}" for r in refs_pp]
    ids = jnp.asarray(np.stack([tokenize(t) for t in texts]))
    ref = _reference_scores(ids, params)
    np.testing.assert_allclose(np.asarray(scores), np.asarray(ref),
                               rtol=2e-2, atol=1e-3)

    # compute() path: 2 questions, 5 texts total, ONE kernel launch
    questions = [question, "照片拍摄于什么地方？"]
    refs_all = [references, ["山顶", "高山之巅", "雪山山顶"]]
    preds = [prediction, "山上"]
    max_scores = jax.block_until_ready(
        scenery_judge_compute(kparams, questions, refs_all, preds))
    assert max_scores.shape == (2,)
    np.testing.assert_allclose(float(max_scores[0]),
                               float(np.max(np.asarray(ref))),
                               rtol=2e-2, atol=1e-3)

    print("KERNEL_OK")
</pallas_src>

<mosaic_0001>
module attributes {stable_mosaic.version = 11 : i64} {
  func.func @_lm_score_kernel(%arg0: i32, %arg1: memref<1024x1xi32, #tpu.memory_space<vmem>>, %arg2: memref<128x64xbf16, #tpu.memory_space<vmem>>, %arg3: memref<1x64xf32, #tpu.memory_space<vmem>>, %arg4: memref<64x128xbf16, #tpu.memory_space<vmem>>, %arg5: memref<1x128xf32, #tpu.memory_space<vmem>>) attributes {dimension_semantics = [#tpu.dimension_semantics<parallel>], iteration_bounds = array<i64: 1>, scalar_prefetch = 0 : i64, scratch_operands = 0 : i64, tpu.core_type = #tpu.core_type<tc>, window_params = [{transform_indices = @transform_0, window_bounds = array<i64: 1024, 1>}, {pipeline_mode = #tpu.pipeline_mode<synchronous>, transform_indices = @transform_1, window_bounds = array<i64: 128, 64>}, {pipeline_mode = #tpu.pipeline_mode<synchronous>, transform_indices = @transform_2, window_bounds = array<i64: 1, 64>}, {pipeline_mode = #tpu.pipeline_mode<synchronous>, transform_indices = @transform_3, window_bounds = array<i64: 64, 128>}, {transform_indices = @transform_4, window_bounds = array<i64: 1, 128>}]} {
    %c0 = arith.constant 0 : index
    %c0_0 = arith.constant 0 : index
    %0 = vector.load %arg1[%c0, %c0_0] : memref<1024x1xi32, #tpu.memory_space<vmem>>, vector<1024x1xi32>
    %1 = tpu.iota {dimensions = array<i32: 1>} : vector<1024x128xi32>
    %2 = vector.broadcast %0 : vector<1024x1xi32> to vector<1024x128xi32>
    %3 = arith.cmpi eq, %1, %2 : vector<1024x128xi32>
    %4 = arith.extui %3 : vector<1024x128xi1> to vector<1024x128xi32>
    %5 = arith.sitofp %4 : vector<1024x128xi32> to vector<1024x128xf32>
    %6 = arith.truncf %5 : vector<1024x128xf32> to vector<1024x128xbf16>
    %c0_1 = arith.constant 0 : index
    %c0_2 = arith.constant 0 : index
    %7 = vector.load %arg2[%c0_1, %c0_2] : memref<128x64xbf16, #tpu.memory_space<vmem>>, vector<128x64xbf16>
    %cst = arith.constant dense<0.000000e+00> : vector<1024x64xf32>
    %8 = tpu.matmul %6, %7, %cst {dimension_numbers = #tpu.dot_dimension_numbers<[1], [0], [0], [1], [0, 0, 1, 1], [], []>} : vector<1024x128xbf16>, vector<128x64xbf16>, vector<1024x64xf32> -> vector<1024x64xf32>
    %c0_3 = arith.constant 0 : index
    %c0_4 = arith.constant 0 : index
    %9 = vector.load %arg3[%c0_3, %c0_4] : memref<1x64xf32, #tpu.memory_space<vmem>>, vector<1x64xf32>
    %10 = vector.broadcast %9 : vector<1x64xf32> to vector<1024x64xf32>
    %11 = arith.addf %8, %10 : vector<1024x64xf32>
    %12 = math.tanh %11 : vector<1024x64xf32>
    %13 = arith.truncf %12 : vector<1024x64xf32> to vector<1024x64xbf16>
    %c0_5 = arith.constant 0 : index
    %c0_6 = arith.constant 0 : index
    %14 = vector.load %arg4[%c0_5, %c0_6] : memref<64x128xbf16, #tpu.memory_space<vmem>>, vector<64x128xbf16>
    %cst_7 = arith.constant dense<0.000000e+00> : vector<1024x128xf32>
    %15 = tpu.matmul %13, %14, %cst_7 {dimension_numbers = #tpu.dot_dimension_numbers<[1], [0], [0], [1], [0, 0, 1, 1], [], []>} : vector<1024x64xbf16>, vector<64x128xbf16>, vector<1024x128xf32> -> vector<1024x128xf32>
    %cst_8 = arith.constant dense<0xFF800000> : vector<1024xf32>
    %16 = vector.multi_reduction <maximumf>, %15, %cst_8 [1] : vector<1024x128xf32> to vector<1024xf32>
    %17 = vector.shape_cast %16 : vector<1024xf32> to vector<1024x1xf32>
    %18 = vector.broadcast %17 : vector<1024x1xf32> to vector<1024x128xf32>
    %19 = arith.subf %15, %18 : vector<1024x128xf32>
    %20 = math.exp %19 : vector<1024x128xf32>
    %cst_9 = arith.constant dense<0.000000e+00> : vector<1024xf32>
    %21 = vector.multi_reduction <add>, %20, %cst_9 [1] : vector<1024x128xf32> to vector<1024xf32>
    %22 = vector.shape_cast %21 : vector<1024xf32> to vector<1024x1xf32>
    %23 = vector.extract_strided_slice %6 {offsets = [128, 0], sizes = [128, 128], strides = [1, 1]} : vector<1024x128xbf16> to vector<128x128xbf16>
    %24 = vector.extract_strided_slice %15 {offsets = [0, 0], sizes = [128, 128], strides = [1, 1]} : vector<1024x128xf32> to vector<128x128xf32>
    %25 = arith.extf %23 : vector<128x128xbf16> to vector<128x128xf32>
    %26 = arith.mulf %25, %24 : vector<128x128xf32>
    %27 = vector.extract_strided_slice %17 {offsets = [0, 0], sizes = [128, 1], strides = [1, 1]} : vector<1024x1xf32> to vector<128x1xf32>
    %28 = vector.extract_strided_slice %22 {offsets = [0, 0], sizes = [128, 1], strides = [1, 1]} : vector<1024x1xf32> to vector<128x1xf32>
    %29 = vector.extract_strided_slice %6 {offsets = [256, 0], sizes = [128, 128], strides = [1, 1]} : vector<1024x128xbf16> to vector<128x128xbf16>
    %30 = vector.extract_strided_slice %15 {offsets = [128, 0], sizes = [128, 128], strides = [1, 1]} : vector<1024x128xf32> to vector<128x128xf32>
    %31 = arith.extf %29 : vector<128x128xbf16> to vector<128x128xf32>
    %32 = arith.mulf %31, %30 : vector<128x128xf32>
    %33 = arith.addf %26, %32 : vector<128x128xf32>
    %34 = vector.extract_strided_slice %17 {offsets = [128, 0], sizes = [128, 1], strides = [1, 1]} : vector<1024x1xf32> to vector<128x1xf32>
    %35 = arith.addf %27, %34 : vector<128x1xf32>
    %36 = vector.extract_strided_slice %22 {offsets = [128, 0], sizes = [128, 1], strides = [1, 1]} : vector<1024x1xf32> to vector<128x1xf32>
    %37 = arith.mulf %28, %36 : vector<128x1xf32>
    %38 = vector.extract_strided_slice %6 {offsets = [384, 0], sizes = [128, 128], strides = [1, 1]} : vector<1024x128xbf16> to vector<128x128xbf16>
    %39 = vector.extract_strided_slice %15 {offsets = [256, 0], sizes = [128, 128], strides = [1, 1]} : vector<1024x128xf32> to vector<128x128xf32>
    %40 = arith.extf %38 : vector<128x128xbf16> to vector<128x128xf32>
    %41 = arith.mulf %40, %39 : vector<128x128xf32>
    %42 = arith.addf %33, %41 : vector<128x128xf32>
    %43 = vector.extract_strided_slice %17 {offsets = [256, 0], sizes = [128, 1], strides = [1, 1]} : vector<1024x1xf32> to vector<128x1xf32>
    %44 = arith.addf %35, %43 : vector<128x1xf32>
    %45 = vector.extract_strided_slice %22 {offsets = [256, 0], sizes = [128, 1], strides = [1, 1]} : vector<1024x1xf32> to vector<128x1xf32>
    %46 = arith.mulf %37, %45 : vector<128x1xf32>
    %47 = vector.extract_strided_slice %6 {offsets = [512, 0], sizes = [128, 128], strides = [1, 1]} : vector<1024x128xbf16> to vector<128x128xbf16>
    %48 = vector.extract_strided_slice %15 {offsets = [384, 0], sizes = [128, 128], strides = [1, 1]} : vector<1024x128xf32> to vector<128x128xf32>
    %49 = arith.extf %47 : vector<128x128xbf16> to vector<128x128xf32>
    %50 = arith.mulf %49, %48 : vector<128x128xf32>
    %51 = arith.addf %42, %50 : vector<128x128xf32>
    %52 = vector.extract_strided_slice %17 {offsets = [384, 0], sizes = [128, 1], strides = [1, 1]} : vector<1024x1xf32> to vector<128x1xf32>
    %53 = arith.addf %44, %52 : vector<128x1xf32>
    %54 = vector.extract_strided_slice %22 {offsets = [384, 0], sizes = [128, 1], strides = [1, 1]} : vector<1024x1xf32> to vector<128x1xf32>
    %55 = arith.mulf %46, %54 : vector<128x1xf32>
    %56 = vector.extract_strided_slice %6 {offsets = [640, 0], sizes = [128, 128], strides = [1, 1]} : vector<1024x128xbf16> to vector<128x128xbf16>
    %57 = vector.extract_strided_slice %15 {offsets = [512, 0], sizes = [128, 128], strides = [1, 1]} : vector<1024x128xf32> to vector<128x128xf32>
    %58 = arith.extf %56 : vector<128x128xbf16> to vector<128x128xf32>
    %59 = arith.mulf %58, %57 : vector<128x128xf32>
    %60 = arith.addf %51, %59 : vector<128x128xf32>
    %61 = vector.extract_strided_slice %17 {offsets = [512, 0], sizes = [128, 1], strides = [1, 1]} : vector<1024x1xf32> to vector<128x1xf32>
    %62 = arith.addf %53, %61 : vector<128x1xf32>
    %63 = vector.extract_strided_slice %22 {offsets = [512, 0], sizes = [128, 1], strides = [1, 1]} : vector<1024x1xf32> to vector<128x1xf32>
    %64 = arith.mulf %55, %63 : vector<128x1xf32>
    %65 = vector.extract_strided_slice %6 {offsets = [768, 0], sizes = [128, 128], strides = [1, 1]} : vector<1024x128xbf16> to vector<128x128xbf16>
    %66 = vector.extract_strided_slice %15 {offsets = [640, 0], sizes = [128, 128], strides = [1, 1]} : vector<1024x128xf32> to vector<128x128xf32>
    %67 = arith.extf %65 : vector<128x128xbf16> to vector<128x128xf32>
    %68 = arith.mulf %67, %66 : vector<128x128xf32>
    %69 = arith.addf %60, %68 : vector<128x128xf32>
    %70 = vector.extract_strided_slice %17 {offsets = [640, 0], sizes = [128, 1], strides = [1, 1]} : vector<1024x1xf32> to vector<128x1xf32>
    %71 = arith.addf %62, %70 : vector<128x1xf32>
    %72 = vector.extract_strided_slice %22 {offsets = [640, 0], sizes = [128, 1], strides = [1, 1]} : vector<1024x1xf32> to vector<128x1xf32>
    %73 = arith.mulf %64, %72 : vector<128x1xf32>
    %74 = vector.extract_strided_slice %6 {offsets = [896, 0], sizes = [128, 128], strides = [1, 1]} : vector<1024x128xbf16> to vector<128x128xbf16>
    %75 = vector.extract_strided_slice %15 {offsets = [768, 0], sizes = [128, 128], strides = [1, 1]} : vector<1024x128xf32> to vector<128x128xf32>
    %76 = arith.extf %74 : vector<128x128xbf16> to vector<128x128xf32>
    %77 = arith.mulf %76, %75 : vector<128x128xf32>
    %78 = arith.addf %69, %77 : vector<128x128xf32>
    %79 = vector.extract_strided_slice %17 {offsets = [768, 0], sizes = [128, 1], strides = [1, 1]} : vector<1024x1xf32> to vector<128x1xf32>
    %80 = arith.addf %71, %79 : vector<128x1xf32>
    %81 = vector.extract_strided_slice %22 {offsets = [768, 0], sizes = [128, 1], strides = [1, 1]} : vector<1024x1xf32> to vector<128x1xf32>
    %82 = arith.mulf %73, %81 : vector<128x1xf32>
    %cst_10 = arith.constant dense<0.000000e+00> : vector<128xf32>
    %83 = vector.multi_reduction <add>, %78, %cst_10 [1] : vector<128x128xf32> to vector<128xf32>
    %84 = vector.shape_cast %83 : vector<128xf32> to vector<128x1xf32>
    %85 = arith.subf %84, %80 : vector<128x1xf32>
    %86 = math.log %82 : vector<128x1xf32>
    %87 = arith.subf %85, %86 : vector<128x1xf32>
    %cst_11 = arith.constant 0.142857149 : f32
    %88 = vector.broadcast %cst_11 : f32 to vector<128x1xf32>
    %89 = arith.mulf %87, %88 : vector<128x1xf32>
    %90 = math.exp %89 : vector<128x1xf32>
    %91 = vector.shape_cast %90 : vector<128x1xf32> to vector<1x128xf32>
    %c0_12 = arith.constant 0 : index
    %c0_13 = arith.constant 0 : index
    %92 = vector.load %arg5[%c0_12, %c0_13] : memref<1x128xf32, #tpu.memory_space<vmem>>, vector<1x128xf32>
    tpu.vector_store %arg5[%c0_12, %c0_13], %91 {strides = array<i32>} : memref<1x128xf32, #tpu.memory_space<vmem>>, vector<1x128xf32>,
    return
  }
  func.func @transform_0(%arg0: i32) -> (i32, i32) {
    %c0_i32 = arith.constant 0 : i32
    %c0_i32_0 = arith.constant 0 : i32
    return %arg0, %c0_i32 : i32, i32
  }
  func.func @transform_1(%arg0: i32) -> (i32, i32) {
    %c0_i32 = arith.constant 0 : i32
    %c0_i32_0 = arith.constant 0 : i32
    %c0_i32_1 = arith.constant 0 : i32
    return %c0_i32, %c0_i32_0 : i32, i32
  }
  func.func @transform_2(%arg0: i32) -> (i32, i32) {
    %c0_i32 = arith.constant 0 : i32
    %c0_i32_0 = arith.constant 0 : i32
    %c0_i32_1 = arith.constant 0 : i32
    return %c0_i32, %c0_i32_0 : i32, i32
  }
  func.func @transform_3(%arg0: i32) -> (i32, i32) {
    %c0_i32 = arith.constant 0 : i32
    %c0_i32_0 = arith.constant 0 : i32
    %c0_i32_1 = arith.constant 0 : i32
    return %c0_i32, %c0_i32_0 : i32, i32
  }
  func.func @transform_4(%arg0: i32) -> (i32, i32) {
    %c0_i32 = arith.constant 0 : i32
    %c0_i32_0 = arith.constant 0 : i32
    return %c0_i32, %arg0 : i32, i32
  }
}

</mosaic_0001>

<bundles_post_ra>
// kernel: tpu_custom_call.1
= control target key start
LH: loop header
LB: loop body
LE: loop exit
PB: predicated region body
PF: predicated region fallthrough
CT: control target
= control target key end

     0   :  { %v5464_v2 = vmov 0   ;;  %s9528_s0 = inlined_call_operand.vmem [shape: s32[1024,1], index: 0, kind: input, shape index: {}]   ;;  %s9529_s1 = inlined_call_operand.vmem [shape: bf16[128,64], index: 1, kind: input, shape index: {}]   ;;  %s9530_s2 = inlined_call_operand.vmem [shape: f32[1,64], index: 2, kind: input, shape index: {}]   ;;  %s9531_s3 = inlined_call_operand.vmem [shape: bf16[64,128], index: 3, kind: input, shape index: {}]   ;;  %s9532_s4 = inlined_call_operand.hbm [shape: f32[1,128], index: 4, kind: output, shape index: {}]  }
   0x1   :  { %v21_v0 = vld [vmem:[%s9528_s0 + $0x10] sm:$0xff]  ;;  %v19_v1 = vld [vmem:[%s9528_s0] sm:$0xff]  ;;  %4882 = vset.pattern.permute.xlu1 %v5464_v2  ;;  %4881 = vset.pattern.permute.xlu0 %v5464_v2  ;;  %v22_v3 = vld [vmem:[%s9528_s0 + $0x18] sm:$0xff] }
   0x2   :  { %156 = vperm.xlu1 %4882, %v21_v0   ;;  %150 = vperm.xlu0 %4881, %v19_v1   ;;  %v20_v4 = vld [vmem:[%s9528_s0 + $0x8] sm:$0xff]  ;;  %v23_v6 = vld [vmem:[%s9528_s0 + $0x20] sm:$0xff]  ;;  %v26_v7 = vld [vmem:[%s9528_s0 + $0x38] sm:$0xff] }
   0x3   :  { %v24_v5 = vld [vmem:[%s9528_s0 + $0x28] sm:$0xff]  ;;  %v25_v8 = vld [vmem:[%s9528_s0 + $0x30] sm:$0xff]  ;;  %v27_v10 = vld [vmem:[%s9528_s0 + $0x40] sm:$0xff] }
   0x4   :  { %v28_v9 = vld [vmem:[%s9528_s0 + $0x48] sm:$0xff]  ;;  %v30_v11 = vld [vmem:[%s9528_s0 + $0x58] sm:$0xff]  ;;  %v29_v12 = vld [vmem:[%s9528_s0 + $0x50] sm:$0xff] }
   0x5   :  { %v4883_v13 = vld [vmem:[%s9529_s1] sm:$0xff]   ;;  %v4884_v14 = vld [vmem:[%s9529_s1 + $0x8] sm:$0xff]   ;;  %v4885_v17 = vld [vmem:[%s9529_s1 + $0x10] sm:$0xff]  }
   0x6   :  { %159 = vperm.xlu1 %4882, %v22_v3   ;;  %153 = vperm.xlu0 %4881, %v20_v4   ;;  %v32_v15 = vld [vmem:[%s9528_s0 + $0x68] sm:$0xff]  ;;  %v31_v16 = vld [vmem:[%s9528_s0 + $0x60] sm:$0xff]  ;;  %v34_v18 = vld [vmem:[%s9528_s0 + $0x78] sm:$0xff] }
   0x7   :  { %4597 = vmatprep.subr.bf16.mxu0 %v4883_v13  ;;  %v33_v19 = vld [vmem:[%s9528_s0 + $0x70] sm:$0xff]  ;;  %v4886_v20 = vld [vmem:[%s9529_s1 + $0x18] sm:$0xff]   ;;  %v36_v21 = vld [vmem:[%s9528_s0 + $0x88] sm:$0xff] }
   0x8   :  { %4598 = vmatpush3.bf16.msra.mxu0 %v4883_v13  ;;  %v35_v22 = vld [vmem:[%s9528_s0 + $0x80] sm:$0xff]  ;;  %v38_v24 = vld [vmem:[%s9528_s0 + $0x98] sm:$0xff]  ;;  %v37_v25 = vld [vmem:[%s9528_s0 + $0x90] sm:$0xff] }
   0x9   :  { %4599 = vmatprep.subr.bf16.mxu0 %v4884_v14  ;;  %v4887_v23 = vld [vmem:[%s9529_s1 + $0x20] sm:$0xff]   ;;  %v4888_v26 = vld [vmem:[%s9529_s1 + $0x28] sm:$0xff]  }
   0xa   :  { %165 = vperm.xlu1 %4882, %v24_v5   ;;  %162 = vperm.xlu0 %4881, %v23_v6  }
   0xc   :  { %4600 = vmatpush3.bf16.msra.mxu0 %v4884_v14 }
   0xd   :  { %4601 = vmatprep.subr.bf16.mxu0 %v4885_v17 }
   0xe   :  { %171 = vperm.xlu1 %4882, %v26_v7   ;;  %168 = vperm.xlu0 %4881, %v25_v8  }
  0x10   :  { %4602 = vmatpush3.bf16.msra.mxu0 %v4885_v17 }
  0x11   :  { %4603 = vmatprep.subr.bf16.mxu0 %v4886_v20 }
  0x12   :  { %177 = vperm.xlu1 %4882, %v28_v9   ;;  %174 = vperm.xlu0 %4881, %v27_v10  }
  0x14   :  { %4604 = vmatpush3.bf16.msra.mxu0 %v4886_v20 }
  0x15   :  { %4605 = vmatprep.subr.bf16.mxu0 %v4887_v23 }
  0x16   :  { %183 = vperm.xlu1 %4882, %v30_v11   ;;  %180 = vperm.xlu0 %4881, %v29_v12  }
  0x18   :  { %4606 = vmatpush3.bf16.msra.mxu0 %v4887_v23 }
  0x1a   :  { %189 = vperm.xlu1 %4882, %v32_v15   ;;  %186 = vperm.xlu0 %4881, %v31_v16  }
  0x1e   :  { %195 = vperm.xlu1 %4882, %v34_v18   ;;  %192 = vperm.xlu0 %4881, %v33_v19  }
  0x22   :  { %201 = vperm.xlu1 %4882, %v36_v21   ;;  %198 = vperm.xlu0 %4881, %v35_v22  }
  0x26   :  { %207 = vperm.xlu1 %4882, %v38_v24   ;;  %204 = vperm.xlu0 %4881, %v37_v25  }
  0x27   :  { %9 = vsyncpa [#allocation3], 0  ;;  %v40_v27 = vld [vmem:[%s9528_s0 + $0xa8] sm:$0xff]  ;;  %v39_v28 = vld [vmem:[%s9528_s0 + $0xa0] sm:$0xff]  ;;  %4607 = vmatprep.subr.bf16.mxu0 %v4888_v26  ;;  %v9579_v9 = vlaneseq  ;;  %v9655_v21 = vmov 1.0|1.0  }
  0x28   :  { %v4889_v29 = vld [vmem:[%s9529_s1 + $0x30] sm:$0xff]   ;;  %4608 = vmatpush3.bf16.msra.mxu0 %v4888_v26  ;;  %v42_v30 = vld [vmem:[%s9528_s0 + $0xb8] sm:$0xff]  ;;  %v44_v33 = vld [vmem:[%s9528_s0 + $0xc8] sm:$0xff] }
  0x29   :  { %v41_v31 = vld [vmem:[%s9528_s0 + $0xb0] sm:$0xff]  ;;  %4609 = vmatprep.subr.bf16.mxu0 %v4889_v29  ;;  %v4890_v32 = vld [vmem:[%s9529_s1 + $0x38] sm:$0xff]   ;;  %v43_v34 = vld [vmem:[%s9528_s0 + $0xc0] sm:$0xff]  ;;  %v5716_v14 = vand.u32 127, %v9579_v9 }
  0x2a   :  { %213 = vperm.xlu1 %4882, %v40_v27   ;;  %210 = vperm.xlu0 %4881, %v39_v28   ;;  %v46_v35 = vld [vmem:[%s9528_s0 + $0xd8] sm:$0xff]  ;;  %v45_v36 = vld [vmem:[%s9528_s0 + $0xd0] sm:$0xff]  ;;  %v48_v37 = vld [vmem:[%s9528_s0 + $0xe8] sm:$0xff] }
  0x2b   :  { %v47_v38 = vld [vmem:[%s9528_s0 + $0xe0] sm:$0xff]  ;;  %v50_v39 = vld [vmem:[%s9528_s0 + $0xf8] sm:$0xff]  ;;  %v49_v40 = vld [vmem:[%s9528_s0 + $0xf0] sm:$0xff]  ;;  %9921 = vst [vmem:[#allocation5_spill] sm:$0xff] %v5716_v14 }
  0x2c   :  { %4610 = vmatpush3.bf16.msra.mxu0 %v4889_v29  ;;  %v52_v41 = vld [vmem:[%s9528_s0 + $0x108] sm:$0xff]  ;;  %v51_v42 = vld [vmem:[%s9528_s0 + $0x100] sm:$0xff]  ;;  %v54_v43 = vld [vmem:[%s9528_s0 + $0x118] sm:$0xff] }
  0x2d   :  { %4611 = vmatprep.subr.bf16.mxu0 %v4890_v32  ;;  %v53_v44 = vld [vmem:[%s9528_s0 + $0x110] sm:$0xff]  ;;  %v56_v45 = vld [vmem:[%s9528_s0 + $0x128] sm:$0xff]  ;;  %v55_v46 = vld [vmem:[%s9528_s0 + $0x120] sm:$0xff] }
  0x2e   :  { %219 = vperm.xlu1 %4882, %v42_v30   ;;  %216 = vperm.xlu0 %4881, %v41_v31   ;;  %v58_v47 = vld [vmem:[%s9528_s0 + $0x138] sm:$0xff]  ;;  %v57_v48 = vld [vmem:[%s9528_s0 + $0x130] sm:$0xff]  ;;  %v60_v49 = vld [vmem:[%s9528_s0 + $0x148] sm:$0xff] }
  0x2f   :  { %v59_v50 = vld [vmem:[%s9528_s0 + $0x140] sm:$0xff]  ;;  %v62_v51 = vld [vmem:[%s9528_s0 + $0x158] sm:$0xff]  ;;  %v61_v52 = vld [vmem:[%s9528_s0 + $0x150] sm:$0xff] }
  0x30   :  { %4612 = vmatpush3.bf16.msra.mxu0 %v4890_v32  ;;  %v64_v53 = vld [vmem:[%s9528_s0 + $0x168] sm:$0xff]  ;;  %v63_v54 = vld [vmem:[%s9528_s0 + $0x160] sm:$0xff]  ;;  %v66_v55 = vld [vmem:[%s9528_s0 + $0x178] sm:$0xff] }
  0x31   :  { %v65_v56 = vld [vmem:[%s9528_s0 + $0x170] sm:$0xff]  ;;  %v68_v57 = vld [vmem:[%s9528_s0 + $0x188] sm:$0xff]  ;;  %v67_v58 = vld [vmem:[%s9528_s0 + $0x180] sm:$0xff] }
  0x32   :  { %225 = vperm.xlu1 %4882, %v44_v33   ;;  %222 = vperm.xlu0 %4881, %v43_v34   ;;  %v70_v59 = vld [vmem:[%s9528_s0 + $0x198] sm:$0xff]  ;;  %v69_v60 = vld [vmem:[%s9528_s0 + $0x190] sm:$0xff]  ;;  %v72_v61 = vld [vmem:[%s9528_s0 + $0x1a8] sm:$0xff] }
  0x33   :  { %v71_v62 = vld [vmem:[%s9528_s0 + $0x1a0] sm:$0xff]  ;;  %v74_v63 = vld [vmem:[%s9528_s0 + $0x1b8] sm:$0xff]  ;;  %v73_v0 = vld [vmem:[%s9528_s0 + $0x1b0] sm:$0xff] }
  0x34   :  { %v76_v1 = vld [vmem:[%s9528_s0 + $0x1c8] sm:$0xff]  ;;  %v75_v2 = vld [vmem:[%s9528_s0 + $0x1c0] sm:$0xff]  ;;  %v78_v3 = vld [vmem:[%s9528_s0 + $0x1d8] sm:$0xff] }
  0x35   :  { %v77_v4 = vld [vmem:[%s9528_s0 + $0x1d0] sm:$0xff]  ;;  %v80_v5 = vld [vmem:[%s9528_s0 + $0x1e8] sm:$0xff]  ;;  %v79_v6 = vld [vmem:[%s9528_s0 + $0x1e0] sm:$0xff] }
  0x36   :  { %231 = vperm.xlu1 %4882, %v46_v35   ;;  %228 = vperm.xlu0 %4881, %v45_v36   ;;  %v82_v7 = vld [vmem:[%s9528_s0 + $0x1f8] sm:$0xff]  ;;  %v81_v8 = vld [vmem:[%s9528_s0 + $0x1f0] sm:$0xff]  ;;  %v84_v10 = vld [vmem:[%s9528_s0 + $0x208] sm:$0xff] }
  0x37   :  { %v83_v11 = vld [vmem:[%s9528_s0 + $0x200] sm:$0xff]  ;;  %v86_v15 = vld [vmem:[%s9528_s0 + $0x218] sm:$0xff]  ;;  %v85_v16 = vld [vmem:[%s9528_s0 + $0x210] sm:$0xff] }
  0x38   :  { %v88_v19 = vld [vmem:[%s9528_s0 + $0x228] sm:$0xff]  ;;  %v87_v20 = vld [vmem:[%s9528_s0 + $0x220] sm:$0xff]  ;;  %v90_v24 = vld [vmem:[%s9528_s0 + $0x238] sm:$0xff] }
  0x39   :  { %v89_v25 = vld [vmem:[%s9528_s0 + $0x230] sm:$0xff]  ;;  %v92_v28 = vld [vmem:[%s9528_s0 + $0x248] sm:$0xff]  ;;  %v91_v29 = vld [vmem:[%s9528_s0 + $0x240] sm:$0xff] }
  0x3a   :  { %237 = vperm.xlu1 %4882, %v48_v37   ;;  %234 = vperm.xlu0 %4881, %v47_v38   ;;  %v94_v32 = vld [vmem:[%s9528_s0 + $0x258] sm:$0xff]  ;;  %v93_v33 = vld [vmem:[%s9528_s0 + $0x250] sm:$0xff]  ;;  %v96_v36 = vld [vmem:[%s9528_s0 + $0x268] sm:$0xff] }
  0x3b   :  { %v95_v37 = vld [vmem:[%s9528_s0 + $0x260] sm:$0xff] }
  0x3e   :  { %243 = vperm.xlu1 %4882, %v50_v39   ;;  %240 = vperm.xlu0 %4881, %v49_v40   ;;  %v98_v40 = vld [vmem:[%s9528_s0 + $0x278] sm:$0xff] }
  0x42   :  { %249 = vperm.xlu1 %4882, %v52_v41   ;;  %246 = vperm.xlu0 %4881, %v51_v42   ;;  %v97_v41 = vld [vmem:[%s9528_s0 + $0x270] sm:$0xff] }
  0x46   :  { %255 = vperm.xlu1 %4882, %v54_v43   ;;  %252 = vperm.xlu0 %4881, %v53_v44   ;;  %v100_v44 = vld [vmem:[%s9528_s0 + $0x288] sm:$0xff] }
  0x4a   :  { %261 = vperm.xlu1 %4882, %v56_v45   ;;  %258 = vperm.xlu0 %4881, %v55_v46   ;;  %v99_v45 = vld [vmem:[%s9528_s0 + $0x280] sm:$0xff] }
  0x4e   :  { %267 = vperm.xlu1 %4882, %v58_v47   ;;  %264 = vperm.xlu0 %4881, %v57_v48   ;;  %v102_v48 = vld [vmem:[%s9528_s0 + $0x298] sm:$0xff] }
  0x52   :  { %273 = vperm.xlu1 %4882, %v60_v49   ;;  %270 = vperm.xlu0 %4881, %v59_v50   ;;  %v101_v49 = vld [vmem:[%s9528_s0 + $0x290] sm:$0xff] }
  0x56   :  { %279 = vperm.xlu1 %4882, %v62_v51   ;;  %276 = vperm.xlu0 %4881, %v61_v52   ;;  %v104_v52 = vld [vmem:[%s9528_s0 + $0x2a8] sm:$0xff] }
  0x5a   :  { %285 = vperm.xlu1 %4882, %v64_v53   ;;  %282 = vperm.xlu0 %4881, %v63_v54   ;;  %v103_v53 = vld [vmem:[%s9528_s0 + $0x2a0] sm:$0xff] }
  0x5e   :  { %291 = vperm.xlu1 %4882, %v66_v55   ;;  %288 = vperm.xlu0 %4881, %v65_v56   ;;  %v106_v56 = vld [vmem:[%s9528_s0 + $0x2b8] sm:$0xff] }
  0x62   :  { %297 = vperm.xlu1 %4882, %v68_v57   ;;  %294 = vperm.xlu0 %4881, %v67_v58   ;;  %v105_v57 = vld [vmem:[%s9528_s0 + $0x2b0] sm:$0xff] }
  0x66   :  { %303 = vperm.xlu1 %4882, %v70_v59   ;;  %300 = vperm.xlu0 %4881, %v69_v60   ;;  %v108_v60 = vld [vmem:[%s9528_s0 + $0x2c8] sm:$0xff] }
  0x6a   :  { %309 = vperm.xlu1 %4882, %v72_v61   ;;  %306 = vperm.xlu0 %4881, %v71_v62   ;;  %v107_v61 = vld [vmem:[%s9528_s0 + $0x2c0] sm:$0xff] }
  0x6e   :  { %315 = vperm.xlu1 %4882, %v74_v63   ;;  %312 = vperm.xlu0 %4881, %v73_v0   ;;  %v110_v0 = vld [vmem:[%s9528_s0 + $0x2d8] sm:$0xff] }
  0x72   :  { %321 = vperm.xlu1 %4882, %v76_v1   ;;  %318 = vperm.xlu0 %4881, %v75_v2   ;;  %v109_v1 = vld [vmem:[%s9528_s0 + $0x2d0] sm:$0xff] }
  0x76   :  { %327 = vperm.xlu1 %4882, %v78_v3   ;;  %324 = vperm.xlu0 %4881, %v77_v4   ;;  %v112_v4 = vld [vmem:[%s9528_s0 + $0x2e8] sm:$0xff] }
  0x7a   :  { %333 = vperm.xlu1 %4882, %v80_v5   ;;  %330 = vperm.xlu0 %4881, %v79_v6   ;;  %v111_v5 = vld [vmem:[%s9528_s0 + $0x2e0] sm:$0xff] }
  0x7e   :  { %339 = vperm.xlu1 %4882, %v82_v7   ;;  %336 = vperm.xlu0 %4881, %v81_v8   ;;  %v114_v8 = vld [vmem:[%s9528_s0 + $0x2f8] sm:$0xff] }
  0x81   :  { %v157_v12 = vpop.permute.xlu1 %156  ;;  %v151_v13 = vpop.permute.xlu0 %150 }
  0x82   :  { %345 = vperm.xlu1 %4882, %v84_v10   ;;  %342 = vperm.xlu0 %4881, %v83_v11   ;;  %vm535_vm0 = vcmp.eq.s32.totalorder %v5716_v14, %v157_v12  ;;  %vm533_vm4 = vcmp.eq.s32.totalorder %v5716_v14, %v151_v13  ;;  %v113_v10 = vld [vmem:[%s9528_s0 + $0x2f0] sm:$0xff]  ;;  %v116_v13 = vld [vmem:[%s9528_s0 + $0x308] sm:$0xff] }
  0x85   :  { %v160_v17 = vpop.permute.xlu1 %159  ;;  %v154_v18 = vpop.permute.xlu0 %153 }
  0x86   :  { %vm536_vm1 = vcmp.eq.s32.totalorder %v5716_v14, %v160_v17  ;;  %351 = vperm.xlu1 %4882, %v86_v15   ;;  %348 = vperm.xlu0 %4881, %v85_v16   ;;  %vm534_vm2 = vcmp.eq.s32.totalorder %v5716_v14, %v154_v18  ;;  %v115_v15 = vld [vmem:[%s9528_s0 + $0x300] sm:$0xff]  ;;  %v118_v18 = vld [vmem:[%s9528_s0 + $0x318] sm:$0xff] }
  0x87   :  { %vm4263_vm3 = vmpackc.low %vm536_vm1, %vm535_vm0 }
  0x88   :  { %vm4261_vm5 = vmpackc.low %vm534_vm2, %vm533_vm4 }
  0x89   :  { %4613 = vmatprep.mubr.msk.bf16.mxu0 %vm4261_vm5, %v9655_v21  ;;  %v166_v22 = vpop.permute.xlu1 %165  ;;  %v163_v23 = vpop.permute.xlu0 %162 }
  0x8a   :  { %vm538_vm6 = vcmp.eq.s32.totalorder %v5716_v14, %v166_v22  ;;  %4614 = vmatmul.mubr.msk.bf16.vlgmr.msra.gmra.mrb[0].mxu0 %vm4263_vm3, %v9655_v21  ;;  %vm537_vm7 = vcmp.eq.s32.totalorder %v5716_v14, %v163_v23  ;;  %357 = vperm.xlu1 %4882, %v88_v19   ;;  %v117_v19 = vld [vmem:[%s9528_s0 + $0x310] sm:$0xff]  ;;  %v120_v23 = vld [vmem:[%s9528_s0 + $0x328] sm:$0xff] }
  0x8b   :  { %vm4265_vm8 = vmpackc.low %vm538_vm6, %vm537_vm7  ;;  %354 = vperm.xlu0 %4881, %v87_v20  }
  0x8c   :  { %4617 = vmatprep.mubr.msk.bf16.mxu0 %vm4265_vm8, %v9655_v21 }
  0x8d   :  { %v172_v26 = vpop.permute.xlu1 %171  ;;  %v169_v27 = vpop.permute.xlu0 %168 }
  0x8e   :  { %vm540_vm9 = vcmp.eq.s32.totalorder %v5716_v14, %v172_v26  ;;  %vm539_vm10 = vcmp.eq.s32.totalorder %v5716_v14, %v169_v27  ;;  %363 = vperm.xlu1 %4882, %v90_v24   ;;  %v119_v24 = vld [vmem:[%s9528_s0 + $0x320] sm:$0xff]  ;;  %v122_v27 = vld [vmem:[%s9528_s0 + $0x338] sm:$0xff] }
  0x8f   :  { %vm4267_vm11 = vmpackc.low %vm540_vm9, %vm539_vm10  ;;  %360 = vperm.xlu0 %4881, %v89_v25  }
  0x91   :  { %v178_v30 = vpop.permute.xlu1 %177  ;;  %v175_v31 = vpop.permute.xlu0 %174 }
  0x92   :  { %vm542_vm12 = vcmp.eq.s32.totalorder %v5716_v14, %v178_v30  ;;  %4618 = vmatmul.mubr.msk.bf16.gmra.mrb[4].mxu0 %vm4267_vm11, %v9655_v21  ;;  %vm541_vm13 = vcmp.eq.s32.totalorder %v5716_v14, %v175_v31  ;;  %369 = vperm.xlu1 %4882, %v92_v28   ;;  %v121_v28 = vld [vmem:[%s9528_s0 + $0x330] sm:$0xff]  ;;  %v124_v31 = vld [vmem:[%s9528_s0 + $0x348] sm:$0xff] }
  0x93   :  { %vm4269_vm14 = vmpackc.low %vm542_vm12, %vm541_vm13  ;;  %366 = vperm.xlu0 %4881, %v91_v29  }
  0x94   :  { %4621 = vmatprep.mubr.msk.bf16.mxu0 %vm4269_vm14, %v9655_v21 }
  0x95   :  { %v184_v34 = vpop.permute.xlu1 %183  ;;  %v181_v35 = vpop.permute.xlu0 %180 }
  0x96   :  { %vm544_vm15 = vcmp.eq.s32.totalorder %v5716_v14, %v184_v34  ;;  %vm543_vm0 = vcmp.eq.s32.totalorder %v5716_v14, %v181_v35  ;;  %375 = vperm.xlu1 %4882, %v94_v32   ;;  %v123_v32 = vld [vmem:[%s9528_s0 + $0x340] sm:$0xff]  ;;  %v126_v35 = vld [vmem:[%s9528_s0 + $0x358] sm:$0xff] }
  0x97   :  { %vm4271_vm1 = vmpackc.low %vm544_vm15, %vm543_vm0  ;;  %372 = vperm.xlu0 %4881, %v93_v33  }
  0x99   :  { %v190_v38 = vpop.permute.xlu1 %189  ;;  %v187_v39 = vpop.permute.xlu0 %186 }
  0x9a   :  { %vm546_vm2 = vcmp.eq.s32.totalorder %v5716_v14, %v190_v38  ;;  %4622 = vmatmul.mubr.msk.bf16.gmra.mrb[8].mxu0 %vm4271_vm1, %v9655_v21  ;;  %vm545_vm3 = vcmp.eq.s32.totalorder %v5716_v14, %v187_v39  ;;  %381 = vperm.xlu1 %4882, %v96_v36   ;;  %v125_v36 = vld [vmem:[%s9528_s0 + $0x350] sm:$0xff]  ;;  %v128_v39 = vld [vmem:[%s9528_s0 + $0x368] sm:$0xff] }
  0x9b   :  { %vm4273_vm4 = vmpackc.low %vm546_vm2, %vm545_vm3  ;;  %378 = vperm.xlu0 %4881, %v95_v37  }
  0x9c   :  { %4625 = vmatprep.mubr.msk.bf16.mxu0 %vm4273_vm4, %v9655_v21 }
  0x9d   :  { %v196_v42 = vpop.permute.xlu1 %195  ;;  %v193_v43 = vpop.permute.xlu0 %192 }
  0x9e   :  { %vm548_vm5 = vcmp.eq.s32.totalorder %v5716_v14, %v196_v42  ;;  %vm547_vm6 = vcmp.eq.s32.totalorder %v5716_v14, %v193_v43  ;;  %387 = vperm.xlu1 %4882, %v98_v40   ;;  %v127_v40 = vld [vmem:[%s9528_s0 + $0x360] sm:$0xff]  ;;  %v130_v43 = vld [vmem:[%s9528_s0 + $0x378] sm:$0xff] }
  0x9f   :  { %vm4275_vm7 = vmpackc.low %vm548_vm5, %vm547_vm6  ;;  %384 = vperm.xlu0 %4881, %v97_v41  }
  0xa1   :  { %v5789_v46 = vpop.permute.xlu1 %201  ;;  %v5791_v47 = vpop.permute.xlu0 %198 }
  0xa2   :  { %vm550_vm8 = vcmp.eq.s32.totalorder %v5716_v14, %v5789_v46  ;;  %4626 = vmatmul.mubr.msk.bf16.gmra.mrb[12].mxu0 %vm4275_vm7, %v9655_v21  ;;  %vm549_vm9 = vcmp.eq.s32.totalorder %v5716_v14, %v5791_v47  ;;  %393 = vperm.xlu1 %4882, %v100_v44   ;;  %v129_v44 = vld [vmem:[%s9528_s0 + $0x370] sm:$0xff] }
  0xa3   :  { %vm4277_vm10 = vmpackc.low %vm550_vm8, %vm549_vm9  ;;  %390 = vperm.xlu0 %4881, %v99_v45  }
  0xa4   :  { %4629 = vmatprep.mubr.msk.bf16.mxu0 %vm4277_vm10, %v9655_v21 }
  0xa5   :  { %v5811_v50 = vpop.permute.xlu1 %207  ;;  %v5813_v51 = vpop.permute.xlu0 %204 }
  0xa6   :  { %vm552_vm11 = vcmp.eq.s32.totalorder %v5716_v14, %v5811_v50  ;;  %vm551_vm12 = vcmp.eq.s32.totalorder %v5716_v14, %v5813_v51  ;;  %399 = vperm.xlu1 %4882, %v102_v48  }
  0xa7   :  { %vm4279_vm13 = vmpackc.low %vm552_vm11, %vm551_vm12  ;;  %396 = vperm.xlu0 %4881, %v101_v49   ;;  %v132_v49 = vld [vmem:[%s9528_s0 + $0x388] sm:$0xff] }
  0xa9   :  { %v5831_v54 = vpop.permute.xlu1 %213  ;;  %v5833_v55 = vpop.permute.xlu0 %210 }
  0xaa   :  { %vm554_vm14 = vcmp.eq.s32.totalorder %v5716_v14, %v5831_v54  ;;  %4630 = vmatmul.mubr.msk.bf16.gmra.mrb[16].mxu0 %vm4279_vm13, %v9655_v21  ;;  %vm553_vm15 = vcmp.eq.s32.totalorder %v5716_v14, %v5833_v55  ;;  %405 = vperm.xlu1 %4882, %v104_v52   ;;  %v4891_v52 = vld [vmem:[%s9531_s3] sm:$0xff]  }
  0xab   :  { %vm4281_vm0 = vmpackc.low %vm554_vm14, %vm553_vm15  ;;  %402 = vperm.xlu0 %4881, %v103_v53   ;;  %v131_v53 = vld [vmem:[%s9528_s0 + $0x380] sm:$0xff]  ;;  %4741 = vmatprep.subr.bf16.mxu1 %v4891_v52 }
  0xac   :  { %4633 = vmatprep.mubr.msk.bf16.mxu0 %vm4281_vm0, %v9655_v21  ;;  %4742 = vmatpush3.bf16.msra.mxu1 %v4891_v52 }
  0xad   :  { %v5853_v58 = vpop.permute.xlu1 %219  ;;  %v5855_v59 = vpop.permute.xlu0 %216 }
  0xae   :  { %vm556_vm1 = vcmp.eq.s32.totalorder %v5716_v14, %v5853_v58  ;;  %vm555_vm2 = vcmp.eq.s32.totalorder %v5716_v14, %v5855_v59  ;;  %411 = vperm.xlu1 %4882, %v106_v56  }
  0xaf   :  { %vm4283_vm3 = vmpackc.low %vm556_vm1, %vm555_vm2  ;;  %408 = vperm.xlu0 %4881, %v105_v57  }
  0xb1   :  { %v5873_v62 = vpop.permute.xlu1 %225  ;;  %v5875_v63 = vpop.permute.xlu0 %222 }
  0xb2   :  { %vm9567_vm4 = vcmp.eq.s32.totalorder %v5716_v14, %v5873_v62  ;;  %4634 = vmatmul.mubr.msk.bf16.gmra.mrb[20].mxu0 %vm4283_vm3, %v9655_v21  ;;  %vm557_vm5 = vcmp.eq.s32.totalorder %v5716_v14, %v5875_v63  ;;  %417 = vperm.xlu1 %4882, %v108_v60   ;;  %v134_v60 = vld [vmem:[%s9528_s0 + $0x398] sm:$0xff] }
  0xb3   :  { %vm4285_vm6 = vmpackc.low %vm9567_vm4, %vm557_vm5  ;;  %414 = vperm.xlu0 %4881, %v107_v61   ;;  %v4892_v61 = vld [vmem:[%s9531_s3 + $0x8] sm:$0xff]  }
  0xb4   :  { %4637 = vmatprep.mubr.msk.bf16.mxu0 %vm4285_vm6, %v9655_v21  ;;  %4743 = vmatprep.subr.bf16.mxu1 %v4892_v61 }
  0xb5   :  { %v5895_v2 = vpop.permute.xlu1 %231  ;;  %v5897_v3 = vpop.permute.xlu0 %228  ;;  %4744 = vmatpush3.bf16.msra.mxu1 %v4892_v61  ;;  %v145_v61 = vld [vmem:[%s9528_s0 + $0x3f0] sm:$0xff] }
  0xb6   :  { %vm9570_vm7 = vcmp.eq.s32.totalorder %v5716_v14, %v5895_v2  ;;  %vm559_vm10 = vcmp.eq.s32.totalorder %v5716_v14, %v5897_v3  ;;  %423 = vperm.xlu1 %4882, %v110_v0   ;;  %v133_v0 = vld [vmem:[%s9528_s0 + $0x390] sm:$0xff] }
  0xb7   :  { %vm4287_vm13 = vmpackc.low %vm9570_vm7, %vm559_vm10  ;;  %420 = vperm.xlu0 %4881, %v109_v1  }
  0xb9   :  { %v5915_v6 = vpop.permute.xlu1 %237  ;;  %v5917_v7 = vpop.permute.xlu0 %234 }
  0xba   :  { %vm9533_vm0 = vcmp.eq.s32.totalorder %v5716_v14, %v5915_v6  ;;  %4638 = vmatmul.mubr.msk.bf16.gmra.mrb[24].mxu0 %vm4287_vm13, %v9655_v21  ;;  %vm9534_vm3 = vcmp.eq.s32.totalorder %v5716_v14, %v5917_v7  ;;  %429 = vperm.xlu1 %4882, %v112_v4  }
  0xbb   :  { %vm4289_vm6 = vmpackc.low %vm9533_vm0, %vm9534_vm3  ;;  %426 = vperm.xlu0 %4881, %v111_v5   ;;  %v136_v5 = vld [vmem:[%s9528_s0 + $0x3a8] sm:$0xff] }
  0xbc   :  { %4641 = vmatprep.mubr.msk.bf16.mxu0 %vm4289_vm6, %v9655_v21 }
  0xbd   :  { %v5937_v11 = vpop.permute.xlu1 %243  ;;  %v5939_v12 = vpop.permute.xlu0 %240 }
  0xbe   :  { %vm9535_vm13 = vcmp.eq.s32.totalorder %v5716_v14, %v5937_v11  ;;  %vm9536_vm0 = vcmp.eq.s32.totalorder %v5716_v14, %v5939_v12  ;;  %435 = vperm.xlu1 %4882, %v114_v8   ;;  %v4893_v8 = vld [vmem:[%s9531_s3 + $0x10] sm:$0xff]  }
  0xbf   :  { %vm4291_vm6 = vmpackc.low %vm9535_vm13, %vm9536_vm0  ;;  %432 = vperm.xlu0 %4881, %v113_v10   ;;  %v135_v10 = vld [vmem:[%s9528_s0 + $0x3a0] sm:$0xff]  ;;  %4745 = vmatprep.subr.bf16.mxu1 %v4893_v8 }
  0xc0   :  { %4746 = vmatpush3.bf16.msra.mxu1 %v4893_v8 }
  0xc1   :  { %v5957_v16 = vpop.permute.xlu1 %249  ;;  %v5959_v17 = vpop.permute.xlu0 %246 }
  0xc2   :  { %vm9537_vm3 = vcmp.eq.s32.totalorder %v5716_v14, %v5957_v16  ;;  %4642 = vmatmul.mubr.msk.bf16.gmra.mrb[28].mxu0 %vm4291_vm6, %v9655_v21  ;;  %vm9538_vm13 = vcmp.eq.s32.totalorder %v5716_v14, %v5959_v17  ;;  %441 = vperm.xlu1 %4882, %v116_v13  }
  0xc3   :  { %vm4293_vm0 = vmpackc.low %vm9537_vm3, %vm9538_vm13  ;;  %438 = vperm.xlu0 %4881, %v115_v15  }
  0xc4   :  { %4645 = vmatprep.mubr.msk.bf16.mxu0 %vm4293_vm0, %v9655_v21 }
  0xc5   :  { %v5979_v20 = vpop.permute.xlu1 %255  ;;  %v5981_v22 = vpop.permute.xlu0 %252 }
  0xc6   :  { %vm9539_vm6 = vcmp.eq.s32.totalorder %v5716_v14, %v5979_v20  ;;  %vm9540_vm3 = vcmp.eq.s32.totalorder %v5716_v14, %v5981_v22  ;;  %447 = vperm.xlu1 %4882, %v118_v18   ;;  %v138_v18 = vld [vmem:[%s9528_s0 + $0x3b8] sm:$0xff] }
  0xc7   :  { %vm4295_vm0 = vmpackc.low %vm9539_vm6, %vm9540_vm3  ;;  %444 = vperm.xlu0 %4881, %v117_v19   ;;  %v4894_v19 = vld [vmem:[%s9531_s3 + $0x18] sm:$0xff]  }
  0xc8   :  { %4747 = vmatprep.subr.bf16.mxu1 %v4894_v19 }
  0xc9   :  { %v5999_v25 = vpop.permute.xlu1 %261  ;;  %v6001_v26 = vpop.permute.xlu0 %258  ;;  %4748 = vmatpush3.bf16.msra.mxu1 %v4894_v19 }
  0xca   :  { %vm9541_vm13 = vcmp.eq.s32.totalorder %v5716_v14, %v5999_v25  ;;  %4646 = vmatmul.mubr.msk.bf16.gmra.mrb[32].mxu0 %vm4295_vm0, %v9655_v21  ;;  %vm9542_vm6 = vcmp.eq.s32.totalorder %v5716_v14, %v6001_v26  ;;  %453 = vperm.xlu1 %4882, %v120_v23   ;;  %v137_v23 = vld [vmem:[%s9528_s0 + $0x3b0] sm:$0xff] }
  0xcb   :  { %vm4297_vm3 = vmpackc.low %vm9541_vm13, %vm9542_vm6  ;;  %450 = vperm.xlu0 %4881, %v119_v24  }
  0xcc   :  { %4649 = vmatprep.mubr.msk.bf16.mxu0 %vm4297_vm3, %v9655_v21 }
  0xcd   :  { %v6021_v29 = vpop.permute.xlu1 %267  ;;  %v6023_v30 = vpop.permute.xlu0 %264 }
  0xce   :  { %vm9543_vm0 = vcmp.eq.s32.totalorder %v5716_v14, %v6021_v29  ;;  %vm9544_vm13 = vcmp.eq.s32.totalorder %v5716_v14, %v6023_v30  ;;  %459 = vperm.xlu1 %4882, %v122_v27  }
  0xcf   :  { %vm4299_vm3 = vmpackc.low %vm9543_vm0, %vm9544_vm13  ;;  %456 = vperm.xlu0 %4881, %v121_v28   ;;  %v140_v28 = vld [vmem:[%s9528_s0 + $0x3c8] sm:$0xff] }
  0xd1   :  { %v6041_v33 = vpop.permute.xlu1 %273  ;;  %v6043_v34 = vpop.permute.xlu0 %270 }
  0xd2   :  { %vm9545_vm6 = vcmp.eq.s32.totalorder %v5716_v14, %v6041_v33  ;;  %4650 = vmatmul.mubr.msk.bf16.gmra.mrb[36].mxu0 %vm4299_vm3, %v9655_v21  ;;  %vm9546_vm0 = vcmp.eq.s32.totalorder %v5716_v14, %v6043_v34  ;;  %465 = vperm.xlu1 %4882, %v124_v31   ;;  %v139_v31 = vld [vmem:[%s9528_s0 + $0x3c0] sm:$0xff] }
  0xd3   :  { %vm4301_vm13 = vmpackc.low %vm9545_vm6, %vm9546_vm0  ;;  %462 = vperm.xlu0 %4881, %v123_v32  }
  0xd4   :  { %4653 = vmatprep.mubr.msk.bf16.mxu0 %vm4301_vm13, %v9655_v21 }
  0xd5   :  { %v6063_v37 = vpop.permute.xlu1 %279  ;;  %v6065_v38 = vpop.permute.xlu0 %276 }
  0xd6   :  { %vm9547_vm3 = vcmp.eq.s32.totalorder %v5716_v14, %v6063_v37  ;;  %vm9548_vm6 = vcmp.eq.s32.totalorder %v5716_v14, %v6065_v38  ;;  %471 = vperm.xlu1 %4882, %v126_v35  }
  0xd7   :  { %vm4303_vm13 = vmpackc.low %vm9547_vm3, %vm9548_vm6  ;;  %468 = vperm.xlu0 %4881, %v125_v36   ;;  %v142_v36 = vld [vmem:[%s9528_s0 + $0x3d8] sm:$0xff] }
  0xd9   :  { %v6083_v41 = vpop.permute.xlu1 %285  ;;  %v6085_v42 = vpop.permute.xlu0 %282 }
  0xda   :  { %vm9549_vm0 = vcmp.eq.s32.totalorder %v5716_v14, %v6083_v41  ;;  %4654 = vmatmul.mubr.msk.bf16.gmra.mrb[40].mxu0 %vm4303_vm13, %v9655_v21  ;;  %vm9551_vm3 = vcmp.eq.s32.totalorder %v5716_v14, %v6085_v42  ;;  %477 = vperm.xlu1 %4882, %v128_v39   ;;  %v141_v39 = vld [vmem:[%s9528_s0 + $0x3d0] sm:$0xff] }
  0xdb   :  { %vm4305_vm6 = vmpackc.low %vm9549_vm0, %vm9551_vm3  ;;  %474 = vperm.xlu0 %4881, %v127_v40  }
  0xdc   :  { %4657 = vmatprep.mubr.msk.bf16.mxu0 %vm4305_vm6, %v9655_v21 }
  0xdd   :  { %v6105_v45 = vpop.permute.xlu1 %291  ;;  %v6107_v48 = vpop.permute.xlu0 %288 }
  0xde   :  { %vm9550_vm13 = vcmp.eq.s32.totalorder %v5716_v14, %v6105_v45  ;;  %vm9552_vm0 = vcmp.eq.s32.totalorder %v5716_v14, %v6107_v48  ;;  %483 = vperm.xlu1 %4882, %v130_v43  }
  0xdf   :  { %vm4307_vm6 = vmpackc.low %vm9550_vm13, %vm9552_vm0  ;;  %480 = vperm.xlu0 %4881, %v129_v44   ;;  %v144_v44 = vld [vmem:[%s9528_s0 + $0x3e8] sm:$0xff] }
  0xe1   :  { %v6128_v56 = vpop.permute.xlu1 %297  ;;  %v6130_v57 = vpop.permute.xlu0 %294 }
  0xe2   :  { %vm9553_vm13 = vcmp.eq.s32.totalorder %v5716_v14, %v6128_v56  ;;  %4658 = vmatmul.mubr.msk.bf16.gmra.mrb[44].mxu0 %vm4307_vm6, %v9655_v21  ;;  %vm9555_vm3 = vcmp.eq.s32.totalorder %v5716_v14, %v6130_v57  ;;  %489 = vperm.xlu1 %4882, %v132_v49   ;;  %v143_v49 = vld [vmem:[%s9528_s0 + $0x3e0] sm:$0xff] }
  0xe3   :  { %vm4309_vm0 = vmpackc.low %vm9553_vm13, %vm9555_vm3  ;;  %486 = vperm.xlu0 %4881, %v131_v53  }
  0xe4   :  { %4661 = vmatprep.mubr.msk.bf16.mxu0 %vm4309_vm0, %v9655_v21 }
  0xe5   :  { %v6153_v1 = vpop.permute.xlu1 %303  ;;  %v6155_v4 = vpop.permute.xlu0 %300 }
  0xe6   :  { %vm9554_vm6 = vcmp.eq.s32.totalorder %v5716_v14, %v6153_v1  ;;  %vm9556_vm13 = vcmp.eq.s32.totalorder %v5716_v14, %v6155_v4  ;;  %495 = vperm.xlu1 %4882, %v134_v60   ;;  %v146_v60 = vld [vmem:[%s9528_s0 + $0x3f8] sm:$0xff] }
  0xe7   :  { %vm4311_vm0 = vmpackc.low %vm9554_vm6, %vm9556_vm13  ;;  %492 = vperm.xlu0 %4881, %v133_v0  }
  0xe9   :  { %v6176_v13 = vpop.permute.xlu1 %309  ;;  %v6178_v15 = vpop.permute.xlu0 %306 }
  0xea   :  { %vm9557_vm6 = vcmp.eq.s32.totalorder %v5716_v14, %v6176_v13  ;;  %4662 = vmatmul.mubr.msk.bf16.gmra.mrb[48].mxu0 %vm4311_vm0, %v9655_v21  ;;  %vm9558_vm3 = vcmp.eq.s32.totalorder %v5716_v14, %v6178_v15  ;;  %501 = vperm.xlu1 %4882, %v136_v5  }
  0xeb   :  { %vm4313_vm13 = vmpackc.low %vm9557_vm6, %vm9558_vm3  ;;  %498 = vperm.xlu0 %4881, %v135_v10  }
  0xec   :  { %4665 = vmatprep.mubr.msk.bf16.mxu0 %vm4313_vm13, %v9655_v21 }
  0xed   :  { %v6201_v24 = vpop.permute.xlu1 %315  ;;  %v6203_v27 = vpop.permute.xlu0 %312 }
  0xee   :  { %vm9559_vm0 = vcmp.eq.s32.totalorder %v5716_v14, %v6201_v24  ;;  %vm9560_vm6 = vcmp.eq.s32.totalorder %v5716_v14, %v6203_v27  ;;  %507 = vperm.xlu1 %4882, %v138_v18  }
  0xef   :  { %vm4315_vm13 = vmpackc.low %vm9559_vm0, %vm9560_vm6  ;;  %504 = vperm.xlu0 %4881, %v137_v23  }
  0xf1   :  { %v6221_v32 = vpop.permute.xlu1 %321  ;;  %v6223_v35 = vpop.permute.xlu0 %318 }
  0xf2   :  { %vm9561_vm3 = vcmp.eq.s32.totalorder %v5716_v14, %v6221_v32  ;;  %4666 = vmatmul.mubr.msk.bf16.gmra.mrb[52].mxu0 %vm4315_vm13, %v9655_v21  ;;  %vm9562_vm0 = vcmp.eq.s32.totalorder %v5716_v14, %v6223_v35  ;;  %513 = vperm.xlu1 %4882, %v140_v28  }
  0xf3   :  { %vm4317_vm6 = vmpackc.low %vm9561_vm3, %vm9562_vm0  ;;  %510 = vperm.xlu0 %4881, %v139_v31  }
  0xf4   :  { %4669 = vmatprep.mubr.msk.bf16.mxu0 %vm4317_vm6, %v9655_v21 }
  0xf5   :  { %v6243_v40 = vpop.permute.xlu1 %327  ;;  %v6245_v43 = vpop.permute.xlu0 %324 }
  0xf6   :  { %vm9563_vm13 = vcmp.eq.s32.totalorder %v5716_v14, %v6243_v40  ;;  %vm9564_vm3 = vcmp.eq.s32.totalorder %v5716_v14, %v6245_v43  ;;  %519 = vperm.xlu1 %4882, %v142_v36  }
  0xf7   :  { %vm4319_vm6 = vmpackc.low %vm9563_vm13, %vm9564_vm3  ;;  %516 = vperm.xlu0 %4881, %v141_v39  }
  0xf9   :  { %v6263_v52 = vpop.permute.xlu1 %333  ;;  %v6265_v53 = vpop.permute.xlu0 %330 }
  0xfa   :  { %9922 = vst [vmem:[#allocation6_spill] sm:$0xff] %v6263_v52  ;;  %vm9565_vm0 = vcmp.eq.s32.totalorder %v5716_v14, %v6263_v52  ;;  %4670 = vmatmul.mubr.msk.bf16.gmra.mrb[56].mxu0 %vm4319_vm6, %v9655_v21  ;;  %vm9566_vm13 = vcmp.eq.s32.totalorder %v5716_v14, %v6265_v53  ;;  %525 = vperm.xlu1 %4882, %v144_v44  }
  0xfb   :  { %vm4321_vm3 = vmpackc.low %vm9565_vm0, %vm9566_vm13  ;;  %522 = vperm.xlu0 %4881, %v143_v49  }
  0xfc   :  { %4673 = vmatprep.mubr.msk.bf16.mxu0 %vm4321_vm3, %v9655_v21 }
  0xfd   :  { %v6285_v0 = vpop.permute.xlu1 %339  ;;  %v6287_v5 = vpop.permute.xlu0 %336 }
  0xfe   :  { %9923 = vst [vmem:[#allocation7_spill] sm:$0xff] %v6285_v0  ;;  %vm9568_vm6 = vcmp.eq.s32.totalorder %v5716_v14, %v6285_v0  ;;  %vm9569_vm0 = vcmp.eq.s32.totalorder %v5716_v14, %v6287_v5  ;;  %531 = vperm.xlu1 %4882, %v146_v60  }
  0xff   :  { %vm4323_vm3 = vmpackc.low %vm9568_vm6, %vm9569_vm0  ;;  %528 = vperm.xlu0 %4881, %v145_v61  }
 0x101   :  { %v6299_v8 = vpop.permute.xlu1 %345  ;;  %v6301_v10 = vpop.permute.xlu0 %342 }
 0x102   :  { %9924 = vst [vmem:[#allocation8_spill] sm:$0xff] %v6299_v8  ;;  %9925 = vst [vmem:[#allocation9_spill] sm:$0xff] %v6301_v10  ;;  %vm9571_vm13 = vcmp.eq.s32.totalorder %v5716_v14, %v6299_v8  ;;  %4674 = vmatmul.mubr.msk.bf16.gmra.mrb[60].mxu0 %vm4323_vm3, %v9655_v21  ;;  %vm9572_vm4 = vcmp.eq.s32.totalorder %v5716_v14, %v6301_v10 }
 0x103   :  { %vm4325_vm6 = vmpackc.low %vm9571_vm13, %vm9572_vm4 }
 0x104   :  { %4677 = vmatprep.mubr.msk.bf16.mxu0 %vm4325_vm6, %v9655_v21 }
 0x105   :  { %v6315_v18 = vpop.permute.xlu1 %351  ;;  %v6317_v19 = vpop.permute.xlu0 %348 }
 0x106   :  { %9926 = vst [vmem:[#allocation10_spill] sm:$0xff] %v6315_v18  ;;  %9927 = vst [vmem:[#allocation11_spill] sm:$0xff] %v6317_v19  ;;  %vm9573_vm0 = vcmp.eq.s32.totalorder %v5716_v14, %v6315_v18  ;;  %vm9574_vm3 = vcmp.eq.s32.totalorder %v5716_v14, %v6317_v19 }
 0x107   :  { %vm4327_vm7 = vmpackc.low %vm9573_vm0, %vm9574_vm3 }
 0x109   :  { %v6329_v23 = vpop.permute.xlu1 %357 }
 0x10a   :  { %9928 = vst [vmem:[#allocation12_spill] sm:$0xff] %v6329_v23  ;;  %vm9575_vm6 = vcmp.eq.s32.totalorder %v5716_v14, %v6329_v23  ;;  %4678 = vmatmul.mubr.msk.bf16.gmra.mrb[64].mxu0 %vm4327_vm7, %v9655_v21  ;;  %v6334_v28 = vpop.permute.xlu0 %354 }
 0x10b   :  { %9929 = vst [vmem:[#allocation13_spill] sm:$0xff] %v6334_v28  ;;  %vm9576_vm13 = vcmp.eq.s32.totalorder %v5716_v14, %v6334_v28 }
 0x10c   :  { %vm4329_vm4 = vmpackc.low %vm9575_vm6, %vm9576_vm13 }
 0x10d   :  { %4681 = vmatprep.mubr.msk.bf16.mxu0 %vm4329_vm4, %v9655_v21  ;;  %v6345_v31 = vpop.permute.xlu1 %363 }
 0x10e   :  { %9930 = vst [vmem:[#allocation14_spill] sm:$0xff] %v6345_v31  ;;  %vm9577_vm0 = vcmp.eq.s32.totalorder %v5716_v14, %v6345_v31  ;;  %v6349_v36 = vpop.permute.xlu0 %360 }
 0x10f   :  { %9931 = vst [vmem:[#allocation15_spill] sm:$0xff] %v6349_v36  ;;  %vm9578_vm7 = vcmp.eq.s32.totalorder %v5716_v14, %v6349_v36 }
 0x110   :  { %vm4331_vm3 = vmpackc.low %vm9577_vm0, %vm9578_vm7 }
 0x111   :  { %v6359_v39 = vpop.permute.xlu1 %369 }
 0x112   :  { %9932 = vst [vmem:[#allocation16_spill] sm:$0xff] %v6359_v39  ;;  %vm9580_vm4 = vcmp.eq.s32.totalorder %v5716_v14, %v6359_v39  ;;  %4682 = vmatmul.mubr.msk.bf16.gmra.mrb[68].mxu0 %vm4331_vm3, %v9655_v21  ;;  %v6364_v44 = vpop.permute.xlu0 %366 }
 0x113   :  { %9933 = vst [vmem:[#allocation17_spill] sm:$0xff] %v6364_v44  ;;  %vm9581_vm6 = vcmp.eq.s32.totalorder %v5716_v14, %v6364_v44 }
 0x114   :  { %vm4333_vm13 = vmpackc.low %vm9580_vm4, %vm9581_vm6 }
 0x115   :  { %4685 = vmatprep.mubr.msk.bf16.mxu0 %vm4333_vm13, %v9655_v21  ;;  %v6375_v49 = vpop.permute.xlu1 %375 }
 0x116   :  { %9934 = vst [vmem:[#allocation18_spill] sm:$0xff] %v6375_v49  ;;  %vm9583_vm0 = vcmp.eq.s32.totalorder %v5716_v14, %v6375_v49  ;;  %v6379_v60 = vpop.permute.xlu0 %372 }
 0x117   :  { %9935 = vst [vmem:[#allocation19_spill] sm:$0xff] %v6379_v60  ;;  %vm9585_vm3 = vcmp.eq.s32.totalorder %v5716_v14, %v6379_v60 }
 0x118   :  { %vm4335_vm7 = vmpackc.low %vm9583_vm0, %vm9585_vm3 }
 0x119   :  { %v6389_v61 = vpop.permute.xlu1 %381 }
 0x11a   :  { %9936 = vst [vmem:[#allocation20_spill] sm:$0xff] %v6389_v61  ;;  %vm9588_vm13 = vcmp.eq.s32.totalorder %v5716_v14, %v6389_v61  ;;  %4686 = vmatmul.mubr.msk.bf16.gmra.mrb[72].mxu0 %vm4335_vm7, %v9655_v21  ;;  %v6394_v9 = vpop.permute.xlu0 %378 }
 0x11b   :  { %9937 = vst [vmem:[#allocation21_spill] sm:$0xff] %v6394_v9  ;;  %vm9589_vm4 = vcmp.eq.s32.totalorder %v5716_v14, %v6394_v9 }
 0x11c   :  { %vm4337_vm6 = vmpackc.low %vm9588_vm13, %vm9589_vm4 }
 0x11d   :  { %4689 = vmatprep.mubr.msk.bf16.mxu0 %vm4337_vm6, %v9655_v21  ;;  %v6405_v39 = vpop.permute.xlu1 %387 }
 0x11e   :  { %9938 = vst [vmem:[#allocation22_spill] sm:$0xff] %v6405_v39  ;;  %vm9591_vm0 = vcmp.eq.s32.totalorder %v5716_v14, %v6405_v39  ;;  %v6409_v49 = vpop.permute.xlu0 %384 }
 0x11f   :  { %9939 = vst [vmem:[#allocation23_spill] sm:$0xff] %v6409_v49  ;;  %vm9593_vm7 = vcmp.eq.s32.totalorder %v5716_v14, %v6409_v49 }
 0x120   :  { %vm4339_vm3 = vmpackc.low %vm9591_vm0, %vm9593_vm7 }
 0x121   :  { %v6419_v61 = vpop.permute.xlu1 %393 }
 0x122   :  { %9940 = vst [vmem:[#allocation24_spill] sm:$0xff] %v6419_v61  ;;  %vm9596_vm6 = vcmp.eq.s32.totalorder %v5716_v14, %v6419_v61  ;;  %4690 = vmatmul.mubr.msk.bf16.gmra.mrb[76].mxu0 %vm4339_vm3, %v9655_v21  ;;  %v6424_v9 = vpop.permute.xlu0 %390 }
 0x123   :  { %9941 = vst [vmem:[#allocation25_spill] sm:$0xff] %v6424_v9  ;;  %vm9597_vm13 = vcmp.eq.s32.totalorder %v5716_v14, %v6424_v9 }
 0x124   :  { %vm4341_vm4 = vmpackc.low %vm9596_vm6, %vm9597_vm13 }
 0x125   :  { %4693 = vmatprep.mubr.msk.bf16.mxu0 %vm4341_vm4, %v9655_v21  ;;  %v6435_v39 = vpop.permute.xlu1 %399 }
 0x126   :  { %9942 = vst [vmem:[#allocation26_spill] sm:$0xff] %v6435_v39  ;;  %vm9599_vm0 = vcmp.eq.s32.totalorder %v5716_v14, %v6435_v39  ;;  %v6439_v49 = vpop.permute.xlu0 %396 }
 0x127   :  { %9943 = vst [vmem:[#allocation27_spill] sm:$0xff] %v6439_v49  ;;  %vm9601_vm3 = vcmp.eq.s32.totalorder %v5716_v14, %v6439_v49 }
 0x128   :  { %vm4343_vm7 = vmpackc.low %vm9599_vm0, %vm9601_vm3 }
 0x129   :  { %v6449_v61 = vpop.permute.xlu1 %405 }
 0x12a   :  { %9944 = vst [vmem:[#allocation28_spill] sm:$0xff] %v6449_v61  ;;  %vm9604_vm4 = vcmp.eq.s32.totalorder %v5716_v14, %v6449_v61  ;;  %4694 = vmatmul.mubr.msk.bf16.gmra.mrb[80].mxu0 %vm4343_vm7, %v9655_v21  ;;  %v6454_v9 = vpop.permute.xlu0 %402 }
 0x12b   :  { %9945 = vst [vmem:[#allocation29_spill] sm:$0xff] %v6454_v9  ;;  %vm9605_vm6 = vcmp.eq.s32.totalorder %v5716_v14, %v6454_v9 }
 0x12c   :  { %vm4345_vm13 = vmpackc.low %vm9604_vm4, %vm9605_vm6 }
 0x12d   :  { %4697 = vmatprep.mubr.msk.bf16.mxu0 %vm4345_vm13, %v9655_v21  ;;  %v6465_v39 = vpop.permute.xlu1 %411 }
 0x12e   :  { %9946 = vst [vmem:[#allocation30_spill] sm:$0xff] %v6465_v39  ;;  %vm9607_vm0 = vcmp.eq.s32.totalorder %v5716_v14, %v6465_v39  ;;  %v6469_v49 = vpop.permute.xlu0 %408 }
 0x12f   :  { %9947 = vst [vmem:[#allocation31_spill] sm:$0xff] %v6469_v49  ;;  %vm9609_vm7 = vcmp.eq.s32.totalorder %v5716_v14, %v6469_v49 }
 0x130   :  { %vm4347_vm3 = vmpackc.low %vm9607_vm0, %vm9609_vm7 }
 0x131   :  { %v6479_v61 = vpop.permute.xlu1 %417 }
 0x132   :  { %9948 = vst [vmem:[#allocation32_spill] sm:$0xff] %v6479_v61  ;;  %vm9612_vm13 = vcmp.eq.s32.totalorder %v5716_v14, %v6479_v61  ;;  %4698 = vmatmul.mubr.msk.bf16.gmra.mrb[84].mxu0 %vm4347_vm3, %v9655_v21  ;;  %v6484_v9 = vpop.permute.xlu0 %414 }
 0x133   :  { %9949 = vst [vmem:[#allocation33_spill] sm:$0xff] %v6484_v9  ;;  %vm9613_vm4 = vcmp.eq.s32.totalorder %v5716_v14, %v6484_v9 }
 0x134   :  { %vm4349_vm6 = vmpackc.low %vm9612_vm13, %vm9613_vm4 }
 0x135   :  { %4701 = vmatprep.mubr.msk.bf16.mxu0 %vm4349_vm6, %v9655_v21  ;;  %v6495_v39 = vpop.permute.xlu1 %423 }
 0x136   :  { %9950 = vst [vmem:[#allocation34_spill] sm:$0xff] %v6495_v39  ;;  %vm9615_vm0 = vcmp.eq.s32.totalorder %v5716_v14, %v6495_v39  ;;  %v6499_v49 = vpop.permute.xlu0 %420 }
 0x137   :  { %9951 = vst [vmem:[#allocation35_spill] sm:$0xff] %v6499_v49  ;;  %vm9617_vm3 = vcmp.eq.s32.totalorder %v5716_v14, %v6499_v49 }
 0x138   :  { %vm4351_vm7 = vmpackc.low %vm9615_vm0, %vm9617_vm3 }
 0x139   :  { %v6509_v61 = vpop.permute.xlu1 %429 }
 0x13a   :  { %9952 = vst [vmem:[#allocation36_spill] sm:$0xff] %v6509_v61  ;;  %vm9620_vm6 = vcmp.eq.s32.totalorder %v5716_v14, %v6509_v61  ;;  %4702 = vmatmul.mubr.msk.bf16.gmra.mrb[88].mxu0 %vm4351_vm7, %v9655_v21  ;;  %v6514_v9 = vpop.permute.xlu0 %426 }
 0x13b   :  { %9953 = vst [vmem:[#allocation37_spill] sm:$0xff] %v6514_v9  ;;  %vm9621_vm13 = vcmp.eq.s32.totalorder %v5716_v14, %v6514_v9 }
 0x13c   :  { %vm4353_vm4 = vmpackc.low %vm9620_vm6, %vm9621_vm13 }
 0x13d   :  { %4705 = vmatprep.mubr.msk.bf16.mxu0 %vm4353_vm4, %v9655_v21  ;;  %v6525_v39 = vpop.permute.xlu1 %435 }
 0x13e   :  { %9954 = vst [vmem:[#allocation38_spill] sm:$0xff] %v6525_v39  ;;  %vm9623_vm0 = vcmp.eq.s32.totalorder %v5716_v14, %v6525_v39  ;;  %v6529_v49 = vpop.permute.xlu0 %432 }
 0x13f   :  { %9955 = vst [vmem:[#allocation39_spill] sm:$0xff] %v6529_v49  ;;  %vm9625_vm7 = vcmp.eq.s32.totalorder %v5716_v14, %v6529_v49 }
 0x140   :  { %vm4355_vm3 = vmpackc.low %vm9623_vm0, %vm9625_vm7 }
 0x141   :  { %v6539_v61 = vpop.permute.xlu1 %441 }
 0x142   :  { %9956 = vst [vmem:[#allocation40_spill] sm:$0xff] %v6539_v61  ;;  %vm9628_vm4 = vcmp.eq.s32.totalorder %v5716_v14, %v6539_v61  ;;  %4706 = vmatmul.mubr.msk.bf16.gmra.mrb[92].mxu0 %vm4355_vm3, %v9655_v21  ;;  %v6544_v9 = vpop.permute.xlu0 %438 }
 0x143   :  { %9957 = vst [vmem:[#allocation41_spill] sm:$0xff] %v6544_v9  ;;  %vm9629_vm6 = vcmp.eq.s32.totalorder %v5716_v14, %v6544_v9 }
 0x144   :  { %vm4357_vm13 = vmpackc.low %vm9628_vm4, %vm9629_vm6 }
 0x145   :  { %4709 = vmatprep.mubr.msk.bf16.mxu0 %vm4357_vm13, %v9655_v21  ;;  %v6555_v39 = vpop.permute.xlu1 %447 }
 0x146   :  { %9958 = vst [vmem:[#allocation42_spill] sm:$0xff] %v6555_v39  ;;  %vm9631_vm0 = vcmp.eq.s32.totalorder %v5716_v14, %v6555_v39  ;;  %v6559_v49 = vpop.permute.xlu0 %444 }
 0x147   :  { %9959 = vst [vmem:[#allocation43_spill] sm:$0xff] %v6559_v49  ;;  %vm9633_vm3 = vcmp.eq.s32.totalorder %v5716_v14, %v6559_v49 }
 0x148   :  { %vm4359_vm7 = vmpackc.low %vm9631_vm0, %vm9633_vm3 }
 0x149   :  { %v6569_v61 = vpop.permute.xlu1 %453 }
 0x14a   :  { %9960 = vst [vmem:[#allocation44_spill] sm:$0xff] %v6569_v61  ;;  %vm9636_vm13 = vcmp.eq.s32.totalorder %v5716_v14, %v6569_v61  ;;  %4710 = vmatmul.mubr.msk.bf16.gmra.mrb[96].mxu0 %vm4359_vm7, %v9655_v21  ;;  %v6574_v9 = vpop.permute.xlu0 %450 }
 0x14b   :  { %9961 = vst [vmem:[#allocation45_spill] sm:$0xff] %v6574_v9  ;;  %vm9637_vm4 = vcmp.eq.s32.totalorder %v5716_v14, %v6574_v9 }
 0x14c   :  { %vm4361_vm6 = vmpackc.low %vm9636_vm13, %vm9637_vm4 }
 0x14d   :  { %4713 = vmatprep.mubr.msk.bf16.mxu0 %vm4361_vm6, %v9655_v21  ;;  %v6585_v39 = vpop.permute.xlu1 %459 }
 0x14e   :  { %9962 = vst [vmem:[#allocation46_spill] sm:$0xff] %v6585_v39  ;;  %vm9639_vm0 = vcmp.eq.s32.totalorder %v5716_v14, %v6585_v39  ;;  %v6589_v49 = vpop.permute.xlu0 %456 }
 0x14f   :  { %9963 = vst [vmem:[#allocation47_spill] sm:$0xff] %v6589_v49  ;;  %vm9641_vm7 = vcmp.eq.s32.totalorder %v5716_v14, %v6589_v49 }
 0x150   :  { %vm4363_vm3 = vmpackc.low %vm9639_vm0, %vm9641_vm7 }
 0x151   :  { %v6599_v61 = vpop.permute.xlu1 %465 }
 0x152   :  { %9964 = vst [vmem:[#allocation48_spill] sm:$0xff] %v6599_v61  ;;  %vm9644_vm6 = vcmp.eq.s32.totalorder %v5716_v14, %v6599_v61  ;;  %4714 = vmatmul.mubr.msk.bf16.gmra.mrb[100].mxu0 %vm4363_vm3, %v9655_v21  ;;  %v6604_v9 = vpop.permute.xlu0 %462 }
 0x153   :  { %9965 = vst [vmem:[#allocation49_spill] sm:$0xff] %v6604_v9  ;;  %vm9653_vm13 = vcmp.eq.s32.totalorder %v5716_v14, %v6604_v9 }
 0x154   :  { %vm4365_vm4 = vmpackc.low %vm9644_vm6, %vm9653_vm13 }
 0x155   :  { %4717 = vmatprep.mubr.msk.bf16.mxu0 %vm4365_vm4, %v9655_v21  ;;  %v6615_v39 = vpop.permute.xlu1 %471 }
 0x156   :  { %9966 = vst [vmem:[#allocation50_spill] sm:$0xff] %v6615_v39  ;;  %vm9646_vm0 = vcmp.eq.s32.totalorder %v5716_v14, %v6615_v39  ;;  %v6619_v49 = vpop.permute.xlu0 %468 }
 0x157   :  { %9967 = vst [vmem:[#allocation51_spill] sm:$0xff] %v6619_v49  ;;  %vm639_vm3 = vcmp.eq.s32.totalorder %v5716_v14, %v6619_v49  ;;  %v6641_v49 = vld [vmem:[%s9530_s2] ss:$0 sm:$0xff] }
 0x158   :  { %vm4367_vm7 = vmpackc.low %vm9646_vm0, %vm639_vm3 }
 0x159   :  { %v6629_v61 = vpop.permute.xlu1 %477 }
 0x15a   :  { %9968 = vst [vmem:[#allocation52_spill] sm:$0xff] %v6629_v61  ;;  %vm9659_vm4 = vcmp.eq.s32.totalorder %v5716_v14, %v6629_v61  ;;  %4718 = vmatmul.mubr.msk.bf16.gmra.mrb[104].mxu0 %vm4367_vm7, %v9655_v21  ;;  %v6634_v9 = vpop.permute.xlu0 %474 }
 0x15b   :  { %9969 = vst [vmem:[#allocation53_spill] sm:$0xff] %v6634_v9  ;;  %vm9661_vm6 = vcmp.eq.s32.totalorder %v5716_v14, %v6634_v9 }
 0x15c   :  { %vm4369_vm0 = vmpackc.low %vm9659_vm4, %vm9661_vm6 }
 0x15d   :  { %v4615_v39 = vpop.f32.mrb[0].mxu0  ;;  %4721 = vmatprep.mubr.msk.bf16.mxu0 %vm4369_vm0, %v9655_v21  ;;  %v6650_v44 = vpop.permute.xlu1 %483 }
 0x15e   :  { %9970 = vst [vmem:[#allocation54_spill] sm:$0xff] %v6650_v44  ;;  %v1095_v60 = vadd.f32 %v4615_v39, %v6641_v49  ;;  %vm9660_vm7 = vcmp.eq.s32.totalorder %v5716_v14, %v6650_v44  ;;  %v1086_v23 = vpop.f32.mrb[1].mxu0  ;;  %v6655_v31 = vpop.permute.xlu0 %480 }
 0x15f   :  { %9971 = vst [vmem:[#allocation55_spill] sm:$0xff] %v6655_v31  ;;  %v1087_v28 = vadd.f32 %v6641_v49, %v1086_v23  ;;  %vm9663_vm13 = vcmp.eq.s32.totalorder %v5716_v14, %v6655_v31  ;;  %v4616_v61 = vpop.f32.mrb[2].mxu0  ;;  %v9973_v23 = vmov 1.0|1.0  }
 0x160   :  { %4895 = vtanh.f32 %v1095_v60  ;;  %vm4371_vm0 = vmpackc.low %vm9660_vm7, %vm9663_vm13  ;;  %v1098_v39 = vadd.f32 %v4616_v61, %v6641_v49  ;;  %v1089_v21 = vpop.f32.mrb[3].mxu0 }
 0x161   :  { %4897 = vtanh.f32 %v1087_v28  ;;  %v1090_v9 = vadd.f32 %v6641_v49, %v1089_v21  ;;  %v6668_v36 = vpop.permute.xlu1 %489 }
 0x162   :  { %9972 = vst [vmem:[#allocation56_spill] sm:$0xff] %v6668_v36  ;;  %4899 = vtanh.f32 %v1098_v39  ;;  %vm9671_vm4 = vcmp.eq.s32.totalorder %v5716_v14, %v6668_v36  ;;  %4722 = vmatmul.mubr.msk.bf16.gmra.mrb[108].mxu0 %vm4371_vm0, %v9973_v23  ;;  %v6673_v60 = vpop.permute.xlu0 %486 }
 0x163   :  { %9974 = vst [vmem:[#allocation57_spill] sm:$0xff] %v6673_v60  ;;  %4901 = vtanh.f32 %v1090_v9  ;;  %vm9668_vm7 = vcmp.eq.s32.totalorder %v5716_v14, %v6673_v60 }
 0x164   :  { %vm4373_vm6 = vmpackc.low %vm9671_vm4, %vm9668_vm7 }
 0x165   :  { %v4619_v21 = vpop.f32.mrb[4].mxu0  ;;  %4725 = vmatprep.mubr.msk.bf16.mxu0 %vm4373_vm6, %v9973_v23  ;;  %v6684_v28 = vpop.permute.xlu1 %495 }
 0x166   :  { %9975 = vst [vmem:[#allocation58_spill] sm:$0xff] %v6684_v28  ;;  %v1111_v61 = vadd.f32 %v4619_v21, %v6641_v49  ;;  %vm9670_vm0 = vcmp.eq.s32.totalorder %v5716_v14, %v6684_v28  ;;  %v1102_v9 = vpop.f32.mrb[5].mxu0  ;;  %v6689_v39 = vpop.permute.xlu0 %492 }
 0x167   :  { %9976 = vst [vmem:[#allocation59_spill] sm:$0xff] %v6689_v39  ;;  %v1103_v44 = vadd.f32 %v6641_v49, %v1102_v9  ;;  %vm9673_vm13 = vcmp.eq.s32.totalorder %v5716_v14, %v6689_v39  ;;  %v4620_v60 = vpop.f32.mrb[6].mxu0 }
 0x168   :  { %4903 = vtanh.f32 %v1111_v61  ;;  %vm4375_vm6 = vmpackc.low %vm9670_vm0, %vm9673_vm13  ;;  %v1114_v21 = vadd.f32 %v4620_v60, %v6641_v49  ;;  %v1105_v36 = vpop.f32.mrb[7].mxu0 }
 0x169   :  { %4905 = vtanh.f32 %v1103_v44  ;;  %v1106_v31 = vadd.f32 %v6641_v49, %v1105_v36  ;;  %v6702_v8 = vpop.permute.xlu1 %501 }
 0x16a   :  { %9977 = vst [vmem:[#allocation60_spill] sm:$0xff] %v6702_v8  ;;  %v4896_v9 = vpop.eup %4895  ;;  %4907 = vtanh.f32 %v1114_v21  ;;  %vm9678_vm7 = vcmp.eq.s32.totalorder %v5716_v14, %v6702_v8  ;;  %4726 = vmatmul.mubr.msk.bf16.gmra.mrb[112].mxu0 %vm4375_vm6, %v9973_v23  ;;  %v6707_v61 = vpop.permute.xlu0 %498  ;;  %vm1821_vm6 = vcmask 523264  }
 0x16b   :  { %9978 = vst [vmem:[#allocation61_spill] sm:$0xff] %v6707_v61  ;;  %v4898_v39 = vpop.eup %4897  ;;  %4909 = vtanh.f32 %v1106_v31  ;;  %vm9680_vm0 = vcmp.eq.s32.totalorder %v5716_v14, %v6707_v61 }
 0x16c   :  { %v4900_v60 = vpop.eup %4899  ;;  %vm4377_vm4 = vmpackc.low %vm9678_vm7, %vm9680_vm0 }
 0x16d   :  { %v4902_v36 = vpop.eup %4901  ;;  %v4623_v44 = vpop.f32.mrb[8].mxu0  ;;  %4729 = vmatprep.mubr.msk.bf16.mxu0 %vm4377_vm4, %v9973_v23  ;;  %v1726_v28 = vpack.c.bf16 %v4900_v60, %v4896_v9 }
 0x16e   :  { %v6718_v21 = vpop.permute.xlu1 %507  ;;  %v1127_v31 = vadd.f32 %v4623_v44, %v6641_v49  ;;  %v1118_v18 = vpop.f32.mrb[9].mxu0  ;;  %v1725_v61 = vpack.c.bf16 %v4902_v36, %v4898_v39 }
 0x16f   :  { %9979 = vst [vmem:[#allocation62_spill] sm:$0xff] %v6718_v21  ;;  %vm9681_vm13 = vcmp.eq.s32.totalorder %v5716_v14, %v6718_v21  ;;  %v6723_v10 = vpop.permute.xlu0 %504  ;;  %v1119_v8 = vadd.f32 %v6641_v49, %v1118_v18  ;;  %v4624_v19 = vpop.f32.mrb[10].mxu0 }
 0x170   :  { %9980 = vst [vmem:[#allocation63_spill] sm:$0xff] %v6723_v10  ;;  %vm9682_vm7 = vcmp.eq.s32.totalorder %v5716_v14, %v6723_v10  ;;  %4911 = vtanh.f32 %v1127_v31  ;;  %v1130_v9 = vadd.f32 %v4624_v19, %v6641_v49  ;;  %v1121_v60 = vpop.f32.mrb[11].mxu0  ;;  %4749 = vmatprep.mubr.msk.bf16.mxu1 %vm1821_vm6, %v1725_v61 }
 0x171   :  { %vm4379_vm4 = vmpackc.low %vm9681_vm13, %vm9682_vm7  ;;  %4913 = vtanh.f32 %v1119_v8  ;;  %v1122_v18 = vadd.f32 %v6641_v49, %v1121_v60  ;;  %4750 = vmatmul.mubr.msk.bf16.vlgmr.msra.gmra.mrb[0].mxu1 %vm1821_vm6, %v1726_v28 }
 0x172   :  { %v6738_v39 = vpop.permute.xlu1 %513  ;;  %v4904_v36 = vpop.eup %4903  ;;  %4915 = vtanh.f32 %v1130_v9  ;;  %4730 = vmatmul.mubr.msk.bf16.gmra.mrb[116].mxu0 %vm4379_vm4, %v9973_v23 }
 0x173   :  { %9981 = vst [vmem:[#allocation64_spill] sm:$0xff] %v6738_v39  ;;  %vm9688_vm0 = vcmp.eq.s32.totalorder %v5716_v14, %v6738_v39  ;;  %v6743_v44 = vpop.permute.xlu0 %510  ;;  %v4906_v19 = vpop.eup %4905  ;;  %4917 = vtanh.f32 %v1122_v18 }
 0x174   :  { %9982 = vst [vmem:[#allocation65_spill] sm:$0xff] %v6743_v44  ;;  %vm9686_vm13 = vcmp.eq.s32.totalorder %v5716_v14, %v6743_v44  ;;  %v4908_v8 = vpop.eup %4907 }
 0x175   :  { %vm4381_vm7 = vmpackc.low %vm9688_vm0, %vm9686_vm13  ;;  %v4910_v28 = vpop.eup %4909  ;;  %v4627_v61 = vpop.f32.mrb[12].mxu0  ;;  %v1728_v9 = vpack.c.bf16 %v4908_v8, %v4904_v36 }
 0x176   :  { %4733 = vmatprep.mubr.msk.bf16.mxu0 %vm4381_vm7, %v9973_v23  ;;  %v6754_v31 = vpop.permute.xlu1 %519  ;;  %v1143_v60 = vadd.f32 %v4627_v61, %v6641_v49  ;;  %v1134_v18 = vpop.f32.mrb[13].mxu0  ;;  %v1727_v44 = vpack.c.bf16 %v4910_v28, %v4906_v19 }
 0x177   :  { %9983 = vst [vmem:[#allocation66_spill] sm:$0xff] %v6754_v31  ;;  %vm9689_vm4 = vcmp.eq.s32.totalorder %v5716_v14, %v6754_v31  ;;  %v6759_v21 = vpop.permute.xlu0 %516  ;;  %v1135_v10 = vadd.f32 %v6641_v49, %v1134_v18  ;;  %v4628_v39 = vpop.f32.mrb[14].mxu0 }
 0x178   :  { %9984 = vst [vmem:[#allocation67_spill] sm:$0xff] %v6759_v21  ;;  %vm9690_vm13 = vcmp.eq.s32.totalorder %v5716_v14, %v6759_v21  ;;  %4919 = vtanh.f32 %v1143_v60  ;;  %v1146_v36 = vadd.f32 %v4628_v39, %v6641_v49  ;;  %v1137_v8 = vpop.f32.mrb[15].mxu0  ;;  %4753 = vmatprep.mubr.msk.bf16.mxu1 %vm1821_vm6, %v1727_v44 }
 0x179   :  { %vm4383_vm7 = vmpackc.low %vm9689_vm4, %vm9690_vm13  ;;  %4921 = vtanh.f32 %v1135_v10  ;;  %v1138_v19 = vadd.f32 %v6641_v49, %v1137_v8  ;;  %4754 = vmatmul.mubr.msk.bf16.gmra.mrb[4].mxu1 %vm1821_vm6, %v1728_v9 }
 0x17a   :  { %v6774_v28 = vpop.permute.xlu1 %525  ;;  %v4912_v61 = vpop.eup %4911  ;;  %4923 = vtanh.f32 %v1146_v36  ;;  %4734 = vmatmul.mubr.msk.bf16.gmra.mrb[120].mxu0 %vm4383_vm7, %v9973_v23 }
 0x17b   :  { %9985 = vst [vmem:[#allocation68_spill] sm:$0xff] %v6774_v28  ;;  %vm9694_vm0 = vcmp.eq.s32.totalorder %v5716_v14, %v6774_v28  ;;  %v6779_v60 = vpop.permute.xlu0 %522  ;;  %v4914_v39 = vpop.eup %4913  ;;  %4925 = vtanh.f32 %v1138_v19 }
 0x17c   :  { %9986 = vst [vmem:[#allocation69_spill] sm:$0xff] %v6779_v60  ;;  %vm657_vm4 = vcmp.eq.s32.totalorder %v5716_v14, %v6779_v60  ;;  %v4916_v10 = vpop.eup %4915 }
 0x17d   :  { %vm4385_vm13 = vmpackc.low %vm9694_vm0, %vm657_vm4  ;;  %v4918_v44 = vpop.eup %4917  ;;  %v4631_v9 = vpop.f32.mrb[16].mxu0  ;;  %v1730_v36 = vpack.c.bf16 %v4916_v10, %v4912_v61 }
 0x17e   :  { %4737 = vmatprep.mubr.msk.bf16.mxu0 %vm4385_vm13, %v9973_v23  ;;  %v6790_v18 = vpop.permute.xlu1 %531  ;;  %v1159_v8 = vadd.f32 %v4631_v9, %v6641_v49  ;;  %v1150_v19 = vpop.f32.mrb[17].mxu0  ;;  %v1729_v60 = vpack.c.bf16 %v4918_v44, %v4914_v39 }
 0x17f   :  { %9987 = vst [vmem:[#allocation70_spill] sm:$0xff] %v6790_v18  ;;  %vm660_vm7 = vcmp.eq.s32.totalorder %v5716_v14, %v6790_v18  ;;  %v6795_v31 = vpop.permute.xlu0 %528  ;;  %v1151_v21 = vadd.f32 %v6641_v49, %v1150_v19  ;;  %v4632_v28 = vpop.f32.mrb[18].mxu0 }
 0x180   :  { %9988 = vst [vmem:[#allocation71_spill] sm:$0xff] %v6795_v31  ;;  %vm659_vm0 = vcmp.eq.s32.totalorder %v5716_v14, %v6795_v31  ;;  %4927 = vtanh.f32 %v1159_v8  ;;  %v1162_v61 = vadd.f32 %v4632_v28, %v6641_v49  ;;  %v1153_v10 = vpop.f32.mrb[19].mxu0  ;;  %4757 = vmatprep.mubr.msk.bf16.mxu1 %vm1821_vm6, %v1729_v60 }
 0x181   :  { %vm4387_vm13 = vmpackc.low %vm660_vm7, %vm659_vm0  ;;  %4929 = vtanh.f32 %v1151_v21  ;;  %v1154_v39 = vadd.f32 %v6641_v49, %v1153_v10  ;;  %4758 = vmatmul.mubr.msk.bf16.gmra.mrb[8].mxu1 %vm1821_vm6, %v1730_v36 }
 0x182   :  { %v4920_v44 = vpop.eup %4919  ;;  %4931 = vtanh.f32 %v1162_v61  ;;  %4738 = vmatmul.mubr.msk.bf16.gmra.mrb[124].mxu0 %vm4387_vm13, %v9973_v23  ;;  %vm10015_vm13 = vcmp.eq.s32.totalorder %v5716_v14, %v6023_v30 }
 0x183   :  { %v4922_v9 = vpop.eup %4921  ;;  %4933 = vtanh.f32 %v1154_v39 }
 0x184   :  { %v4924_v8 = vpop.eup %4923 }
 0x185   :  { %v4926_v19 = vpop.eup %4925  ;;  %v4635_v18 = vpop.f32.mrb[20].mxu0  ;;  %v1732_v31 = vpack.c.bf16 %v4924_v8, %v4920_v44 }
 0x186   :  { %v1175_v28 = vadd.f32 %v4635_v18, %v6641_v49  ;;  %v1166_v52 = vpop.f32.mrb[21].mxu0  ;;  %v1731_v0 = vpack.c.bf16 %v4926_v19, %v4922_v9 }
 0x187   :  { %v1167_v21 = vadd.f32 %v6641_v49, %v1166_v52  ;;  %v4636_v60 = vpop.f32.mrb[22].mxu0 }
 0x188   :  { %4935 = vtanh.f32 %v1175_v28  ;;  %v1178_v36 = vadd.f32 %v4636_v60, %v6641_v49  ;;  %v1169_v10 = vpop.f32.mrb[23].mxu0  ;;  %4761 = vmatprep.mubr.msk.bf16.mxu1 %vm1821_vm6, %v1731_v0 }
 0x189   :  { %4937 = vtanh.f32 %v1167_v21  ;;  %v1170_v23 = vadd.f32 %v6641_v49, %v1169_v10  ;;  %4762 = vmatmul.mubr.msk.bf16.gmra.mrb[12].mxu1 %vm1821_vm6, %v1732_v31 }
 0x18a   :  { %v4928_v61 = vpop.eup %4927  ;;  %4939 = vtanh.f32 %v1178_v36 }
 0x18b   :  { %v4930_v39 = vpop.eup %4929  ;;  %4941 = vtanh.f32 %v1170_v23 }
 0x18c   :  { %v4932_v18 = vpop.eup %4931 }
 0x18d   :  { %v4934_v44 = vpop.eup %4933  ;;  %v4639_v9 = vpop.f32.mrb[24].mxu0  ;;  %v1734_v52 = vpack.c.bf16 %v4932_v18, %v4928_v61 }
 0x18e   :  { %v1191_v8 = vadd.f32 %v4639_v9, %v6641_v49  ;;  %v1182_v19 = vpop.f32.mrb[25].mxu0  ;;  %v1733_v28 = vpack.c.bf16 %v4934_v44, %v4930_v39 }
 0x18f   :  { %v1183_v60 = vadd.f32 %v6641_v49, %v1182_v19  ;;  %v4640_v0 = vpop.f32.mrb[26].mxu0 }
 0x190   :  { %4943 = vtanh.f32 %v1191_v8  ;;  %v1194_v21 = vadd.f32 %v4640_v0, %v6641_v49  ;;  %v1185_v10 = vpop.f32.mrb[27].mxu0  ;;  %4765 = vmatprep.mubr.msk.bf16.mxu1 %vm1821_vm6, %v1733_v28 }
 0x191   :  { %4945 = vtanh.f32 %v1183_v60  ;;  %v1186_v31 = vadd.f32 %v6641_v49, %v1185_v10  ;;  %4766 = vmatmul.mubr.msk.bf16.gmra.mrb[16].mxu1 %vm1821_vm6, %v1734_v52 }
 0x192   :  { %v4936_v36 = vpop.eup %4935  ;;  %4947 = vtanh.f32 %v1194_v21 }
 0x193   :  { %v4938_v23 = vpop.eup %4937  ;;  %4949 = vtanh.f32 %v1186_v31 }
 0x194   :  { %v4940_v61 = vpop.eup %4939 }
 0x195   :  { %v4942_v39 = vpop.eup %4941  ;;  %v4643_v18 = vpop.f32.mrb[28].mxu0  ;;  %v1736_v44 = vpack.c.bf16 %v4940_v61, %v4936_v36 }
 0x196   :  { %v1207_v9 = vadd.f32 %v4643_v18, %v6641_v49  ;;  %v1198_v8 = vpop.f32.mrb[29].mxu0  ;;  %v1735_v19 = vpack.c.bf16 %v4942_v39, %v4938_v23 }
 0x197   :  { %v1199_v0 = vadd.f32 %v6641_v49, %v1198_v8  ;;  %v4644_v28 = vpop.f32.mrb[30].mxu0 }
 0x198   :  { %4951 = vtanh.f32 %v1207_v9  ;;  %v1210_v60 = vadd.f32 %v4644_v28, %v6641_v49  ;;  %v1201_v10 = vpop.f32.mrb[31].mxu0  ;;  %4769 = vmatprep.mubr.msk.bf16.mxu1 %vm1821_vm6, %v1735_v19 }
 0x199   :  { %4953 = vtanh.f32 %v1199_v0  ;;  %v1202_v52 = vadd.f32 %v6641_v49, %v1201_v10  ;;  %4770 = vmatmul.mubr.msk.bf16.gmra.mrb[20].mxu1 %vm1821_vm6, %v1736_v44 }
 0x19a   :  { %v4944_v21 = vpop.eup %4943  ;;  %4955 = vtanh.f32 %v1210_v60 }
 0x19b   :  { %v4946_v31 = vpop.eup %4945  ;;  %4957 = vtanh.f32 %v1202_v52 }
 0x19c   :  { %v4948_v36 = vpop.eup %4947 }
 0x19d   :  { %v4950_v23 = vpop.eup %4949  ;;  %v4647_v61 = vpop.f32.mrb[32].mxu0  ;;  %v1738_v39 = vpack.c.bf16 %v4948_v36, %v4944_v21 }
 0x19e   :  { %v1223_v18 = vadd.f32 %v4647_v61, %v6641_v49  ;;  %v1214_v9 = vpop.f32.mrb[33].mxu0  ;;  %v1737_v8 = vpack.c.bf16 %v4950_v23, %v4946_v31 }
 0x19f   :  { %v1215_v28 = vadd.f32 %v6641_v49, %v1214_v9  ;;  %v4648_v19 = vpop.f32.mrb[34].mxu0 }
 0x1a0   :  { %4959 = vtanh.f32 %v1223_v18  ;;  %v1226_v0 = vadd.f32 %v4648_v19, %v6641_v49  ;;  %v1217_v10 = vpop.f32.mrb[35].mxu0  ;;  %4773 = vmatprep.mubr.msk.bf16.mxu1 %vm1821_vm6, %v1737_v8 }
 0x1a1   :  { %4961 = vtanh.f32 %v1215_v28  ;;  %v1218_v44 = vadd.f32 %v6641_v49, %v1217_v10  ;;  %4774 = vmatmul.mubr.msk.bf16.gmra.mrb[24].mxu1 %vm1821_vm6, %v1738_v39 }
 0x1a2   :  { %v4952_v60 = vpop.eup %4951  ;;  %4963 = vtanh.f32 %v1226_v0 }
 0x1a3   :  { %v4954_v52 = vpop.eup %4953  ;;  %4965 = vtanh.f32 %v1218_v44 }
 0x1a4   :  { %v4956_v21 = vpop.eup %4955 }
 0x1a5   :  { %v4958_v31 = vpop.eup %4957  ;;  %v4651_v36 = vpop.f32.mrb[36].mxu0  ;;  %v1740_v23 = vpack.c.bf16 %v4956_v21, %v4952_v60 }
 0x1a6   :  { %v1239_v61 = vadd.f32 %v4651_v36, %v6641_v49  ;;  %v1230_v18 = vpop.f32.mrb[37].mxu0  ;;  %v1739_v9 = vpack.c.bf16 %v4958_v31, %v4954_v52 }
 0x1a7   :  { %v1231_v19 = vadd.f32 %v6641_v49, %v1230_v18  ;;  %v4652_v8 = vpop.f32.mrb[38].mxu0 }
 0x1a8   :  { %4967 = vtanh.f32 %v1239_v61  ;;  %v1242_v28 = vadd.f32 %v4652_v8, %v6641_v49  ;;  %v1233_v10 = vpop.f32.mrb[39].mxu0  ;;  %4777 = vmatprep.mubr.msk.bf16.mxu1 %vm1821_vm6, %v1739_v9 }
 0x1a9   :  { %4969 = vtanh.f32 %v1231_v19  ;;  %v1234_v39 = vadd.f32 %v6641_v49, %v1233_v10  ;;  %4778 = vmatmul.mubr.msk.bf16.gmra.mrb[28].mxu1 %vm1821_vm6, %v1740_v23 }
 0x1aa   :  { %v4960_v0 = vpop.eup %4959  ;;  %4971 = vtanh.f32 %v1242_v28 }
 0x1ab   :  { %v4962_v44 = vpop.eup %4961  ;;  %4973 = vtanh.f32 %v1234_v39 }
 0x1ac   :  { %v4964_v60 = vpop.eup %4963 }
 0x1ad   :  { %v4966_v52 = vpop.eup %4965  ;;  %v4655_v21 = vpop.f32.mrb[40].mxu0  ;;  %v1742_v31 = vpack.c.bf16 %v4964_v60, %v4960_v0 }
 0x1ae   :  { %v1255_v36 = vadd.f32 %v4655_v21, %v6641_v49  ;;  %v1246_v61 = vpop.f32.mrb[41].mxu0  ;;  %v1741_v18 = vpack.c.bf16 %v4966_v52, %v4962_v44 }
 0x1af   :  { %v1247_v8 = vadd.f32 %v6641_v49, %v1246_v61  ;;  %v4656_v9 = vpop.f32.mrb[42].mxu0 }
 0x1b0   :  { %4975 = vtanh.f32 %v1255_v36  ;;  %v1258_v19 = vadd.f32 %v4656_v9, %v6641_v49  ;;  %v1249_v10 = vpop.f32.mrb[43].mxu0  ;;  %4781 = vmatprep.mubr.msk.bf16.mxu1 %vm1821_vm6, %v1741_v18 }
 0x1b1   :  { %4977 = vtanh.f32 %v1247_v8  ;;  %v1250_v23 = vadd.f32 %v6641_v49, %v1249_v10  ;;  %4782 = vmatmul.mubr.msk.bf16.gmra.mrb[32].mxu1 %vm1821_vm6, %v1742_v31 }
 0x1b2   :  { %v4968_v28 = vpop.eup %4967  ;;  %4979 = vtanh.f32 %v1258_v19 }
 0x1b3   :  { %v4970_v39 = vpop.eup %4969  ;;  %4981 = vtanh.f32 %v1250_v23 }
 0x1b4   :  { %v4972_v0 = vpop.eup %4971 }
 0x1b5   :  { %v4974_v44 = vpop.eup %4973  ;;  %v4659_v60 = vpop.f32.mrb[44].mxu0  ;;  %v1744_v52 = vpack.c.bf16 %v4972_v0, %v4968_v28 }
 0x1b6   :  { %v1271_v21 = vadd.f32 %v4659_v60, %v6641_v49  ;;  %v1262_v36 = vpop.f32.mrb[45].mxu0  ;;  %v1743_v61 = vpack.c.bf16 %v4974_v44, %v4970_v39 }
 0x1b7   :  { %v1263_v9 = vadd.f32 %v6641_v49, %v1262_v36  ;;  %v4660_v18 = vpop.f32.mrb[46].mxu0 }
 0x1b8   :  { %4983 = vtanh.f32 %v1271_v21  ;;  %v1274_v8 = vadd.f32 %v4660_v18, %v6641_v49  ;;  %v1265_v10 = vpop.f32.mrb[47].mxu0  ;;  %4785 = vmatprep.mubr.msk.bf16.mxu1 %vm1821_vm6, %v1743_v61 }
 0x1b9   :  { %4985 = vtanh.f32 %v1263_v9  ;;  %v1266_v31 = vadd.f32 %v6641_v49, %v1265_v10  ;;  %4786 = vmatmul.mubr.msk.bf16.gmra.mrb[36].mxu1 %vm1821_vm6, %v1744_v52 }
 0x1ba   :  { %v4976_v19 = vpop.eup %4975  ;;  %4987 = vtanh.f32 %v1274_v8 }
 0x1bb   :  { %v4978_v23 = vpop.eup %4977  ;;  %4989 = vtanh.f32 %v1266_v31 }
 0x1bc   :  { %v4980_v28 = vpop.eup %4979 }
 0x1bd   :  { %v4982_v39 = vpop.eup %4981  ;;  %v4663_v0 = vpop.f32.mrb[48].mxu0  ;;  %v1746_v44 = vpack.c.bf16 %v4980_v28, %v4976_v19 }
 0x1be   :  { %v1287_v60 = vadd.f32 %v4663_v0, %v6641_v49  ;;  %v1278_v21 = vpop.f32.mrb[49].mxu0  ;;  %v1745_v36 = vpack.c.bf16 %v4982_v39, %v4978_v23 }
 0x1bf   :  { %v1279_v18 = vadd.f32 %v6641_v49, %v1278_v21  ;;  %v4664_v61 = vpop.f32.mrb[50].mxu0 }
 0x1c0   :  { %4991 = vtanh.f32 %v1287_v60  ;;  %v1290_v9 = vadd.f32 %v4664_v61, %v6641_v49  ;;  %v1281_v10 = vpop.f32.mrb[51].mxu0  ;;  %4789 = vmatprep.mubr.msk.bf16.mxu1 %vm1821_vm6, %v1745_v36 }
 0x1c1   :  { %4993 = vtanh.f32 %v1279_v18  ;;  %v1282_v52 = vadd.f32 %v6641_v49, %v1281_v10  ;;  %4790 = vmatmul.mubr.msk.bf16.gmra.mrb[40].mxu1 %vm1821_vm6, %v1746_v44 }
 0x1c2   :  { %v4984_v8 = vpop.eup %4983  ;;  %4995 = vtanh.f32 %v1290_v9 }
 0x1c3   :  { %v4986_v31 = vpop.eup %4985  ;;  %4997 = vtanh.f32 %v1282_v52 }
 0x1c4   :  { %v4988_v19 = vpop.eup %4987 }
 0x1c5   :  { %v4990_v23 = vpop.eup %4989  ;;  %v4667_v28 = vpop.f32.mrb[52].mxu0  ;;  %v1748_v39 = vpack.c.bf16 %v4988_v19, %v4984_v8 }
 0x1c6   :  { %v1303_v0 = vadd.f32 %v4667_v28, %v6641_v49  ;;  %v1294_v60 = vpop.f32.mrb[53].mxu0  ;;  %v1747_v21 = vpack.c.bf16 %v4990_v23, %v4986_v31 }
 0x1c7   :  { %v1295_v61 = vadd.f32 %v6641_v49, %v1294_v60  ;;  %v4668_v36 = vpop.f32.mrb[54].mxu0 }
 0x1c8   :  { %4999 = vtanh.f32 %v1303_v0  ;;  %v1306_v18 = vadd.f32 %v4668_v36, %v6641_v49  ;;  %v1297_v10 = vpop.f32.mrb[55].mxu0  ;;  %4793 = vmatprep.mubr.msk.bf16.mxu1 %vm1821_vm6, %v1747_v21 }
 0x1c9   :  { %5001 = vtanh.f32 %v1295_v61  ;;  %v1298_v44 = vadd.f32 %v6641_v49, %v1297_v10  ;;  %4794 = vmatmul.mubr.msk.bf16.gmra.mrb[44].mxu1 %vm1821_vm6, %v1748_v39 }
 0x1ca   :  { %v4992_v9 = vpop.eup %4991  ;;  %5003 = vtanh.f32 %v1306_v18 }
 0x1cb   :  { %v4994_v52 = vpop.eup %4993  ;;  %5005 = vtanh.f32 %v1298_v44 }
 0x1cc   :  { %v4996_v8 = vpop.eup %4995 }
 0x1cd   :  { %v4998_v31 = vpop.eup %4997  ;;  %v4671_v19 = vpop.f32.mrb[56].mxu0  ;;  %v1750_v23 = vpack.c.bf16 %v4996_v8, %v4992_v9 }
 0x1ce   :  { %v1319_v28 = vadd.f32 %v4671_v19, %v6641_v49  ;;  %v1310_v0 = vpop.f32.mrb[57].mxu0  ;;  %v1749_v60 = vpack.c.bf16 %v4998_v31, %v4994_v52 }
 0x1cf   :  { %v1311_v36 = vadd.f32 %v6641_v49, %v1310_v0  ;;  %v4672_v21 = vpop.f32.mrb[58].mxu0 }
 0x1d0   :  { %5007 = vtanh.f32 %v1319_v28  ;;  %v1322_v61 = vadd.f32 %v4672_v21, %v6641_v49  ;;  %v1313_v10 = vpop.f32.mrb[59].mxu0  ;;  %4797 = vmatprep.mubr.msk.bf16.mxu1 %vm1821_vm6, %v1749_v60 }
 0x1d1   :  { %5009 = vtanh.f32 %v1311_v36  ;;  %v1314_v39 = vadd.f32 %v6641_v49, %v1313_v10  ;;  %4798 = vmatmul.mubr.msk.bf16.gmra.mrb[48].mxu1 %vm1821_vm6, %v1750_v23 }
 0x1d2   :  { %v5000_v18 = vpop.eup %4999  ;;  %5011 = vtanh.f32 %v1322_v61 }
 0x1d3   :  { %v5002_v44 = vpop.eup %5001  ;;  %5013 = vtanh.f32 %v1314_v39 }
 0x1d4   :  { %v5004_v9 = vpop.eup %5003 }
 0x1d5   :  { %v5006_v52 = vpop.eup %5005  ;;  %v4675_v8 = vpop.f32.mrb[60].mxu0  ;;  %v1752_v31 = vpack.c.bf16 %v5004_v9, %v5000_v18 }
 0x1d6   :  { %v1335_v19 = vadd.f32 %v4675_v8, %v6641_v49  ;;  %v1326_v28 = vpop.f32.mrb[61].mxu0  ;;  %v1751_v0 = vpack.c.bf16 %v5006_v52, %v5002_v44 }
 0x1d7   :  { %v1327_v21 = vadd.f32 %v6641_v49, %v1326_v28  ;;  %v4676_v60 = vpop.f32.mrb[62].mxu0 }
 0x1d8   :  { %5015 = vtanh.f32 %v1335_v19  ;;  %v1338_v36 = vadd.f32 %v4676_v60, %v6641_v49  ;;  %v1329_v10 = vpop.f32.mrb[63].mxu0  ;;  %4801 = vmatprep.mubr.msk.bf16.mxu1 %vm1821_vm6, %v1751_v0 }
 0x1d9   :  { %5017 = vtanh.f32 %v1327_v21  ;;  %v1330_v23 = vadd.f32 %v6641_v49, %v1329_v10  ;;  %4802 = vmatmul.mubr.msk.bf16.gmra.mrb[52].mxu1 %vm1821_vm6, %v1752_v31 }
 0x1da   :  { %v5008_v61 = vpop.eup %5007  ;;  %5019 = vtanh.f32 %v1338_v36 }
 0x1db   :  { %v5010_v39 = vpop.eup %5009  ;;  %5021 = vtanh.f32 %v1330_v23 }
 0x1dc   :  { %v5012_v18 = vpop.eup %5011 }
 0x1dd   :  { %v5014_v44 = vpop.eup %5013  ;;  %v4679_v9 = vpop.f32.mrb[64].mxu0  ;;  %v1754_v52 = vpack.c.bf16 %v5012_v18, %v5008_v61 }
 0x1de   :  { %v1351_v8 = vadd.f32 %v4679_v9, %v6641_v49  ;;  %v1342_v19 = vpop.f32.mrb[65].mxu0  ;;  %v1753_v28 = vpack.c.bf16 %v5014_v44, %v5010_v39 }
 0x1df   :  { %v1343_v60 = vadd.f32 %v6641_v49, %v1342_v19  ;;  %v4680_v0 = vpop.f32.mrb[66].mxu0 }
 0x1e0   :  { %5023 = vtanh.f32 %v1351_v8  ;;  %v1354_v21 = vadd.f32 %v4680_v0, %v6641_v49  ;;  %v1345_v10 = vpop.f32.mrb[67].mxu0  ;;  %4805 = vmatprep.mubr.msk.bf16.mxu1 %vm1821_vm6, %v1753_v28 }
 0x1e1   :  { %5025 = vtanh.f32 %v1343_v60  ;;  %v1346_v31 = vadd.f32 %v6641_v49, %v1345_v10  ;;  %4806 = vmatmul.mubr.msk.bf16.gmra.mrb[56].mxu1 %vm1821_vm6, %v1754_v52 }
 0x1e2   :  { %v5016_v36 = vpop.eup %5015  ;;  %5027 = vtanh.f32 %v1354_v21 }
 0x1e3   :  { %v5018_v23 = vpop.eup %5017  ;;  %5029 = vtanh.f32 %v1346_v31 }
 0x1e4   :  { %v5020_v61 = vpop.eup %5019 }
 0x1e5   :  { %v5022_v39 = vpop.eup %5021  ;;  %v4683_v18 = vpop.f32.mrb[68].mxu0  ;;  %v1756_v44 = vpack.c.bf16 %v5020_v61, %v5016_v36 }
 0x1e6   :  { %v1367_v9 = vadd.f32 %v4683_v18, %v6641_v49  ;;  %v1358_v8 = vpop.f32.mrb[69].mxu0  ;;  %v1755_v19 = vpack.c.bf16 %v5022_v39, %v5018_v23 }
 0x1e7   :  { %v1359_v0 = vadd.f32 %v6641_v49, %v1358_v8  ;;  %v4684_v28 = vpop.f32.mrb[70].mxu0 }
 0x1e8   :  { %5031 = vtanh.f32 %v1367_v9  ;;  %v1370_v60 = vadd.f32 %v4684_v28, %v6641_v49  ;;  %v1361_v10 = vpop.f32.mrb[71].mxu0  ;;  %4809 = vmatprep.mubr.msk.bf16.mxu1 %vm1821_vm6, %v1755_v19 }
 0x1e9   :  { %5033 = vtanh.f32 %v1359_v0  ;;  %v1362_v52 = vadd.f32 %v6641_v49, %v1361_v10  ;;  %4810 = vmatmul.mubr.msk.bf16.gmra.mrb[60].mxu1 %vm1821_vm6, %v1756_v44 }
 0x1ea   :  { %v5024_v21 = vpop.eup %5023  ;;  %5035 = vtanh.f32 %v1370_v60 }
 0x1eb   :  { %v5026_v31 = vpop.eup %5025  ;;  %5037 = vtanh.f32 %v1362_v52 }
 0x1ec   :  { %v5028_v36 = vpop.eup %5027 }
 0x1ed   :  { %v5030_v23 = vpop.eup %5029  ;;  %v4687_v61 = vpop.f32.mrb[72].mxu0  ;;  %v1758_v39 = vpack.c.bf16 %v5028_v36, %v5024_v21 }
 0x1ee   :  { %v1383_v18 = vadd.f32 %v4687_v61, %v6641_v49  ;;  %v1374_v9 = vpop.f32.mrb[73].mxu0  ;;  %v1757_v8 = vpack.c.bf16 %v5030_v23, %v5026_v31 }
 0x1ef   :  { %v1375_v28 = vadd.f32 %v6641_v49, %v1374_v9  ;;  %v4688_v19 = vpop.f32.mrb[74].mxu0 }
 0x1f0   :  { %5039 = vtanh.f32 %v1383_v18  ;;  %v1386_v0 = vadd.f32 %v4688_v19, %v6641_v49  ;;  %v1377_v10 = vpop.f32.mrb[75].mxu0  ;;  %4813 = vmatprep.mubr.msk.bf16.mxu1 %vm1821_vm6, %v1757_v8 }
 0x1f1   :  { %5041 = vtanh.f32 %v1375_v28  ;;  %v1378_v44 = vadd.f32 %v6641_v49, %v1377_v10  ;;  %4814 = vmatmul.mubr.msk.bf16.gmra.mrb[64].mxu1 %vm1821_vm6, %v1758_v39 }
 0x1f2   :  { %v5032_v60 = vpop.eup %5031  ;;  %5043 = vtanh.f32 %v1386_v0 }
 0x1f3   :  { %v5034_v52 = vpop.eup %5033  ;;  %5045 = vtanh.f32 %v1378_v44 }
 0x1f4   :  { %v5036_v21 = vpop.eup %5035 }
 0x1f5   :  { %v5038_v31 = vpop.eup %5037  ;;  %v4691_v36 = vpop.f32.mrb[76].mxu0  ;;  %v1760_v23 = vpack.c.bf16 %v5036_v21, %v5032_v60 }
 0x1f6   :  { %v1399_v61 = vadd.f32 %v4691_v36, %v6641_v49  ;;  %v1390_v18 = vpop.f32.mrb[77].mxu0  ;;  %v1759_v9 = vpack.c.bf16 %v5038_v31, %v5034_v52 }
 0x1f7   :  { %v1391_v19 = vadd.f32 %v6641_v49, %v1390_v18  ;;  %v4692_v8 = vpop.f32.mrb[78].mxu0 }
 0x1f8   :  { %5047 = vtanh.f32 %v1399_v61  ;;  %v1402_v28 = vadd.f32 %v4692_v8, %v6641_v49  ;;  %v1393_v10 = vpop.f32.mrb[79].mxu0  ;;  %4817 = vmatprep.mubr.msk.bf16.mxu1 %vm1821_vm6, %v1759_v9 }
 0x1f9   :  { %5049 = vtanh.f32 %v1391_v19  ;;  %v1394_v39 = vadd.f32 %v6641_v49, %v1393_v10  ;;  %4818 = vmatmul.mubr.msk.bf16.gmra.mrb[68].mxu1 %vm1821_vm6, %v1760_v23 }
 0x1fa   :  { %v5040_v0 = vpop.eup %5039  ;;  %5051 = vtanh.f32 %v1402_v28 }
 0x1fb   :  { %v5042_v44 = vpop.eup %5041  ;;  %5053 = vtanh.f32 %v1394_v39 }
 0x1fc   :  { %v5044_v60 = vpop.eup %5043 }
 0x1fd   :  { %v5046_v52 = vpop.eup %5045  ;;  %v4695_v21 = vpop.f32.mrb[80].mxu0  ;;  %v1762_v31 = vpack.c.bf16 %v5044_v60, %v5040_v0 }
 0x1fe   :  { %v1415_v36 = vadd.f32 %v4695_v21, %v6641_v49  ;;  %v1406_v61 = vpop.f32.mrb[81].mxu0  ;;  %v1761_v18 = vpack.c.bf16 %v5046_v52, %v5042_v44 }
 0x1ff   :  { %v1407_v8 = vadd.f32 %v6641_v49, %v1406_v61  ;;  %v4696_v9 = vpop.f32.mrb[82].mxu0 }
 0x200   :  { %5055 = vtanh.f32 %v1415_v36  ;;  %v1418_v19 = vadd.f32 %v4696_v9, %v6641_v49  ;;  %v1409_v10 = vpop.f32.mrb[83].mxu0  ;;  %4821 = vmatprep.mubr.msk.bf16.mxu1 %vm1821_vm6, %v1761_v18 }
 0x201   :  { %5057 = vtanh.f32 %v1407_v8  ;;  %v1410_v23 = vadd.f32 %v6641_v49, %v1409_v10  ;;  %4822 = vmatmul.mubr.msk.bf16.gmra.mrb[72].mxu1 %vm1821_vm6, %v1762_v31 }
 0x202   :  { %v5048_v28 = vpop.eup %5047  ;;  %5059 = vtanh.f32 %v1418_v19 }
 0x203   :  { %v5050_v39 = vpop.eup %5049  ;;  %5061 = vtanh.f32 %v1410_v23 }
 0x204   :  { %v5052_v0 = vpop.eup %5051 }
 0x205   :  { %v5054_v44 = vpop.eup %5053  ;;  %v4699_v60 = vpop.f32.mrb[84].mxu0  ;;  %v1764_v52 = vpack.c.bf16 %v5052_v0, %v5048_v28 }
 0x206   :  { %v1431_v21 = vadd.f32 %v4699_v60, %v6641_v49  ;;  %v1422_v36 = vpop.f32.mrb[85].mxu0  ;;  %v1763_v61 = vpack.c.bf16 %v5054_v44, %v5050_v39 }
 0x207   :  { %v1423_v9 = vadd.f32 %v6641_v49, %v1422_v36  ;;  %v4700_v18 = vpop.f32.mrb[86].mxu0 }
 0x208   :  { %5063 = vtanh.f32 %v1431_v21  ;;  %v1434_v8 = vadd.f32 %v4700_v18, %v6641_v49  ;;  %v1425_v10 = vpop.f32.mrb[87].mxu0  ;;  %4825 = vmatprep.mubr.msk.bf16.mxu1 %vm1821_vm6, %v1763_v61 }
 0x209   :  { %5065 = vtanh.f32 %v1423_v9  ;;  %v1426_v31 = vadd.f32 %v6641_v49, %v1425_v10  ;;  %4826 = vmatmul.mubr.msk.bf16.gmra.mrb[76].mxu1 %vm1821_vm6, %v1764_v52 }
 0x20a   :  { %v5056_v19 = vpop.eup %5055  ;;  %5067 = vtanh.f32 %v1434_v8 }
 0x20b   :  { %v5058_v23 = vpop.eup %5057  ;;  %5069 = vtanh.f32 %v1426_v31 }
 0x20c   :  { %v5060_v28 = vpop.eup %5059 }
 0x20d   :  { %v5062_v39 = vpop.eup %5061  ;;  %v4703_v0 = vpop.f32.mrb[88].mxu0  ;;  %v1766_v44 = vpack.c.bf16 %v5060_v28, %v5056_v19 }
 0x20e   :  { %v1447_v60 = vadd.f32 %v4703_v0, %v6641_v49  ;;  %v1438_v21 = vpop.f32.mrb[89].mxu0  ;;  %v1765_v36 = vpack.c.bf16 %v5062_v39, %v5058_v23 }
 0x20f   :  { %v1439_v18 = vadd.f32 %v6641_v49, %v1438_v21  ;;  %v4704_v61 = vpop.f32.mrb[90].mxu0 }
 0x210   :  { %5071 = vtanh.f32 %v1447_v60  ;;  %v1450_v9 = vadd.f32 %v4704_v61, %v6641_v49  ;;  %v1441_v10 = vpop.f32.mrb[91].mxu0  ;;  %4829 = vmatprep.mubr.msk.bf16.mxu1 %vm1821_vm6, %v1765_v36 }
 0x211   :  { %5073 = vtanh.f32 %v1439_v18  ;;  %v1442_v52 = vadd.f32 %v6641_v49, %v1441_v10  ;;  %4830 = vmatmul.mubr.msk.bf16.gmra.mrb[80].mxu1 %vm1821_vm6, %v1766_v44  ;;  %v6924_v44 = vld [vmem:[%s9530_s2] ss:$0 sm:$0xff]  ;;  %s5467_s2 = smov [#allocation2]  }
 0x212   :  { %v5064_v8 = vpop.eup %5063  ;;  %5075 = vtanh.f32 %v1450_v9  ;;  %s4116_s29 = sshll.u32 %s5467_s2, 4  ;;  %s4117_s29 = int_to_ptr.vmem [resolvable:$true] %s4116_s29 }
 0x213   :  { %v5066_v31 = vpop.eup %5065  ;;  %5077 = vtanh.f32 %v1442_v52  ;;  %s5440_s30 = scalar_lea.vmem %s4117_s29, 16  ;;  %s5444_s5 = scalar_lea.vmem %s4117_s29, 32 }
 0x214   :  { %v5068_v19 = vpop.eup %5067  ;;  %p5441_p0 = scmp.ne.s32.totalorder %s4117_s29, %s5440_s30  ;;  %p5445_p1 = scmp.lt.s32.totalorder %s4117_s29, %s4117_s29 }
 0x215   :  { %v5070_v23 = vpop.eup %5069  ;;  %v4707_v28 = vpop.f32.mrb[92].mxu0  ;;  %v1768_v39 = vpack.c.bf16 %v5068_v19, %v5064_v8  ;;  %p5446_p2 = scmp.lt.s32.totalorder %s5444_s5, %s5440_s30 }
 0x216   :  { %v1463_v0 = vadd.f32 %v4707_v28, %v6641_v49  ;;  %v1454_v60 = vpop.f32.mrb[93].mxu0  ;;  %v1767_v21 = vpack.c.bf16 %v5070_v23, %v5066_v31 }
 0x217   :  { %v1455_v61 = vadd.f32 %v6641_v49, %v1454_v60  ;;  %v4708_v36 = vpop.f32.mrb[94].mxu0  ;;  %p5447_p3 = por %p5446_p2, %p5445_p1 }
 0x218   :  { %5079 = vtanh.f32 %v1463_v0  ;;  %v1466_v18 = vadd.f32 %v6924_v44, %v4708_v36  ;;  %v1457_v9 = vpop.f32.mrb[95].mxu0  ;;  %4833 = vmatprep.mubr.msk.bf16.mxu1 %vm1821_vm6, %v1767_v21 }
 0x219   :  { %5081 = vtanh.f32 %v1455_v61  ;;  %v1458_v10 = vadd.f32 %v6924_v44, %v1457_v9  ;;  %4834 = vmatmul.mubr.msk.bf16.gmra.mrb[84].mxu1 %vm1821_vm6, %v1768_v39  ;;  %p5448_p4 = pnand %p5447_p3, %p5441_p0 }
 0x21a   :  { %v5072_v52 = vpop.eup %5071  ;;  %5083 = vtanh.f32 %v1466_v18 }
 0x21b   :  { %v5074_v49 = vpop.eup %5073  ;;  %5085 = vtanh.f32 %v1458_v10 }
 0x21c   :  { %v5076_v8 = vpop.eup %5075 }
 0x21d   :  { %v5078_v31 = vpop.eup %5077  ;;  %v4711_v19 = vpop.f32.mrb[96].mxu0  ;;  %v1770_v23 = vpack.c.bf16 %v5076_v8, %v5072_v52 }
 0x21e   :  { %v1479_v28 = vadd.f32 %v6924_v44, %v4711_v19  ;;  %v1470_v0 = vpop.f32.mrb[97].mxu0  ;;  %v1769_v60 = vpack.c.bf16 %v5078_v31, %v5074_v49 }
 0x21f   :  { %v1471_v36 = vadd.f32 %v6924_v44, %v1470_v0  ;;  %v4712_v21 = vpop.f32.mrb[98].mxu0 }
 0x220   :  { %5087 = vtanh.f32 %v1479_v28  ;;  %v1482_v61 = vadd.f32 %v6924_v44, %v4712_v21  ;;  %v1473_v9 = vpop.f32.mrb[99].mxu0  ;;  %4837 = vmatprep.mubr.msk.bf16.mxu1 %vm1821_vm6, %v1769_v60 }
 0x221   :  { %5089 = vtanh.f32 %v1471_v36  ;;  %v1474_v39 = vadd.f32 %v6924_v44, %v1473_v9  ;;  %4838 = vmatmul.mubr.msk.bf16.gmra.mrb[88].mxu1 %vm1821_vm6, %v1770_v23 }
 0x222   :  { %v5080_v18 = vpop.eup %5079  ;;  %5091 = vtanh.f32 %v1482_v61 }
 0x223   :  { %v5082_v10 = vpop.eup %5081  ;;  %5093 = vtanh.f32 %v1474_v39 }
 0x224   :  { %v5084_v52 = vpop.eup %5083 }
 0x225   :  { %v5086_v49 = vpop.eup %5085  ;;  %v4715_v8 = vpop.f32.mrb[100].mxu0  ;;  %v1772_v31 = vpack.c.bf16 %v5084_v52, %v5080_v18 }
 0x226   :  { %v1495_v19 = vadd.f32 %v6924_v44, %v4715_v8  ;;  %v1486_v28 = vpop.f32.mrb[101].mxu0  ;;  %v1771_v0 = vpack.c.bf16 %v5086_v49, %v5082_v10 }
 0x227   :  { %v1487_v21 = vadd.f32 %v6924_v44, %v1486_v28  ;;  %v4716_v60 = vpop.f32.mrb[102].mxu0 }
 0x228   :  { %5095 = vtanh.f32 %v1495_v19  ;;  %v1498_v36 = vadd.f32 %v6924_v44, %v4716_v60  ;;  %v1489_v9 = vpop.f32.mrb[103].mxu0  ;;  %4841 = vmatprep.mubr.msk.bf16.mxu1 %vm1821_vm6, %v1771_v0 }
 0x229   :  { %5097 = vtanh.f32 %v1487_v21  ;;  %v1490_v23 = vadd.f32 %v6924_v44, %v1489_v9  ;;  %4842 = vmatmul.mubr.msk.bf16.gmra.mrb[92].mxu1 %vm1821_vm6, %v1772_v31 }
 0x22a   :  { %v5088_v61 = vpop.eup %5087  ;;  %5099 = vtanh.f32 %v1498_v36 }
 0x22b   :  { %v5090_v39 = vpop.eup %5089  ;;  %5101 = vtanh.f32 %v1490_v23 }
 0x22c   :  { %v5092_v18 = vpop.eup %5091 }
 0x22d   :  { %v5094_v10 = vpop.eup %5093  ;;  %v4719_v52 = vpop.f32.mrb[104].mxu0  ;;  %v1774_v49 = vpack.c.bf16 %v5092_v18, %v5088_v61 }
 0x22e   :  { %v1511_v8 = vadd.f32 %v6924_v44, %v4719_v52  ;;  %v1502_v19 = vpop.f32.mrb[105].mxu0  ;;  %v1773_v28 = vpack.c.bf16 %v5094_v10, %v5090_v39 }
 0x22f   :  { %v1503_v60 = vadd.f32 %v6924_v44, %v1502_v19  ;;  %v4720_v0 = vpop.f32.mrb[106].mxu0 }
 0x230   :  { %5103 = vtanh.f32 %v1511_v8  ;;  %v1514_v21 = vadd.f32 %v6924_v44, %v4720_v0  ;;  %v1505_v9 = vpop.f32.mrb[107].mxu0  ;;  %4845 = vmatprep.mubr.msk.bf16.mxu1 %vm1821_vm6, %v1773_v28 }
 0x231   :  { %5105 = vtanh.f32 %v1503_v60  ;;  %v1506_v31 = vadd.f32 %v6924_v44, %v1505_v9  ;;  %4846 = vmatmul.mubr.msk.bf16.gmra.mrb[96].mxu1 %vm1821_vm6, %v1774_v49 }
 0x232   :  { %v5096_v36 = vpop.eup %5095  ;;  %5107 = vtanh.f32 %v1514_v21 }
 0x233   :  { %v5098_v23 = vpop.eup %5097  ;;  %5109 = vtanh.f32 %v1506_v31 }
 0x234   :  { %v5100_v61 = vpop.eup %5099 }
 0x235   :  { %v5102_v39 = vpop.eup %5101  ;;  %v4723_v18 = vpop.f32.mrb[108].mxu0  ;;  %v1776_v10 = vpack.c.bf16 %v5100_v61, %v5096_v36 }
 0x236   :  { %v1527_v52 = vadd.f32 %v6924_v44, %v4723_v18  ;;  %v1518_v8 = vpop.f32.mrb[109].mxu0  ;;  %v1775_v19 = vpack.c.bf16 %v5102_v39, %v5098_v23 }
 0x237   :  { %v1519_v0 = vadd.f32 %v6924_v44, %v1518_v8  ;;  %v4724_v28 = vpop.f32.mrb[110].mxu0 }
 0x238   :  { %5111 = vtanh.f32 %v1527_v52  ;;  %v1530_v60 = vadd.f32 %v6924_v44, %v4724_v28  ;;  %v1521_v9 = vpop.f32.mrb[111].mxu0  ;;  %4849 = vmatprep.mubr.msk.bf16.mxu1 %vm1821_vm6, %v1775_v19 }
 0x239   :  { %5113 = vtanh.f32 %v1519_v0  ;;  %v1522_v49 = vadd.f32 %v6924_v44, %v1521_v9  ;;  %4850 = vmatmul.mubr.msk.bf16.gmra.mrb[100].mxu1 %vm1821_vm6, %v1776_v10 }
 0x23a   :  { %v5104_v21 = vpop.eup %5103  ;;  %5115 = vtanh.f32 %v1530_v60 }
 0x23b   :  { %v5106_v31 = vpop.eup %5105  ;;  %5117 = vtanh.f32 %v1522_v49 }
 0x23c   :  { %v5108_v36 = vpop.eup %5107 }
 0x23d   :  { %v5110_v23 = vpop.eup %5109  ;;  %v4727_v61 = vpop.f32.mrb[112].mxu0  ;;  %v1778_v39 = vpack.c.bf16 %v5108_v36, %v5104_v21 }
 0x23e   :  { %v1543_v18 = vadd.f32 %v6924_v44, %v4727_v61  ;;  %v1534_v52 = vpop.f32.mrb[113].mxu0  ;;  %v1777_v8 = vpack.c.bf16 %v5110_v23, %v5106_v31  ;;  %v9807_v31 = vmov 0.0  }
 0x23f   :  { %v1535_v28 = vadd.f32 %v6924_v44, %v1534_v52  ;;  %v4728_v19 = vpop.f32.mrb[114].mxu0  ;;  %v4142_v36 = vsel %vm551_vm12, 1.0, %v9807_v31  ;;  %v4143_v51 = vsel %vm552_vm11, 1.0, %v9807_v31  ;;  %vm10000_vm11 = vcmp.eq.s32.totalorder %v5716_v14, %v5939_v12 }
 0x240   :  { %5119 = vtanh.f32 %v1543_v18  ;;  %v1546_v0 = vadd.f32 %v6924_v44, %v4728_v19  ;;  %v1537_v9 = vpop.f32.mrb[115].mxu0  ;;  %4853 = vmatprep.mubr.msk.bf16.mxu1 %vm1821_vm6, %v1777_v8  ;;  %v4140_v18 = vsel %vm549_vm9, 1.0, %v9807_v31  ;;  %vm9999_vm9 = vcmp.eq.s32.totalorder %v5716_v14, %v5873_v62 }
 0x241   :  { %5121 = vtanh.f32 %v1535_v28  ;;  %v1538_v10 = vadd.f32 %v6924_v44, %v1537_v9  ;;  %4854 = vmatmul.mubr.msk.bf16.gmra.mrb[104].mxu1 %vm1821_vm6, %v1778_v39  ;;  %vm10002_vm12 = vcmp.eq.s32.totalorder %v5716_v14, %v5917_v7 }
 0x242   :  { %v5112_v60 = vpop.eup %5111  ;;  %5123 = vtanh.f32 %v1546_v0 }
 0x243   :  { %v5114_v49 = vpop.eup %5113  ;;  %5125 = vtanh.f32 %v1538_v10 }
 0x244   :  { %v5116_v21 = vpop.eup %5115  ;;  %v6964_v23 = vpop.f32.mrb[0].mxu1 }
 0x245   :  { %9989 = vst [vmem:[#allocation72_spill] sm:$0xff] %v6964_v23  ;;  %v5118_v61 = vpop.eup %5117  ;;  %v6971_v39 = vmul.f32 %v6964_v23, %v4142_v36  ;;  %v6973_v52 = vpop.f32.mrb[1].mxu1  ;;  %2547 = vmax.xlane.f32.xlu0 %v6964_v23  ;;  %v1780_v28 = vpack.c.bf16 %v5116_v21, %v5112_v60  ;;  %v4141_v36 = vsel %vm550_vm8, 1.0, %v9807_v31  ;;  %vm9998_vm8 = vcmp.eq.s32.totalorder %v5716_v14, %v5895_v2 }
 0x246   :  { %9990 = vst [vmem:[#allocation73_spill] sm:$0xff] %v6973_v52  ;;  %v4731_v8 = vpop.f32.mrb[116].mxu0  ;;  %v6981_v19 = vmul.f32 %v4140_v18, %v6973_v52  ;;  %v6984_v9 = vpop.f32.mrb[2].mxu1  ;;  %v1779_v10 = vpack.c.bf16 %v5118_v61, %v5114_v49 }
 0x247   :  { %v1559_v47 = vadd.f32 %v6924_v44, %v4731_v8  ;;  %v1550_v0 = vpop.f32.mrb[117].mxu0  ;;  %9991 = vst [vmem:[#allocation74_spill] sm:$0xff] %v6984_v9  ;;  %v6992_v21 = vmul.f32 %v6984_v9, %v4143_v51  ;;  %v6994_v23 = vpop.f32.mrb[3].mxu1 }
 0x248   :  { %v1551_v60 = vadd.f32 %v6924_v44, %v1550_v0  ;;  %v4732_v50 = vpop.f32.mrb[118].mxu0  ;;  %9992 = vst [vmem:[#allocation75_spill] sm:$0xff] %v6994_v23  ;;  %v6998_v8 = vmul.f32 %v4141_v36, %v6994_v23  ;;  %2545 = vmax.xlane.f32.xlu1 %v6994_v23  ;;  %4857 = vmatprep.mubr.msk.bf16.mxu1 %vm1821_vm6, %v1779_v10  ;;  %v4146_v0 = vsel %vm555_vm2, 1.0, %v9807_v31 }
 0x249   :  { %5127 = vtanh.f32 %v1559_v47  ;;  %v1562_v18 = vadd.f32 %v6924_v44, %v4732_v50  ;;  %v1553_v49 = vpop.f32.mrb[119].mxu0  ;;  %2543 = vmax.xlane.f32.xlu0 %v6973_v52  ;;  %4858 = vmatmul.mubr.msk.bf16.gmra.mrb[108].mxu1 %vm1821_vm6, %v1780_v28  ;;  %vm10009_vm2 = vcmp.eq.s32.totalorder %v5716_v14, %v5959_v17 }
 0x24a   :  { %5129 = vtanh.f32 %v1551_v60  ;;  %v1554_v46 = vadd.f32 %v6924_v44, %v1553_v49  ;;  %v5120_v61 = vpop.eup %5119  ;;  %v4144_v60 = vsel %vm553_vm15, 1.0, %v9807_v31  ;;  %v4147_v49 = vsel %vm556_vm1, 1.0, %v9807_v31 }
 0x24b   :  { %5131 = vtanh.f32 %v1562_v18  ;;  %v5122_v51 = vpop.eup %5121  ;;  %vm10006_vm15 = vcmp.eq.s32.totalorder %v5716_v14, %v5915_v6  ;;  %vm10007_vm1 = vcmp.eq.s32.totalorder %v5716_v14, %v5981_v22 }
 0x24c   :  { %5133 = vtanh.f32 %v1554_v46  ;;  %v5124_v47 = vpop.eup %5123  ;;  %v7009_v36 = vpop.f32.mrb[4].mxu1 }
 0x24d   :  { %9993 = vst [vmem:[#allocation76_spill] sm:$0xff] %v7009_v36  ;;  %v5126_v10 = vpop.eup %5125  ;;  %v7016_v28 = vmul.f32 %v7009_v36, %v4146_v0  ;;  %2555 = vmax.xlane.f32.xlu1 %v7009_v36  ;;  %v7019_v50 = vpop.f32.mrb[5].mxu1  ;;  %2549 = vmax.xlane.f32.xlu0 %v6984_v9  ;;  %v1782_v59 = vpack.c.bf16 %v5124_v47, %v5120_v61  ;;  %v4145_v9 = vsel %vm554_vm14, 1.0, %v9807_v31 }
 0x24e   :  { %9994 = vst [vmem:[#allocation77_spill] sm:$0xff] %v7019_v50  ;;  %v4735_v18 = vpop.f32.mrb[120].mxu0  ;;  %v7027_v46 = vmul.f32 %v4144_v60, %v7019_v50  ;;  %v7030_v23 = vpop.f32.mrb[6].mxu1  ;;  %v1781_v36 = vpack.c.bf16 %v5126_v10, %v5122_v51  ;;  %vm10004_vm14 = vcmp.eq.s32.totalorder %v5716_v14, %v5937_v11 }
 0x24f   :  { %v1575_v55 = vadd.f32 %v6924_v44, %v4735_v18  ;;  %v1566_v0 = vpop.f32.mrb[121].mxu0  ;;  %9995 = vst [vmem:[#allocation78_spill] sm:$0xff] %v7030_v23  ;;  %v7038_v47 = vmul.f32 %v7030_v23, %v4147_v49  ;;  %v7040_v52 = vpop.f32.mrb[7].mxu1  ;;  %v4155_v12 = vsel %vm10004_vm14, 1.0, %v9807_v31  ;;  %vm10027_vm14 = vcmp.eq.s32.totalorder %v5716_v14, %v6063_v37 }
 0x250   :  { %v1567_v61 = vadd.f32 %v6924_v44, %v1566_v0  ;;  %v4736_v58 = vpop.f32.mrb[122].mxu0  ;;  %9996 = vst [vmem:[#allocation79_spill] sm:$0xff] %v7040_v52  ;;  %v7044_v18 = vmul.f32 %v4145_v9, %v7040_v52  ;;  %4861 = vmatprep.mubr.msk.bf16.mxu1 %vm1821_vm6, %v1781_v36  ;;  %v4150_v9 = vsel %vm559_vm10, 1.0, %v9807_v31  ;;  %vm10013_vm10 = vcmp.eq.s32.totalorder %v5716_v14, %v5957_v16 }
 0x251   :  { %5135 = vtanh.f32 %v1575_v55  ;;  %v1578_v60 = vadd.f32 %v6924_v44, %v4736_v58  ;;  %v1569_v51 = vpop.f32.mrb[123].mxu0  ;;  %2551 = vmax.xlane.f32.xlu1 %v7019_v50  ;;  %2557 = vmax.xlane.f32.xlu0 %v7030_v23 }
 0x252   :  { %5137 = vtanh.f32 %v1567_v61  ;;  %v1570_v54 = vadd.f32 %v6924_v44, %v1569_v51  ;;  %4862 = vmatmul.mubr.msk.bf16.gmra.mrb[112].mxu1 %vm1821_vm6, %v1782_v59  ;;  %v4148_v61 = vsel %vm557_vm5, 1.0, %v9807_v31  ;;  %v4151_v51 = vsel %vm9998_vm8, 1.0, %v9807_v31 }
 0x253   :  { %v5128_v10 = vpop.eup %5127  ;;  %5139 = vtanh.f32 %v1578_v60  ;;  %vm10011_vm5 = vcmp.eq.s32.totalorder %v5716_v14, %v5979_v20  ;;  %vm10017_vm8 = vcmp.eq.s32.totalorder %v5716_v14, %v6001_v26 }
 0x254   :  { %v5130_v49 = vpop.eup %5129  ;;  %5141 = vtanh.f32 %v1570_v54  ;;  %v7055_v36 = vpop.f32.mrb[8].mxu1  ;;  %v4159_v22 = vsel %vm10011_vm5, 1.0, %v9807_v31  ;;  %vm10034_vm5 = vcmp.eq.s32.totalorder %v5716_v14, %v6105_v45 }
 0x255   :  { %v5132_v55 = vpop.eup %5131  ;;  %9997 = vst [vmem:[#allocation80_spill] sm:$0xff] %v7055_v36  ;;  %v7062_v58 = vmul.f32 %v7055_v36, %v4150_v9  ;;  %2563 = vmax.xlane.f32.xlu1 %v7055_v36  ;;  %v7065_v59 = vpop.f32.mrb[9].mxu1  ;;  %2553 = vmax.xlane.f32.xlu0 %v7040_v52  ;;  %v4149_v52 = vsel %vm9999_vm9, 1.0, %v9807_v31  ;;  %vm10021_vm9 = vcmp.eq.s32.totalorder %v5716_v14, %v5999_v25 }
 0x256   :  { %v5134_v0 = vpop.eup %5133  ;;  %v4739_v60 = vpop.f32.mrb[124].mxu0  ;;  %v1784_v3 = vpack.c.bf16 %v5132_v55, %v5128_v10  ;;  %v7073_v54 = vmul.f32 %v4148_v61, %v7065_v59  ;;  %v4161_v26 = vsel %vm10021_vm9, 1.0, %v9807_v31  ;;  %vm10044_vm9 = vcmp.eq.s32.totalorder %v5716_v14, %v6128_v56 }
 0x257   :  { %v1591_v63 = vadd.f32 %v6924_v44, %v4739_v60  ;;  %v1582_v9 = vpop.f32.mrb[125].mxu0  ;;  %v7076_v23 = vpop.f32.mrb[10].mxu1  ;;  %v1783_v36 = vpack.c.bf16 %v5134_v0, %v5130_v49 }
 0x258   :  { %v1583_v10 = vadd.f32 %v6924_v44, %v1582_v9  ;;  %v7084_v55 = vmul.f32 %v7076_v23, %v4151_v51  ;;  %v4740_v2 = vpop.f32.mrb[126].mxu0  ;;  %v7086_v50 = vpop.f32.mrb[11].mxu1 }
 0x259   :  { %5143 = vtanh.f32 %v1591_v63  ;;  %v1594_v61 = vadd.f32 %v6924_v44, %v4740_v2  ;;  %v7090_v60 = vmul.f32 %v4149_v52, %v7086_v50  ;;  %v1585_v49 = vpop.f32.mrb[127].mxu0  ;;  %4865 = vmatprep.mubr.msk.bf16.mxu1 %vm1821_vm6, %v1783_v36  ;;  %2559 = vmax.xlane.f32.xlu1 %v7065_v59  ;;  %v4154_v52 = vsel %vm10000_vm11, 1.0, %v9807_v31 }
 0x25a   :  { %5145 = vtanh.f32 %v1583_v10  ;;  %v1586_v62 = vadd.f32 %v6924_v44, %v1585_v49  ;;  %2565 = vmax.xlane.f32.xlu0 %v7076_v23  ;;  %4866 = vmatmul.mubr.msk.bf16.gmra.mrb[116].mxu1 %vm1821_vm6, %v1784_v3  ;;  %v4152_v44 = vsel %vm10002_vm12, 1.0, %v9807_v31  ;;  %vm10023_vm11 = vcmp.eq.s32.totalorder %v5716_v14, %v6065_v38 }
 0x25b   :  { %v5136_v0 = vpop.eup %5135  ;;  %5147 = vtanh.f32 %v1594_v61  ;;  %vm10025_vm12 = vcmp.eq.s32.totalorder %v5716_v14, %v6043_v34  ;;  %v4167_v38 = vsel %vm10027_vm14, 1.0, %v9807_v31  ;;  %vm10050_vm14 = vcmp.eq.s32.totalorder %v5716_v14, %v6201_v24 }
 0x25c   :  { %v5138_v51 = vpop.eup %5137  ;;  %5149 = vtanh.f32 %v1586_v62  ;;  %v7101_v36 = vpop.f32.mrb[12].mxu1  ;;  %v4153_v62 = vsel %vm10006_vm15, 1.0, %v9807_v31  ;;  %vm10029_vm15 = vcmp.eq.s32.totalorder %v5716_v14, %v6041_v33 }
 0x25d   :  { %v5140_v63 = vpop.eup %5139  ;;  %10001 = vst [vmem:[#allocation81_spill] sm:$0xff] %v7101_v36  ;;  %v7108_v10 = vmul.f32 %v7101_v36, %v4154_v52  ;;  %2571 = vmax.xlane.f32.xlu1 %v7101_v36  ;;  %v7111_v3 = vpop.f32.mrb[13].mxu1  ;;  %v4165_v34 = vsel %vm10029_vm15, 1.0, %v9807_v31  ;;  %vm10052_vm15 = vcmp.eq.s32.totalorder %v5716_v14, %v6176_v13 }
 0x25e   :  { %v5142_v9 = vpop.eup %5141  ;;  %10003 = vst [vmem:[#allocation82_spill] sm:$0xff] %v7111_v3  ;;  %2561 = vmax.xlane.f32.xlu0 %v7086_v50  ;;  %v1786_v2 = vpack.c.bf16 %v5140_v63, %v5136_v0  ;;  %v7119_v61 = vmul.f32 %v4152_v44, %v7111_v3  ;;  %v7121_v7 = vpop.f32.mrb[14].mxu1 }
 0x25f   :  { %10005 = vst [vmem:[#allocation83_spill] sm:$0xff] %v7121_v7  ;;  %v1785_v49 = vpack.c.bf16 %v5142_v9, %v5138_v51  ;;  %v7128_v52 = vmul.f32 %v7121_v7, %v4155_v12  ;;  %v7130_v0 = vpop.f32.mrb[15].mxu1  ;;  %v4158_v9 = vsel %vm10007_vm1, 1.0, %v9807_v31  ;;  %vm10030_vm1 = vcmp.eq.s32.totalorder %v5716_v14, %v6107_v48 }
 0x260   :  { %v7133_v63 = vmul.f32 %v4153_v62, %v7130_v0  ;;  %v4171_v48 = vsel %vm10034_vm5, 1.0, %v9807_v31  ;;  %vm10058_vm5 = vcmp.eq.s32.totalorder %v5716_v14, %v6243_v40 }
 0x261   :  { %4869 = vmatprep.mubr.msk.bf16.mxu1 %vm1821_vm6, %v1785_v49  ;;  %2567 = vmax.xlane.f32.xlu1 %v7111_v3  ;;  %v4156_v49 = vsel %vm10009_vm2, 1.0, %v9807_v31  ;;  %vm10032_vm2 = vcmp.eq.s32.totalorder %v5716_v14, %v6085_v42 }
 0x262   :  { %2573 = vmax.xlane.f32.xlu0 %v7121_v7  ;;  %4870 = vmatmul.mubr.msk.bf16.gmra.mrb[120].mxu1 %vm1821_vm6, %v1786_v2 }
 0x263   :  { %v5144_v11 = vpop.eup %5143 }
 0x264   :  { %v5146_v51 = vpop.eup %5145  ;;  %v7143_v44 = vpop.f32.mrb[16].mxu1 }
 0x265   :  { %v5148_v6 = vpop.eup %5147  ;;  %10008 = vst [vmem:[#allocation84_spill] sm:$0xff] %v7143_v44  ;;  %v3377_v62 = vmul.f32 %v7143_v44, %v4158_v9  ;;  %2579 = vmax.xlane.f32.xlu1 %v7143_v44  ;;  %v7151_v2 = vpop.f32.mrb[17].mxu1  ;;  %v4157_v9 = vsel %vm10013_vm10, 1.0, %v9807_v31  ;;  %vm10036_vm10 = vcmp.eq.s32.totalorder %v5716_v14, %v6083_v41 }
 0x266   :  { %v5150_v12 = vpop.eup %5149  ;;  %10010 = vst [vmem:[#allocation85_spill] sm:$0xff] %v7151_v2  ;;  %2569 = vmax.xlane.f32.xlu0 %v7130_v0  ;;  %v1788_v7 = vpack.c.bf16 %v5148_v6, %v5144_v11  ;;  %v3375_v3 = vmul.f32 %v4156_v49, %v7151_v2  ;;  %v7159_v36 = vpop.f32.mrb[18].mxu1  ;;  %v4169_v42 = vsel %vm10036_vm10, 1.0, %v9807_v31  ;;  %vm10060_vm10 = vcmp.eq.s32.totalorder %v5716_v14, %v6221_v32 }
 0x267   :  { %10012 = vst [vmem:[#allocation86_spill] sm:$0xff] %v7159_v36  ;;  %v1787_v17 = vpack.c.bf16 %v5150_v12, %v5146_v51  ;;  %v7166_v44 = vadd.f32 %v3377_v62, %v6971_v39  ;;  %v3378_v11 = vmul.f32 %v7159_v36, %v4159_v22  ;;  %v7169_v6 = vpop.f32.mrb[19].mxu1  ;;  %v4162_v39 = vsel %vm10015_vm13, 1.0, %v9807_v31 }
 0x268   :  { %10014 = vst [vmem:[#allocation87_spill] sm:$0xff] %v7169_v6  ;;  %v7172_v20 = vadd.f32 %v3375_v3, %v6981_v19  ;;  %v3376_v49 = vmul.f32 %v4157_v9, %v7169_v6  ;;  %vm10038_vm13 = vcmp.eq.s32.totalorder %v5716_v14, %v6155_v4 }
 0x269   :  { %4873 = vmatprep.mubr.msk.bf16.mxu1 %vm1821_vm6, %v1787_v17  ;;  %v7177_v51 = vadd.f32 %v3378_v11, %v6992_v21  ;;  %2575 = vmax.xlane.f32.xlu1 %v7151_v2  ;;  %v4160_v21 = vsel %vm10017_vm8, 1.0, %v9807_v31  ;;  %vm10040_vm8 = vcmp.eq.s32.totalorder %v5716_v14, %v6130_v57  ;;  %v4173_v57 = vsel %vm10044_vm9, 1.0, %v9807_v31 }
 0x26a   :  { %2581 = vmax.xlane.f32.xlu0 %v7159_v36  ;;  %v7182_v16 = vadd.f32 %v3376_v49, %v6998_v8  ;;  %4874 = vmatmul.mubr.msk.bf16.gmra.mrb[124].mxu1 %vm1821_vm6, %v1788_v7  ;;  %vm10019_vm6 = vcmp.eq.s32.totalorder %v5716_v14, %v6021_v29 }
 0x26b   :  { %v4163_v30 = vsel %vm10019_vm6, 1.0, %v9807_v31  ;;  %vm10042_vm6 = vcmp.eq.s32.totalorder %v5716_v14, %v6153_v1 }
 0x26c   :  { %v7189_v19 = vpop.f32.mrb[20].mxu1  ;;  %v4175_v4 = vsel %vm10042_vm6, 1.0, %v9807_v31 }
 0x26d   :  { %10016 = vst [vmem:[#allocation88_spill] sm:$0xff] %v7189_v19  ;;  %v3381_v3 = vmul.f32 %v7189_v19, %v4162_v39  ;;  %2587 = vmax.xlane.f32.xlu1 %v7189_v19  ;;  %v7197_v8 = vpop.f32.mrb[21].mxu1 }
 0x26e   :  { %10018 = vst [vmem:[#allocation89_spill] sm:$0xff] %v7197_v8  ;;  %2577 = vmax.xlane.f32.xlu0 %v7169_v6  ;;  %v3379_v7 = vmul.f32 %v4160_v21, %v7197_v8  ;;  %v7205_v12 = vpop.f32.mrb[22].mxu1 }
 0x26f   :  { %10020 = vst [vmem:[#allocation90_spill] sm:$0xff] %v7205_v12  ;;  %v7212_v62 = vadd.f32 %v3381_v3, %v7016_v28  ;;  %v3382_v22 = vmul.f32 %v7205_v12, %v4163_v30  ;;  %v7215_v17 = vpop.f32.mrb[23].mxu1  ;;  %v4166_v28 = vsel %vm10023_vm11, 1.0, %v9807_v31  ;;  %vm10046_vm11 = vcmp.eq.s32.totalorder %v5716_v14, %v6203_v27 }
 0x270   :  { %10022 = vst [vmem:[#allocation91_spill] sm:$0xff] %v7215_v17  ;;  %v7218_v9 = vadd.f32 %v3379_v7, %v7027_v46  ;;  %v3380_v29 = vmul.f32 %v4161_v26, %v7215_v17  ;;  %v4164_v46 = vsel %vm10025_vm12, 1.0, %v9807_v31  ;;  %vm10048_vm12 = vcmp.eq.s32.totalorder %v5716_v14, %v6178_v15 }
 0x271   :  { %v7222_v11 = vadd.f32 %v3382_v22, %v7038_v47  ;;  %2583 = vmax.xlane.f32.xlu1 %v7197_v8  ;;  %v4179_v27 = vsel %vm10050_vm14, 1.0, %v9807_v31  ;;  %v4177_v15 = vsel %vm10052_vm15, 1.0, %v9807_v31 }
 0x272   :  { %2589 = vmax.xlane.f32.xlu0 %v7205_v12  ;;  %v7227_v25 = vadd.f32 %v3380_v29, %v7044_v18 }
 0x274   :  { %v7233_v49 = vpop.f32.mrb[24].mxu1 }
 0x275   :  { %10024 = vst [vmem:[#allocation92_spill] sm:$0xff] %v7233_v49  ;;  %v3385_v47 = vmul.f32 %v7233_v49, %v4166_v28  ;;  %2595 = vmax.xlane.f32.xlu1 %v7233_v49  ;;  %v7241_v39 = vpop.f32.mrb[25].mxu1 }
 0x276   :  { %10026 = vst [vmem:[#allocation93_spill] sm:$0xff] %v7241_v39  ;;  %2585 = vmax.xlane.f32.xlu0 %v7215_v17  ;;  %v3383_v18 = vmul.f32 %v4164_v46, %v7241_v39  ;;  %v7249_v21 = vpop.f32.mrb[26].mxu1 }
 0x277   :  { %10028 = vst [vmem:[#allocation94_spill] sm:$0xff] %v7249_v21  ;;  %v7256_v3 = vadd.f32 %v3385_v47, %v7062_v58  ;;  %v3386_v30 = vmul.f32 %v7249_v21, %v4167_v38  ;;  %v7259_v7 = vpop.f32.mrb[27].mxu1  ;;  %v4170_v58 = vsel %vm10030_vm1, 1.0, %v9807_v31  ;;  %vm10054_vm1 = vcmp.eq.s32.totalorder %v5716_v14, %v6245_v43 }
 0x278   :  { %v7262_v26 = vadd.f32 %v3383_v18, %v7073_v54  ;;  %v3384_v37 = vmul.f32 %v4165_v34, %v7259_v7  ;;  %v4168_v54 = vsel %vm10032_vm2, 1.0, %v9807_v31  ;;  %vm10056_vm2 = vcmp.eq.s32.totalorder %v5716_v14, %v6223_v35 }
 0x279   :  { %v7266_v22 = vadd.f32 %v3386_v30, %v7084_v55  ;;  %2591 = vmax.xlane.f32.xlu1 %v7241_v39  ;;  %v4183_v43 = vsel %vm10058_vm5, 1.0, %v9807_v31  ;;  %v4181_v35 = vsel %vm10060_vm10, 1.0, %v9807_v31 }
 0x27a   :  { %2597 = vmax.xlane.f32.xlu0 %v7249_v21  ;;  %v7271_v33 = vadd.f32 %v3384_v37, %v7090_v60 }
 0x27c   :  { %v7277_v29 = vpop.f32.mrb[28].mxu1 }
 0x27d   :  { %10031 = vst [vmem:[#allocation95_spill] sm:$0xff] %v7277_v29  ;;  %v3389_v55 = vmul.f32 %v7277_v29, %v4170_v58  ;;  %2603 = vmax.xlane.f32.xlu1 %v7277_v29  ;;  %v7285_v28 = vpop.f32.mrb[29].mxu1 }
 0x27e   :  { %10033 = vst [vmem:[#allocation96_spill] sm:$0xff] %v7285_v28  ;;  %2593 = vmax.xlane.f32.xlu0 %v7259_v7  ;;  %v3387_v60 = vmul.f32 %v4168_v54, %v7285_v28  ;;  %v7293_v46 = vpop.f32.mrb[30].mxu1 }
 0x27f   :  { %10035 = vst [vmem:[#allocation97_spill] sm:$0xff] %v7293_v46  ;;  %v7300_v47 = vadd.f32 %v3389_v55, %v7108_v10  ;;  %v3390_v38 = vmul.f32 %v7293_v46, %v4171_v48  ;;  %v7303_v18 = vpop.f32.mrb[31].mxu1  ;;  %v4174_v10 = vsel %vm10038_vm13, 1.0, %v9807_v31  ;;  %vm10062_vm13 = vcmp.eq.s32.totalorder %v5716_v14, %v6287_v5 }
 0x280   :  { %10037 = vst [vmem:[#allocation98_spill] sm:$0xff] %v7303_v18  ;;  %v7306_v34 = vadd.f32 %v3387_v60, %v7119_v61  ;;  %v3388_v45 = vmul.f32 %v4169_v42, %v7303_v18  ;;  %v4172_v61 = vsel %vm10040_vm8, 1.0, %v9807_v31  ;;  %vm10064_vm8 = vcmp.eq.s32.totalorder %v5716_v14, %v6265_v53  ;;  %v10069_v53 = vld [vmem:[#allocation6_spill] sm:$0xff] }
 0x281   :  { %v7310_v30 = vadd.f32 %v3390_v38, %v7128_v52  ;;  %2599 = vmax.xlane.f32.xlu1 %v7285_v28  ;;  %vm10070_vm9 = vcmp.eq.s32.totalorder %v5716_v14, %v10069_v53 }
 0x282   :  { %2605 = vmax.xlane.f32.xlu0 %v7293_v46  ;;  %v7315_v41 = vadd.f32 %v3388_v45, %v7133_v63 }
 0x284   :  { %v7321_v37 = vpop.f32.mrb[32].mxu1 }
 0x285   :  { %10039 = vst [vmem:[#allocation99_spill] sm:$0xff] %v7321_v37  ;;  %v3457_v52 = vmul.f32 %v7321_v37, %v4174_v10  ;;  %2611 = vmax.xlane.f32.xlu1 %v7321_v37  ;;  %v7329_v58 = vpop.f32.mrb[33].mxu1 }
 0x286   :  { %10041 = vst [vmem:[#allocation100_spill] sm:$0xff] %v7329_v58  ;;  %2601 = vmax.xlane.f32.xlu0 %v7303_v18  ;;  %v3455_v63 = vmul.f32 %v4172_v61, %v7329_v58  ;;  %v7337_v54 = vpop.f32.mrb[34].mxu1  ;;  %v10210_v18 = vld [vmem:[#allocation50_spill] sm:$0xff] }
 0x287   :  { %10043 = vst [vmem:[#allocation101_spill] sm:$0xff] %v7337_v54  ;;  %v7344_v55 = vadd.f32 %v3457_v52, %v7166_v44  ;;  %v3458_v48 = vmul.f32 %v7337_v54, %v4175_v4  ;;  %v7347_v60 = vpop.f32.mrb[35].mxu1  ;;  %v4178_v44 = vsel %vm10046_vm11, 1.0, %v9807_v31 }
 0x288   :  { %10045 = vst [vmem:[#allocation102_spill] sm:$0xff] %v7347_v60  ;;  %v7350_v42 = vadd.f32 %v3455_v63, %v7172_v20  ;;  %v3456_v1 = vmul.f32 %v4173_v57, %v7347_v60  ;;  %v4176_v20 = vsel %vm10048_vm12, 1.0, %v9807_v31 }
 0x289   :  { %v7354_v38 = vadd.f32 %v3458_v48, %v7177_v51  ;;  %2607 = vmax.xlane.f32.xlu1 %v7329_v58 }
 0x28a   :  { %2613 = vmax.xlane.f32.xlu0 %v7337_v54  ;;  %v7359_v56 = vadd.f32 %v3456_v1, %v7182_v16 }
 0x28c   :  { %v7365_v45 = vpop.f32.mrb[36].mxu1 }
 0x28d   :  { %10047 = vst [vmem:[#allocation103_spill] sm:$0xff] %v7365_v45  ;;  %v3461_v51 = vmul.f32 %v7365_v45, %v4178_v44  ;;  %2619 = vmax.xlane.f32.xlu1 %v7365_v45  ;;  %v7373_v10 = vpop.f32.mrb[37].mxu1 }
 0x28e   :  { %10049 = vst [vmem:[#allocation104_spill] sm:$0xff] %v7373_v10  ;;  %2609 = vmax.xlane.f32.xlu0 %v7347_v60  ;;  %v3459_v16 = vmul.f32 %v4176_v20, %v7373_v10  ;;  %v7381_v61 = vpop.f32.mrb[38].mxu1 }
 0x28f   :  { %10051 = vst [vmem:[#allocation105_spill] sm:$0xff] %v7381_v61  ;;  %v7388_v52 = vadd.f32 %v3461_v51, %v7212_v62  ;;  %v3462_v4 = vmul.f32 %v7381_v61, %v4179_v27  ;;  %v7391_v63 = vpop.f32.mrb[39].mxu1  ;;  %v4182_v62 = vsel %vm10054_vm1, 1.0, %v9807_v31 }
 0x290   :  { %10053 = vst [vmem:[#allocation106_spill] sm:$0xff] %v7391_v63  ;;  %v7394_v57 = vadd.f32 %v3459_v16, %v7218_v9  ;;  %v3460_v24 = vmul.f32 %v4177_v15, %v7391_v63  ;;  %v4180_v9 = vsel %vm10056_vm2, 1.0, %v9807_v31 }
 0x291   :  { %v7398_v48 = vadd.f32 %v3462_v4, %v7222_v11  ;;  %2615 = vmax.xlane.f32.xlu1 %v7373_v10 }
 0x292   :  { %2621 = vmax.xlane.f32.xlu0 %v7381_v61  ;;  %v7403_v13 = vadd.f32 %v3460_v24, %v7227_v25 }
 0x294   :  { %v7409_v1 = vpop.f32.mrb[40].mxu1 }
 0x295   :  { %10055 = vst [vmem:[#allocation107_spill] sm:$0xff] %v7409_v1  ;;  %v3465_v11 = vmul.f32 %v7409_v1, %v4182_v62  ;;  %2627 = vmax.xlane.f32.xlu1 %v7409_v1  ;;  %v7417_v44 = vpop.f32.mrb[41].mxu1 }
 0x296   :  { %10057 = vst [vmem:[#allocation108_spill] sm:$0xff] %v7417_v44  ;;  %2617 = vmax.xlane.f32.xlu0 %v7391_v63  ;;  %v3463_v25 = vmul.f32 %v4180_v9, %v7417_v44  ;;  %v7425_v20 = vpop.f32.mrb[42].mxu1 }
 0x297   :  { %10059 = vst [vmem:[#allocation109_spill] sm:$0xff] %v7425_v20  ;;  %v7432_v51 = vadd.f32 %v3465_v11, %v7256_v3  ;;  %v3466_v27 = vmul.f32 %v7425_v20, %v4183_v43  ;;  %v7435_v16 = vpop.f32.mrb[43].mxu1  ;;  %v4186_v3 = vsel %vm10062_vm13, 1.0, %v9807_v31  ;;  %v4185_v43 = vsel %vm10070_vm9, 1.0, %v9807_v31 }
 0x298   :  { %10061 = vst [vmem:[#allocation110_spill] sm:$0xff] %v7435_v16  ;;  %v7438_v15 = vadd.f32 %v3463_v25, %v7262_v26  ;;  %v3464_v40 = vmul.f32 %v4181_v35, %v7435_v16  ;;  %v4184_v26 = vsel %vm10064_vm8, 1.0, %v9807_v31 }
 0x299   :  { %v7442_v4 = vadd.f32 %v3466_v27, %v7266_v22  ;;  %2623 = vmax.xlane.f32.xlu1 %v7417_v44 }
 0x29a   :  { %2629 = vmax.xlane.f32.xlu0 %v7425_v20  ;;  %v7447_v32 = vadd.f32 %v3464_v40, %v7271_v33  ;;  %v10066_v33 = vld [vmem:[#allocation7_spill] sm:$0xff] }
 0x29b   :  { %vm10067_vm6 = vcmp.eq.s32.totalorder %v5716_v14, %v10066_v33 }
 0x29c   :  { %v7453_v24 = vpop.f32.mrb[44].mxu1  ;;  %v4187_v5 = vsel %vm10067_vm6, 1.0, %v9807_v31 }
 0x29d   :  { %10063 = vst [vmem:[#allocation111_spill] sm:$0xff] %v7453_v24  ;;  %v3469_v22 = vmul.f32 %v7453_v24, %v4186_v3  ;;  %2635 = vmax.xlane.f32.xlu1 %v7453_v24  ;;  %v7461_v62 = vpop.f32.mrb[45].mxu1 }
 0x29e   :  { %10065 = vst [vmem:[#allocation112_spill] sm:$0xff] %v7461_v62  ;;  %2625 = vmax.xlane.f32.xlu0 %v7435_v16  ;;  %v3467_v9 = vmul.f32 %v4184_v26, %v7461_v62  ;;  %v7469_v11 = vpop.f32.mrb[46].mxu1 }
 0x29f   :  { %10068 = vst [vmem:[#allocation7_spill] sm:$0xff] %v7469_v11  ;;  %v7476_v25 = vadd.f32 %v3469_v22, %v7300_v47  ;;  %v3470_v35 = vmul.f32 %v7469_v11, %v4187_v5  ;;  %v7479_v27 = vpop.f32.mrb[47].mxu1  ;;  %v10072_v47 = vld [vmem:[#allocation11_spill] sm:$0xff] }
 0x2a0   :  { %10071 = vst [vmem:[#allocation6_spill] sm:$0xff] %v7479_v27  ;;  %v7482_v40 = vadd.f32 %v3467_v9, %v7306_v34  ;;  %v3468_v3 = vmul.f32 %v4185_v43, %v7479_v27  ;;  %vm10073_vm11 = vcmp.eq.s32.totalorder %v5716_v14, %v10072_v47  ;;  %v10075_v34 = vld [vmem:[#allocation9_spill] sm:$0xff]  ;;  %v10081_v47 = vld [vmem:[#allocation8_spill] sm:$0xff] }
 0x2a1   :  { %v7486_v26 = vadd.f32 %v3470_v35, %v7310_v30  ;;  %2631 = vmax.xlane.f32.xlu1 %v7461_v62  ;;  %v4190_v22 = vsel %vm10073_vm11, 1.0, %v9807_v31  ;;  %vm10076_vm12 = vcmp.eq.s32.totalorder %v5716_v14, %v10075_v34  ;;  %vm10082_vm15 = vcmp.eq.s32.totalorder %v5716_v14, %v10081_v47 }
 0x2a2   :  { %2637 = vmax.xlane.f32.xlu0 %v7469_v11  ;;  %v7491_v33 = vadd.f32 %v3468_v3, %v7315_v41  ;;  %v4188_v30 = vsel %vm10076_vm12, 1.0, %v9807_v31  ;;  %v10078_v41 = vld [vmem:[#allocation10_spill] sm:$0xff] }
 0x2a3   :  { %vm10079_vm14 = vcmp.eq.s32.totalorder %v5716_v14, %v10078_v41 }
 0x2a4   :  { %v7497_v5 = vpop.f32.mrb[48].mxu1  ;;  %v4191_v43 = vsel %vm10079_vm14, 1.0, %v9807_v31 }
 0x2a5   :  { %10074 = vst [vmem:[#allocation11_spill] sm:$0xff] %v7497_v5  ;;  %v3537_v9 = vmul.f32 %v7497_v5, %v4190_v22  ;;  %2643 = vmax.xlane.f32.xlu1 %v7497_v5  ;;  %v7505_v53 = vpop.f32.mrb[49].mxu1  ;;  %v4189_v22 = vsel %vm10082_vm15, 1.0, %v9807_v31 }
 0x2a6   :  { %10077 = vst [vmem:[#allocation9_spill] sm:$0xff] %v7505_v53  ;;  %2633 = vmax.xlane.f32.xlu0 %v7479_v27  ;;  %v3535_v35 = vmul.f32 %v4188_v30, %v7505_v53  ;;  %v7513_v3 = vpop.f32.mrb[50].mxu1 }
 0x2a7   :  { %10080 = vst [vmem:[#allocation10_spill] sm:$0xff] %v7513_v3  ;;  %v7520_v34 = vadd.f32 %v3537_v9, %v7344_v55  ;;  %v3538_v21 = vmul.f32 %v7513_v3, %v4191_v43  ;;  %v7523_v49 = vpop.f32.mrb[51].mxu1  ;;  %v10084_v55 = vld [vmem:[#allocation15_spill] sm:$0xff] }
 0x2a8   :  { %10083 = vst [vmem:[#allocation8_spill] sm:$0xff] %v7523_v49  ;;  %v7526_v27 = vadd.f32 %v3535_v35, %v7350_v42  ;;  %v3536_v41 = vmul.f32 %v4189_v22, %v7523_v49  ;;  %vm10085_vm1 = vcmp.eq.s32.totalorder %v5716_v14, %v10084_v55  ;;  %v10087_v42 = vld [vmem:[#allocation13_spill] sm:$0xff] }
 0x2a9   :  { %v7530_v30 = vadd.f32 %v3538_v21, %v7354_v38  ;;  %2639 = vmax.xlane.f32.xlu1 %v7505_v53  ;;  %v4194_v9 = vsel %vm10085_vm1, 1.0, %v9807_v31  ;;  %vm10088_vm2 = vcmp.eq.s32.totalorder %v5716_v14, %v10087_v42  ;;  %v10093_v42 = vld [vmem:[#allocation12_spill] sm:$0xff] }
 0x2aa   :  { %2645 = vmax.xlane.f32.xlu0 %v7513_v3  ;;  %v7535_v47 = vadd.f32 %v3536_v41, %v7359_v56  ;;  %v4192_v21 = vsel %vm10088_vm2, 1.0, %v9807_v31  ;;  %v10090_v56 = vld [vmem:[#allocation14_spill] sm:$0xff]  ;;  %vm10094_vm10 = vcmp.eq.s32.totalorder %v5716_v14, %v10093_v42 }
 0x2ab   :  { %vm10091_vm5 = vcmp.eq.s32.totalorder %v5716_v14, %v10090_v56 }
 0x2ac   :  { %v7541_v43 = vpop.f32.mrb[52].mxu1  ;;  %v4195_v22 = vsel %vm10091_vm5, 1.0, %v9807_v31 }
 0x2ad   :  { %10086 = vst [vmem:[#allocation15_spill] sm:$0xff] %v7541_v43  ;;  %v3541_v38 = vmul.f32 %v7541_v43, %v4194_v9  ;;  %2651 = vmax.xlane.f32.xlu1 %v7541_v43  ;;  %v7549_v35 = vpop.f32.mrb[53].mxu1  ;;  %v4193_v9 = vsel %vm10094_vm10, 1.0, %v9807_v31 }
 0x2ae   :  { %10089 = vst [vmem:[#allocation13_spill] sm:$0xff] %v7549_v35  ;;  %2641 = vmax.xlane.f32.xlu0 %v7523_v49  ;;  %v3539_v41 = vmul.f32 %v4192_v21, %v7549_v35  ;;  %v7557_v55 = vpop.f32.mrb[54].mxu1 }
 0x2af   :  { %10092 = vst [vmem:[#allocation14_spill] sm:$0xff] %v7557_v55  ;;  %v7564_v43 = vadd.f32 %v3541_v38, %v7388_v52  ;;  %v3542_v3 = vmul.f32 %v7557_v55, %v4195_v22  ;;  %v7567_v49 = vpop.f32.mrb[55].mxu1  ;;  %v10096_v52 = vld [vmem:[#allocation19_spill] sm:$0xff] }
 0x2b0   :  { %10095 = vst [vmem:[#allocation12_spill] sm:$0xff] %v7567_v49  ;;  %v7570_v53 = vadd.f32 %v3539_v41, %v7394_v57  ;;  %v3540_v56 = vmul.f32 %v4193_v9, %v7567_v49  ;;  %vm10097_vm13 = vcmp.eq.s32.totalorder %v5716_v14, %v10096_v52  ;;  %v10099_v57 = vld [vmem:[#allocation17_spill] sm:$0xff] }
 0x2b1   :  { %v7574_v21 = vadd.f32 %v3542_v3, %v7398_v48  ;;  %2647 = vmax.xlane.f32.xlu1 %v7549_v35  ;;  %v4198_v38 = vsel %vm10097_vm13, 1.0, %v9807_v31  ;;  %vm10100_vm8 = vcmp.eq.s32.totalorder %v5716_v14, %v10099_v57  ;;  %v10105_v57 = vld [vmem:[#allocation16_spill] sm:$0xff] }
 0x2b2   :  { %2653 = vmax.xlane.f32.xlu0 %v7557_v55  ;;  %v7579_v42 = vadd.f32 %v3540_v56, %v7403_v13  ;;  %v4196_v48 = vsel %vm10100_vm8, 1.0, %v9807_v31  ;;  %v10102_v13 = vld [vmem:[#allocation18_spill] sm:$0xff]  ;;  %vm10106_vm9 = vcmp.eq.s32.totalorder %v5716_v14, %v10105_v57 }
 0x2b3   :  { %vm10103_vm6 = vcmp.eq.s32.totalorder %v5716_v14, %v10102_v13 }
 0x2b4   :  { %v7585_v22 = vpop.f32.mrb[56].mxu1  ;;  %v4199_v9 = vsel %vm10103_vm6, 1.0, %v9807_v31 }
 0x2b5   :  { %10098 = vst [vmem:[#allocation19_spill] sm:$0xff] %v7585_v22  ;;  %v3545_v3 = vmul.f32 %v7585_v22, %v4198_v38  ;;  %2659 = vmax.xlane.f32.xlu1 %v7585_v22  ;;  %v7593_v41 = vpop.f32.mrb[57].mxu1  ;;  %v4197_v38 = vsel %vm10106_vm9, 1.0, %v9807_v31 }
 0x2b6   :  { %10101 = vst [vmem:[#allocation17_spill] sm:$0xff] %v7593_v41  ;;  %2649 = vmax.xlane.f32.xlu0 %v7567_v49  ;;  %v3543_v56 = vmul.f32 %v4196_v48, %v7593_v41  ;;  %v7601_v52 = vpop.f32.mrb[58].mxu1 }
 0x2b7   :  { %10104 = vst [vmem:[#allocation18_spill] sm:$0xff] %v7601_v52  ;;  %v7608_v22 = vadd.f32 %v3545_v3, %v7432_v51  ;;  %v3546_v55 = vmul.f32 %v7601_v52, %v4199_v9  ;;  %v7611_v49 = vpop.f32.mrb[59].mxu1  ;;  %v10108_v51 = vld [vmem:[#allocation23_spill] sm:$0xff] }
 0x2b8   :  { %10107 = vst [vmem:[#allocation16_spill] sm:$0xff] %v7611_v49  ;;  %v7614_v35 = vadd.f32 %v3543_v56, %v7438_v15  ;;  %v3544_v13 = vmul.f32 %v4197_v38, %v7611_v49  ;;  %vm10109_vm11 = vcmp.eq.s32.totalorder %v5716_v14, %v10108_v51  ;;  %v10111_v15 = vld [vmem:[#allocation21_spill] sm:$0xff] }
 0x2b9   :  { %v7618_v48 = vadd.f32 %v3546_v55, %v7442_v4  ;;  %2655 = vmax.xlane.f32.xlu1 %v7593_v41  ;;  %v4202_v3 = vsel %vm10109_vm11, 1.0, %v9807_v31  ;;  %vm10112_vm12 = vcmp.eq.s32.totalorder %v5716_v14, %v10111_v15  ;;  %v10117_v15 = vld [vmem:[#allocation20_spill] sm:$0xff] }
 0x2ba   :  { %2661 = vmax.xlane.f32.xlu0 %v7601_v52  ;;  %v7623_v57 = vadd.f32 %v3544_v13, %v7447_v32  ;;  %v4200_v4 = vsel %vm10112_vm12, 1.0, %v9807_v31  ;;  %v10114_v32 = vld [vmem:[#allocation22_spill] sm:$0xff]  ;;  %vm10118_vm15 = vcmp.eq.s32.totalorder %v5716_v14, %v10117_v15 }
 0x2bb   :  { %vm10115_vm14 = vcmp.eq.s32.totalorder %v5716_v14, %v10114_v32 }
 0x2bc   :  { %v7629_v9 = vpop.f32.mrb[60].mxu1  ;;  %v4203_v38 = vsel %vm10115_vm14, 1.0, %v9807_v31 }
 0x2bd   :  { %10110 = vst [vmem:[#allocation23_spill] sm:$0xff] %v7629_v9  ;;  %v3549_v55 = vmul.f32 %v7629_v9, %v4202_v3  ;;  %2667 = vmax.xlane.f32.xlu1 %v7629_v9  ;;  %v7637_v56 = vpop.f32.mrb[61].mxu1  ;;  %v4201_v3 = vsel %vm10118_vm15, 1.0, %v9807_v31 }
 0x2be   :  { %10113 = vst [vmem:[#allocation21_spill] sm:$0xff] %v7637_v56  ;;  %2657 = vmax.xlane.f32.xlu0 %v7611_v49  ;;  %v3547_v13 = vmul.f32 %v4200_v4, %v7637_v56  ;;  %v7645_v51 = vpop.f32.mrb[62].mxu1 }
 0x2bf   :  { %10116 = vst [vmem:[#allocation22_spill] sm:$0xff] %v7645_v51  ;;  %v7652_v9 = vadd.f32 %v3549_v55, %v7476_v25  ;;  %v3550_v52 = vmul.f32 %v7645_v51, %v4203_v38  ;;  %v7655_v49 = vpop.f32.mrb[63].mxu1  ;;  %v10120_v25 = vld [vmem:[#allocation27_spill] sm:$0xff] }
 0x2c0   :  { %10119 = vst [vmem:[#allocation20_spill] sm:$0xff] %v7655_v49  ;;  %v7658_v41 = vadd.f32 %v3547_v13, %v7482_v40  ;;  %v3548_v32 = vmul.f32 %v4201_v3, %v7655_v49  ;;  %vm10121_vm1 = vcmp.eq.s32.totalorder %v5716_v14, %v10120_v25  ;;  %v10123_v40 = vld [vmem:[#allocation25_spill] sm:$0xff] }
 0x2c1   :  { %v7662_v4 = vadd.f32 %v3550_v52, %v7486_v26  ;;  %2663 = vmax.xlane.f32.xlu1 %v7637_v56  ;;  %v4206_v55 = vsel %vm10121_vm1, 1.0, %v9807_v31  ;;  %vm10124_vm2 = vcmp.eq.s32.totalorder %v5716_v14, %v10123_v40  ;;  %v10129_v40 = vld [vmem:[#allocation24_spill] sm:$0xff] }
 0x2c2   :  { %2669 = vmax.xlane.f32.xlu0 %v7645_v51  ;;  %v7667_v15 = vadd.f32 %v3548_v32, %v7491_v33  ;;  %v4204_v26 = vsel %vm10124_vm2, 1.0, %v9807_v31  ;;  %v10126_v33 = vld [vmem:[#allocation26_spill] sm:$0xff]  ;;  %vm10130_vm10 = vcmp.eq.s32.totalorder %v5716_v14, %v10129_v40 }
 0x2c3   :  { %vm10127_vm5 = vcmp.eq.s32.totalorder %v5716_v14, %v10126_v33 }
 0x2c4   :  { %v7673_v38 = vpop.f32.mrb[64].mxu1  ;;  %v4207_v3 = vsel %vm10127_vm5, 1.0, %v9807_v31 }
 0x2c5   :  { %10122 = vst [vmem:[#allocation27_spill] sm:$0xff] %v7673_v38  ;;  %v3617_v52 = vmul.f32 %v7673_v38, %v4206_v55  ;;  %2675 = vmax.xlane.f32.xlu1 %v7673_v38  ;;  %v7681_v13 = vpop.f32.mrb[65].mxu1  ;;  %v4205_v55 = vsel %vm10130_vm10, 1.0, %v9807_v31 }
 0x2c6   :  { %10125 = vst [vmem:[#allocation25_spill] sm:$0xff] %v7681_v13  ;;  %2665 = vmax.xlane.f32.xlu0 %v7655_v49  ;;  %v3615_v32 = vmul.f32 %v4204_v26, %v7681_v13  ;;  %v7689_v25 = vpop.f32.mrb[66].mxu1 }
 0x2c7   :  { %10128 = vst [vmem:[#allocation26_spill] sm:$0xff] %v7689_v25  ;;  %v7696_v38 = vadd.f32 %v3617_v52, %v7520_v34  ;;  %v3618_v51 = vmul.f32 %v7689_v25, %v4207_v3  ;;  %v7699_v49 = vpop.f32.mrb[67].mxu1  ;;  %v10132_v34 = vld [vmem:[#allocation31_spill] sm:$0xff] }
 0x2c8   :  { %10131 = vst [vmem:[#allocation24_spill] sm:$0xff] %v7699_v49  ;;  %v7702_v56 = vadd.f32 %v3615_v32, %v7526_v27  ;;  %v3616_v33 = vmul.f32 %v4205_v55, %v7699_v49  ;;  %vm10133_vm13 = vcmp.eq.s32.totalorder %v5716_v14, %v10132_v34  ;;  %v10135_v27 = vld [vmem:[#allocation29_spill] sm:$0xff] }
 0x2c9   :  { %v7706_v26 = vadd.f32 %v3618_v51, %v7530_v30  ;;  %2671 = vmax.xlane.f32.xlu1 %v7681_v13  ;;  %v4210_v52 = vsel %vm10133_vm13, 1.0, %v9807_v31  ;;  %vm10136_vm8 = vcmp.eq.s32.totalorder %v5716_v14, %v10135_v27  ;;  %v10141_v27 = vld [vmem:[#allocation28_spill] sm:$0xff] }
 0x2ca   :  { %2677 = vmax.xlane.f32.xlu0 %v7689_v25  ;;  %v7711_v40 = vadd.f32 %v3616_v33, %v7535_v47  ;;  %v4208_v30 = vsel %vm10136_vm8, 1.0, %v9807_v31  ;;  %v10138_v47 = vld [vmem:[#allocation30_spill] sm:$0xff]  ;;  %vm10142_vm9 = vcmp.eq.s32.totalorder %v5716_v14, %v10141_v27 }
 0x2cb   :  { %vm10139_vm6 = vcmp.eq.s32.totalorder %v5716_v14, %v10138_v47 }
 0x2cc   :  { %v7717_v3 = vpop.f32.mrb[68].mxu1  ;;  %v4211_v55 = vsel %vm10139_vm6, 1.0, %v9807_v31 }
 0x2cd   :  { %10134 = vst [vmem:[#allocation31_spill] sm:$0xff] %v7717_v3  ;;  %v3621_v51 = vmul.f32 %v7717_v3, %v4210_v52  ;;  %2683 = vmax.xlane.f32.xlu1 %v7717_v3  ;;  %v7725_v32 = vpop.f32.mrb[69].mxu1  ;;  %v4209_v52 = vsel %vm10142_vm9, 1.0, %v9807_v31 }
 0x2ce   :  { %10137 = vst [vmem:[#allocation29_spill] sm:$0xff] %v7725_v32  ;;  %2673 = vmax.xlane.f32.xlu0 %v7699_v49  ;;  %v3619_v33 = vmul.f32 %v4208_v30, %v7725_v32  ;;  %v7733_v34 = vpop.f32.mrb[70].mxu1 }
 0x2cf   :  { %10140 = vst [vmem:[#allocation30_spill] sm:$0xff] %v7733_v34  ;;  %v7740_v3 = vadd.f32 %v3621_v51, %v7564_v43  ;;  %v3622_v25 = vmul.f32 %v7733_v34, %v4211_v55  ;;  %v7743_v49 = vpop.f32.mrb[71].mxu1  ;;  %v10144_v51 = vld [vmem:[#allocation72_spill] sm:$0xff] }
 0x2d0   :  { %10143 = vst [vmem:[#allocation28_spill] sm:$0xff] %v7743_v49  ;;  %v7746_v13 = vadd.f32 %v3619_v33, %v7570_v53  ;;  %v3620_v47 = vmul.f32 %v4209_v52, %v7743_v49  ;;  %v10145_v53 = vld [vmem:[#allocation35_spill] sm:$0xff] }
 0x2d1   :  { %v7750_v30 = vadd.f32 %v3622_v25, %v7574_v21  ;;  %2679 = vmax.xlane.f32.xlu1 %v7725_v32  ;;  %vm10146_vm11 = vcmp.eq.s32.totalorder %v5716_v14, %v10145_v53  ;;  %v10148_v21 = vld [vmem:[#allocation33_spill] sm:$0xff] }
 0x2d2   :  { %2685 = vmax.xlane.f32.xlu0 %v7733_v34  ;;  %v7755_v27 = vadd.f32 %v3620_v47, %v7579_v42  ;;  %v7757_v43 = vpop.xlane.xlu0 %2547  ;;  %v4214_v33 = vsel %vm10146_vm11, 1.0, %v9807_v31  ;;  %vm10149_vm12 = vcmp.eq.s32.totalorder %v5716_v14, %v10148_v21 }
 0x2d3   :  { %v2769_v55 = vsub.f32 %v10144_v51, %v7757_v43  ;;  %v4212_v25 = vsel %vm10149_vm12, 1.0, %v9807_v31  ;;  %v10151_v51 = vld [vmem:[#allocation34_spill] sm:$0xff] }
 0x2d4   :  { %v7765_v52 = vpop.f32.mrb[72].mxu1  ;;  %vm10152_vm14 = vcmp.eq.s32.totalorder %v5716_v14, %v10151_v51  ;;  %v10156_v51 = vld [vmem:[#allocation73_spill] sm:$0xff] }
 0x2d5   :  { %10147 = vst [vmem:[#allocation72_spill] sm:$0xff] %v7765_v52  ;;  %v3625_v42 = vmul.f32 %v7765_v52, %v4214_v33  ;;  %v7772_v47 = vpop.xlane.xlu1 %2545  ;;  %2691 = vmax.xlane.f32.xlu1 %v7765_v52  ;;  %v7775_v34 = vpop.f32.mrb[73].mxu1  ;;  %v4215_v53 = vsel %vm10152_vm14, 1.0, %v9807_v31  ;;  %v2883_v32 = vmul.f32 1.442695, %v2769_v55  ;;  %v10154_v33 = vld [vmem:[#allocation32_spill] sm:$0xff] }
 0x2d6   :  { %10150 = vst [vmem:[#allocation35_spill] sm:$0xff] %v7775_v34  ;;  %2681 = vmax.xlane.f32.xlu0 %v7743_v49  ;;  %v3623_v17 = vmul.f32 %v4212_v25, %v7775_v34  ;;  %v7783_v21 = vpop.f32.mrb[74].mxu1  ;;  %v7785_v5 = vpop.xlane.xlu0 %2543  ;;  %vm10155_vm15 = vcmp.eq.s32.totalorder %v5716_v14, %v10154_v33 }
 0x2d7   :  { %10153 = vst [vmem:[#allocation33_spill] sm:$0xff] %v7783_v21  ;;  %v4213_v52 = vsel %vm10155_vm15, 1.0, %v9807_v31  ;;  %v7792_v11 = vadd.f32 %v3625_v42, %v7608_v22  ;;  %v3626_v49 = vmul.f32 %v7783_v21, %v4215_v53  ;;  %v2767_v12 = vsub.f32 %v10156_v51, %v7785_v5  ;;  %v7797_v55 = vpop.f32.mrb[75].mxu1 }
 0x2d8   :  { %10157 = vst [vmem:[#allocation34_spill] sm:$0xff] %v7797_v55  ;;  %v7800_v25 = vadd.f32 %v3623_v17, %v7614_v35  ;;  %v3624_v62 = vmul.f32 %v4213_v52, %v7797_v55  ;;  %5151 = vpow2.f32 %v2883_v32  ;;  %v10158_v17 = vld [vmem:[#allocation74_spill] sm:$0xff]  ;;  %v10161_v52 = vld [vmem:[#allocation75_spill] sm:$0xff] }
 0x2d9   :  { %v7804_v16 = vadd.f32 %v3626_v49, %v7618_v48  ;;  %2687 = vmax.xlane.f32.xlu1 %v7775_v34  ;;  %v2879_v22 = vmul.f32 1.442695, %v2767_v12  ;;  %v10159_v49 = vld [vmem:[#allocation39_spill] sm:$0xff]  ;;  %v2768_v51 = vsub.f32 %v10161_v52, %v7772_v47  ;;  %v10163_v12 = vld [vmem:[#allocation37_spill] sm:$0xff] }
 0x2da   :  { %2693 = vmax.xlane.f32.xlu0 %v7783_v21  ;;  %v7809_v42 = vadd.f32 %v3624_v62, %v7623_v57  ;;  %v7811_v53 = vpop.xlane.xlu1 %2555  ;;  %v7813_v33 = vpop.xlane.xlu0 %2549  ;;  %vm10160_vm1 = vcmp.eq.s32.totalorder %v5716_v14, %v10159_v49  ;;  %vm10164_vm2 = vcmp.eq.s32.totalorder %v5716_v14, %v10163_v12  ;;  %v10166_v49 = vld [vmem:[#allocation38_spill] sm:$0xff] }
 0x2db   :  { %v2770_v35 = vsub.f32 %v10158_v17, %v7813_v33  ;;  %v4218_v48 = vsel %vm10160_vm1, 1.0, %v9807_v31  ;;  %v4216_v62 = vsel %vm10164_vm2, 1.0, %v9807_v31  ;;  %vm10167_vm5 = vcmp.eq.s32.totalorder %v5716_v14, %v10166_v49 }
 0x2dc   :  { %v7823_v32 = vpop.f32.mrb[76].mxu1  ;;  %v4219_v52 = vsel %vm10167_vm5, 1.0, %v9807_v31  ;;  %5153 = vpow2.f32 %v2879_v22  ;;  %v2881_v22 = vmul.f32 1.442695, %v2768_v51 }
 0x2dd   :  { %10162 = vst [vmem:[#allocation32_spill] sm:$0xff] %v7823_v32  ;;  %v2885_v57 = vmul.f32 1.442695, %v2770_v35  ;;  %v3629_v21 = vmul.f32 %v7823_v32, %v4218_v48  ;;  %2699 = vmax.xlane.f32.xlu1 %v7823_v32  ;;  %v7831_v17 = vpop.f32.mrb[77].mxu1  ;;  %v10169_v35 = vld [vmem:[#allocation36_spill] sm:$0xff] }
 0x2de   :  { %10165 = vst [vmem:[#allocation73_spill] sm:$0xff] %v7831_v17  ;;  %2689 = vmax.xlane.f32.xlu0 %v7797_v55  ;;  %v3627_v34 = vmul.f32 %v4216_v62, %v7831_v17  ;;  %v7839_v24 = vpop.xlane.xlu1 %2551  ;;  %v7841_v12 = vpop.f32.mrb[78].mxu1  ;;  %vm10170_vm10 = vcmp.eq.s32.totalorder %v5716_v14, %v10169_v35  ;;  %v10176_v35 = vld [vmem:[#allocation41_spill] sm:$0xff] }
 0x2df   :  { %10168 = vst [vmem:[#allocation74_spill] sm:$0xff] %v7841_v12  ;;  %v4217_v48 = vsel %vm10170_vm10, 1.0, %v9807_v31  ;;  %v7848_v32 = vadd.f32 %v3629_v21, %v7652_v9  ;;  %v3630_v55 = vmul.f32 %v7841_v12, %v4219_v52  ;;  %v7851_v8 = vpop.xlane.xlu0 %2557  ;;  %v7853_v49 = vpop.f32.mrb[79].mxu1  ;;  %5155 = vpow2.f32 %v2885_v57  ;;  %v10172_v9 = vld [vmem:[#allocation76_spill] sm:$0xff] }
 0x2e0   :  { %10171 = vst [vmem:[#allocation39_spill] sm:$0xff] %v7853_v49  ;;  %v7856_v62 = vadd.f32 %v3627_v34, %v7658_v41  ;;  %v3628_v20 = vmul.f32 %v4217_v48, %v7853_v49  ;;  %v2773_v21 = vsub.f32 %v10172_v9, %v7811_v53  ;;  %v10173_v34 = vld [vmem:[#allocation43_spill] sm:$0xff]  ;;  %5157 = vpow2.f32 %v2881_v22  ;;  %v10179_v9 = vld [vmem:[#allocation42_spill] sm:$0xff] }
 0x2e1   :  { %v7860_v44 = vadd.f32 %v3630_v55, %v7662_v4  ;;  %2695 = vmax.xlane.f32.xlu1 %v7831_v17  ;;  %vm10174_vm13 = vcmp.eq.s32.totalorder %v5716_v14, %v10173_v34  ;;  %vm10177_vm8 = vcmp.eq.s32.totalorder %v5716_v14, %v10176_v35  ;;  %vm10180_vm6 = vcmp.eq.s32.totalorder %v5716_v14, %v10179_v9 }
 0x2e2   :  { %2701 = vmax.xlane.f32.xlu0 %v7841_v12  ;;  %v7867_v52 = vadd.f32 %v3628_v20, %v7667_v15  ;;  %v7869_v51 = vpop.xlane.xlu1 %2563  ;;  %v5152_v41 = vpop.eup %5151  ;;  %v4222_v4 = vsel %vm10174_vm13, 1.0, %v9807_v31  ;;  %v4220_v48 = vsel %vm10177_vm8, 1.0, %v9807_v31  ;;  %v4223_v34 = vsel %vm10180_vm6, 1.0, %v9807_v31  ;;  %v10181_v12 = vld [vmem:[#allocation77_spill] sm:$0xff] }
 0x2e3   :  { %v7871_v57 = vpop.xlane.xlu0 %2553  ;;  %v2891_v22 = vmul.f32 1.442695, %v2773_v21  ;;  %v2771_v17 = vsub.f32 %v10181_v12, %v7839_v24 }
 0x2e4   :  { %v7877_v55 = vpop.f32.mrb[80].mxu1 }
 0x2e5   :  { %10175 = vst [vmem:[#allocation75_spill] sm:$0xff] %v7877_v55  ;;  %v3697_v20 = vmul.f32 %v7877_v55, %v4222_v4  ;;  %v7884_v15 = vpop.f32.mrb[81].mxu1  ;;  %3107 = vadd.xlane.f32.xlu1 %v5152_v41  ;;  %v10183_v4 = vld [vmem:[#allocation40_spill] sm:$0xff]  ;;  %5159 = vpow2.f32 %v2891_v22 }
 0x2e6   :  { %10178 = vst [vmem:[#allocation37_spill] sm:$0xff] %v7884_v15  ;;  %2697 = vmax.xlane.f32.xlu0 %v7853_v49  ;;  %v3695_v19 = vmul.f32 %v4220_v48, %v7884_v15  ;;  %v7894_v35 = vpop.xlane.xlu1 %2559  ;;  %v7896_v63 = vpop.f32.mrb[82].mxu1  ;;  %vm10184_vm9 = vcmp.eq.s32.totalorder %v5716_v14, %v10183_v4  ;;  %v10186_v48 = vld [vmem:[#allocation78_spill] sm:$0xff] }
 0x2e7   :  { %10182 = vst [vmem:[#allocation38_spill] sm:$0xff] %v7896_v63  ;;  %v4221_v41 = vsel %vm10184_vm9, 1.0, %v9807_v31  ;;  %v7903_v49 = vadd.f32 %v3697_v20, %v7696_v38  ;;  %v3698_v9 = vmul.f32 %v7896_v63, %v4223_v34  ;;  %v7906_v21 = vpop.xlane.xlu0 %2565  ;;  %v7908_v1 = vpop.f32.mrb[83].mxu1  ;;  %v2774_v61 = vsub.f32 %v10186_v48, %v7851_v8 }
 0x2e8   :  { %10185 = vst [vmem:[#allocation36_spill] sm:$0xff] %v7908_v1  ;;  %v5154_v12 = vpop.eup %5153  ;;  %v7913_v10 = vadd.f32 %v3695_v19, %v7702_v56  ;;  %v3696_v60 = vmul.f32 %v4221_v41, %v7908_v1  ;;  %v2887_v20 = vmul.f32 1.442695, %v2771_v17  ;;  %v10187_v48 = vmov 0.0   ;;  %v10188_v19 = vld [vmem:[#allocation47_spill] sm:$0xff] }
 0x2e9   :  { %v7917_v4 = vadd.f32 %v3698_v9, %v7706_v26  ;;  %3103 = vadd.xlane.f32.xlu1 %v5154_v12  ;;  %v5156_v38 = vpop.eup %5155  ;;  %vm10189_vm11 = vcmp.eq.s32.totalorder %v5716_v14, %v10188_v19  ;;  %v2893_v41 = vmul.f32 1.442695, %v2774_v61  ;;  %v10190_v26 = vld [vmem:[#allocation79_spill] sm:$0xff]  ;;  %v10195_v61 = vld [vmem:[#allocation46_spill] sm:$0xff] }
 0x2ea   :  { %v7920_v34 = vadd.f32 %v3696_v60, %v7711_v40  ;;  %v7922_v31 = vpop.xlane.xlu1 %2571  ;;  %3109 = vadd.xlane.f32.xlu0 %v5156_v38  ;;  %v4226_v56 = vsel %vm10189_vm11, 1.0, %v10187_v48  ;;  %v2772_v9 = vsub.f32 %v10190_v26, %v7871_v57  ;;  %v10192_v60 = vld [vmem:[#allocation45_spill] sm:$0xff]  ;;  %v5158_v38 = vpop.eup %5157  ;;  %vm10196_vm14 = vcmp.eq.s32.totalorder %v5716_v14, %v10195_v61 }
 0x2eb   :  { %v7924_v6 = vpop.xlane.xlu0 %2561  ;;  %vm10193_vm12 = vcmp.eq.s32.totalorder %v5716_v14, %v10192_v60  ;;  %v4227_v19 = vsel %vm10196_vm14, 1.0, %v10187_v48  ;;  %5161 = vpow2.f32 %v2887_v20 }
 0x2ec   :  { %v7932_v12 = vpop.f32.mrb[84].mxu1  ;;  %v4224_v40 = vsel %vm10193_vm12, 1.0, %v10187_v48  ;;  %5163 = vpow2.f32 %v2893_v41 }
 0x2ed   :  { %10191 = vst [vmem:[#allocation76_spill] sm:$0xff] %v7932_v12  ;;  %v3701_v17 = vmul.f32 %v7932_v12, %v4226_v56  ;;  %v7939_v22 = vpop.f32.mrb[85].mxu1  ;;  %2707 = vmax.xlane.f32.xlu1 %v7877_v55  ;;  %v10198_v56 = vld [vmem:[#allocation44_spill] sm:$0xff] }
 0x2ee   :  { %10194 = vst [vmem:[#allocation43_spill] sm:$0xff] %v7939_v22  ;;  %v3699_v26 = vmul.f32 %v4224_v40, %v7939_v22  ;;  %v7947_v45 = vpop.xlane.xlu1 %2567  ;;  %v7949_v54 = vpop.f32.mrb[86].mxu1  ;;  %vm10199_vm15 = vcmp.eq.s32.totalorder %v5716_v14, %v10198_v56  ;;  %3105 = vadd.xlane.f32.xlu0 %v5158_v38  ;;  %v2889_v40 = vmul.f32 1.442695, %v2772_v9  ;;  %v4230_v9 = vsel %vm639_vm3, 1.0, %v10187_v48 }
 0x2ef   :  { %10197 = vst [vmem:[#allocation41_spill] sm:$0xff] %v7949_v54  ;;  %v4225_v60 = vsel %vm10199_vm15, 1.0, %v10187_v48  ;;  %v7956_v55 = vadd.f32 %v3701_v17, %v7740_v3  ;;  %v3702_v58 = vmul.f32 %v7949_v54, %v4227_v19  ;;  %v7959_v61 = vpop.xlane.xlu0 %2573  ;;  %v7961_v20 = vpop.f32.mrb[87].mxu1  ;;  %v10201_v3 = vld [vmem:[#allocation80_spill] sm:$0xff]  ;;  %vm10211_vm3 = vcmp.eq.s32.totalorder %v5716_v14, %v10210_v18 }
 0x2f0   :  { %10200 = vst [vmem:[#allocation42_spill] sm:$0xff] %v7961_v20  ;;  %v7964_v36 = vadd.f32 %v3699_v26, %v7746_v13  ;;  %v3700_v2 = vmul.f32 %v4225_v60, %v7961_v20  ;;  %v2777_v17 = vsub.f32 %v10201_v3, %v7869_v51  ;;  %5165 = vpow2.f32 %v2889_v40 }
 0x2f1   :  { %v7968_v56 = vadd.f32 %v3702_v58, %v7750_v30  ;;  %2703 = vmax.xlane.f32.xlu1 %v7884_v15  ;;  %v5160_v58 = vpop.eup %5159 }
 0x2f2   :  { %v7974_v38 = vadd.f32 %v3700_v2, %v7755_v27  ;;  %v7976_v19 = vpop.xlane.xlu1 %2579  ;;  %2709 = vmax.xlane.f32.xlu0 %v7896_v63  ;;  %v10205_v2 = vld [vmem:[#allocation49_spill] sm:$0xff]  ;;  %v2899_v3 = vmul.f32 1.442695, %v2777_v17  ;;  %v2775_v63 = vsub.f32 %v7065_v59, %v7894_v35 }
 0x2f3   :  { %v7980_v41 = vadd.f32 %v7976_v19, %v7757_v43  ;;  %v7983_v13 = vpop.xlane.xlu0 %2569  ;;  %vm10206_vm1 = vcmp.eq.s32.totalorder %v5716_v14, %v10205_v2  ;;  %v4231_v2 = vsel %vm10211_vm3, 1.0, %v10187_v48 }
 0x2f4   :  { %v7989_v26 = vpop.f32.mrb[88].mxu1  ;;  %v4228_v27 = vsel %vm10206_vm1, 1.0, %v10187_v48  ;;  %5167 = vpow2.f32 %v2899_v3 }
 0x2f5   :  { %10202 = vst [vmem:[#allocation77_spill] sm:$0xff] %v7980_v41  ;;  %10204 = vst [vmem:[#allocation40_spill] sm:$0xff] %v7989_v26  ;;  %v3705_v43 = vmul.f32 %v7989_v26, %v4230_v9  ;;  %v7996_v60 = vpop.f32.mrb[89].mxu1  ;;  %3115 = vadd.xlane.f32.xlu1 %v5160_v58  ;;  %v10215_v41 = vld [vmem:[#allocation48_spill] sm:$0xff] }
 0x2f6   :  { %10207 = vst [vmem:[#allocation78_spill] sm:$0xff] %v7996_v60  ;;  %v3703_v30 = vmul.f32 %v4228_v27, %v7996_v60  ;;  %v8001_v15 = vpop.xlane.xlu1 %2575  ;;  %v8003_v40 = vpop.f32.mrb[90].mxu1  ;;  %2705 = vmax.xlane.f32.xlu0 %v7908_v1  ;;  %vm10216_vm2 = vcmp.eq.s32.totalorder %v5716_v14, %v10215_v41 }
 0x2f7   :  { %10208 = vst [vmem:[#allocation47_spill] sm:$0xff] %v8001_v15  ;;  %10209 = vst [vmem:[#allocation79_spill] sm:$0xff] %v8003_v40  ;;  %v8010_v9 = vadd.f32 %v3705_v43, %v7792_v11  ;;  %v8014_v17 = vadd.f32 %v8001_v15, %v7785_v5  ;;  %v8017_v59 = vpop.xlane.xlu0 %2581  ;;  %v8019_v58 = vpop.f32.mrb[91].mxu1  ;;  %v4229_v18 = vsel %vm10216_vm2, 1.0, %v10187_v48  ;;  %v2778_v11 = vsub.f32 %v7076_v23, %v7906_v21 }
 0x2f8   :  { %10214 = vst [vmem:[#allocation44_spill] sm:$0xff] %v8019_v58  ;;  %v5162_v27 = vpop.eup %5161  ;;  %v8028_v43 = vadd.f32 %v3703_v30, %v7800_v25  ;;  %v3706_v5 = vmul.f32 %v8003_v40, %v4231_v2  ;;  %v8033_v1 = vadd.f32 %v8017_v59, %v7813_v33  ;;  %v2895_v15 = vmul.f32 1.442695, %v2775_v63  ;;  %v10218_v30 = vld [vmem:[#allocation55_spill] sm:$0xff] }
 0x2f9   :  { %10212 = vst [vmem:[#allocation45_spill] sm:$0xff] %v8010_v9  ;;  %10213 = vst [vmem:[#allocation46_spill] sm:$0xff] %v8014_v17  ;;  %v3704_v9 = vmul.f32 %v4229_v18, %v8019_v58  ;;  %3111 = vadd.xlane.f32.xlu1 %v5162_v27  ;;  %v5164_v17 = vpop.eup %5163  ;;  %vm10219_vm5 = vcmp.eq.s32.totalorder %v5716_v14, %v10218_v30  ;;  %v2901_v3 = vmul.f32 1.442695, %v2778_v11 }
 0x2fa   :  { %v8037_v41 = vadd.f32 %v3706_v5, %v7804_v16  ;;  %v8039_v37 = vpop.xlane.xlu1 %2587  ;;  %3117 = vadd.xlane.f32.xlu0 %v5164_v17  ;;  %v4234_v63 = vsel %vm10219_vm5, 1.0, %v10187_v48  ;;  %v2776_v16 = vsub.f32 %v7086_v50, %v7924_v6  ;;  %v5166_v18 = vpop.eup %5165  ;;  %5169 = vpow2.f32 %v2895_v15  ;;  %v10226_v5 = vld [vmem:[#allocation52_spill] sm:$0xff] }
 0x2fb   :  { %10217 = vst [vmem:[#allocation80_spill] sm:$0xff] %v8039_v37  ;;  %v8042_v23 = vadd.f32 %v3704_v9, %v7809_v42  ;;  %v8046_v25 = vadd.f32 %v8039_v37, %v7811_v53  ;;  %v8048_v33 = vpop.xlane.xlu0 %2577  ;;  %v10221_v53 = vld [vmem:[#allocation53_spill] sm:$0xff]  ;;  %vm10227_vm13 = vcmp.eq.s32.totalorder %v5716_v14, %v10226_v5  ;;  %5171 = vpow2.f32 %v2901_v3 }
 0x2fc   :  { %v8058_v42 = vadd.f32 %v8048_v33, %v7772_v47  ;;  %v8060_v2 = vpop.f32.mrb[92].mxu1  ;;  %vm10222_vm10 = vcmp.eq.s32.totalorder %v5716_v14, %v10221_v53  ;;  %v4233_v30 = vsel %vm10227_vm13, 1.0, %v10187_v48  ;;  %v2897_v5 = vmul.f32 1.442695, %v2776_v16 }
 0x2fd   :  { %10220 = vst [vmem:[#allocation51_spill] sm:$0xff] %v8060_v2  ;;  %v4232_v9 = vsel %vm10222_vm10, 1.0, %v10187_v48  ;;  %v3709_v17 = vmul.f32 %v8060_v2, %v4234_v63  ;;  %v8067_v27 = vpop.f32.mrb[93].mxu1  ;;  %2715 = vmax.xlane.f32.xlu1 %v7932_v12  ;;  %v10228_v63 = vld [vmem:[#allocation54_spill] sm:$0xff] }
 0x2fe   :  { %10223 = vst [vmem:[#allocation49_spill] sm:$0xff] %v8067_v27  ;;  %v3707_v50 = vmul.f32 %v4232_v9, %v8067_v27  ;;  %v8071_v11 = vpop.xlane.xlu1 %2583  ;;  %v8073_v47 = vpop.f32.mrb[94].mxu1  ;;  %vm10229_vm8 = vcmp.eq.s32.totalorder %v5716_v14, %v10228_v63  ;;  %3113 = vadd.xlane.f32.xlu0 %v5166_v18  ;;  %5173 = vpow2.f32 %v2897_v5 }
 0x2ff   :  { %10224 = vst [vmem:[#allocation50_spill] sm:$0xff] %v8071_v11  ;;  %10225 = vst [vmem:[#allocation48_spill] sm:$0xff] %v8073_v47  ;;  %v4235_v53 = vsel %vm10229_vm8, 1.0, %v10187_v48  ;;  %v8084_v12 = vadd.f32 %v3709_v17, %v7848_v32  ;;  %v8088_v15 = vadd.f32 %v8071_v11, %v7839_v24  ;;  %v8090_v9 = vpop.xlane.xlu0 %2589  ;;  %v8092_v37 = vpop.f32.mrb[95].mxu1  ;;  %v10232_v24 = vld [vmem:[#allocation81_spill] sm:$0xff]  ;;  %vm4022_vm8 = vcmask 261312  }
 0x300   :  { %10230 = vst [vmem:[#allocation55_spill] sm:$0xff] %v8090_v9  ;;  %10231 = vst [vmem:[#allocation53_spill] sm:$0xff] %v8092_v37  ;;  %v8095_v27 = vadd.f32 %v3707_v50, %v7856_v62  ;;  %v3710_v63 = vmul.f32 %v8073_v47, %v4235_v53  ;;  %v8100_v32 = vadd.f32 %v8090_v9, %v7851_v8  ;;  %v5168_v50 = vpop.eup %5167  ;;  %v10289_v28 = vld [vmem:[#allocation46_spill] sm:$0xff] }
 0x301   :  { %v3708_v17 = vmul.f32 %v4233_v30, %v8092_v37  ;;  %2711 = vmax.xlane.f32.xlu1 %v7939_v22  ;;  %v2781_v18 = vsub.f32 %v10232_v24, %v7922_v31  ;;  %v10235_v30 = vld [vmem:[#allocation59_spill] sm:$0xff] }
 0x302   :  { %v8107_v11 = vadd.f32 %v3710_v63, %v7860_v44  ;;  %v8109_v3 = vpop.xlane.xlu1 %2595  ;;  %2717 = vmax.xlane.f32.xlu0 %v7949_v54  ;;  %vm10236_vm6 = vcmp.eq.s32.totalorder %v5716_v14, %v10235_v30 }
 0x303   :  { %10233 = vst [vmem:[#allocation52_spill] sm:$0xff] %v8109_v3  ;;  %v8112_v62 = vadd.f32 %v3708_v17, %v7867_v52  ;;  %v8116_v16 = vadd.f32 %v8109_v3, %v7869_v51  ;;  %v8119_v8 = vpop.xlane.xlu0 %2585  ;;  %v4238_v44 = vsel %vm10236_vm6, 1.0, %v10187_v48  ;;  %v10238_v51 = vld [vmem:[#allocation56_spill] sm:$0xff]  ;;  %v10240_v17 = vld [vmem:[#allocation57_spill] sm:$0xff]  ;;  %v2907_v22 = vmul.f32 1.442695, %v2781_v18 }
 0x304   :  { %10234 = vst [vmem:[#allocation54_spill] sm:$0xff] %v8119_v8  ;;  %v8127_v53 = vadd.f32 %v8119_v8, %v7871_v57  ;;  %v8129_v52 = vpop.f32.mrb[96].mxu1  ;;  %vm10239_vm9 = vcmp.eq.s32.totalorder %v5716_v14, %v10238_v51  ;;  %vm10241_vm11 = vcmp.eq.s32.totalorder %v5716_v14, %v10240_v17  ;;  %v10243_v57 = vld [vmem:[#allocation58_spill] sm:$0xff]  ;;  %vm4029_vm6 = vcmask 326912  }
 0x305   :  { %10237 = vst [vmem:[#allocation81_spill] sm:$0xff] %v8129_v52  ;;  %v4237_v63 = vsel %vm10239_vm9, 1.0, %v10187_v48  ;;  %v4236_v24 = vsel %vm10241_vm11, 1.0, %v10187_v48  ;;  %v3777_v30 = vmul.f32 %v8129_v52, %v4238_v44  ;;  %v8140_v54 = vpop.f32.mrb[97].mxu1  ;;  %3123 = vadd.xlane.f32.xlu1 %v5168_v50  ;;  %vm10244_vm12 = vcmp.eq.s32.totalorder %v5716_v14, %v10243_v57  ;;  %v10245_v3 = vld [vmem:[#allocation82_spill] sm:$0xff]  ;;  %v10248_v44 = vld [vmem:[#allocation83_spill] sm:$0xff] }
 0x306   :  { %10242 = vst [vmem:[#allocation59_spill] sm:$0xff] %v8140_v54  ;;  %v4239_v5 = vsel %vm10244_vm12, 1.0, %v10187_v48  ;;  %v2779_v51 = vsub.f32 %v10245_v3, %v7947_v45  ;;  %v3775_v8 = vmul.f32 %v4236_v24, %v8140_v54  ;;  %v8149_v9 = vpop.xlane.xlu1 %2591  ;;  %v8151_v17 = vpop.f32.mrb[98].mxu1  ;;  %v2782_v52 = vsub.f32 %v10248_v44, %v7959_v61  ;;  %2713 = vmax.xlane.f32.xlu0 %v7961_v20 }
 0x307   :  { %10246 = vst [vmem:[#allocation56_spill] sm:$0xff] %v8149_v9  ;;  %10247 = vst [vmem:[#allocation57_spill] sm:$0xff] %v8151_v17  ;;  %v8159_v57 = vadd.f32 %v8149_v9, %v7894_v35  ;;  %v3778_v18 = vmul.f32 %v8151_v17, %v4239_v5  ;;  %v8163_v3 = vpop.xlane.xlu0 %2597  ;;  %v8165_v24 = vpop.f32.mrb[99].mxu1  ;;  %v8173_v50 = vadd.f32 %v3777_v30, %v7903_v49  ;;  %5175 = vpow2.f32 %v2907_v22 }
 0x308   :  { %10249 = vst [vmem:[#allocation58_spill] sm:$0xff] %v8163_v3  ;;  %10250 = vst [vmem:[#allocation82_spill] sm:$0xff] %v8165_v24  ;;  %v5170_v54 = vpop.eup %5169  ;;  %v8169_v37 = vadd.f32 %v8163_v3, %v7906_v21  ;;  %v3776_v44 = vmul.f32 %v4237_v63, %v8165_v24  ;;  %v8176_v35 = vadd.f32 %v3775_v8, %v7913_v10  ;;  %v2903_v9 = vmul.f32 1.442695, %v2779_v51 }
 0x309   :  { %3119 = vadd.xlane.f32.xlu1 %v5170_v54  ;;  %v8179_v5 = vadd.f32 %v3778_v18, %v7917_v4  ;;  %v5172_v20 = vpop.eup %5171  ;;  %v2909_v3 = vmul.f32 1.442695, %v2782_v52  ;;  %v10252_v4 = vld [vmem:[#allocation63_spill] sm:$0xff]  ;;  %v10258_v18 = vld [vmem:[#allocation60_spill] sm:$0xff]  ;;  %vm4036_vm9 = vcmask 392512   ;;  %vm4043_vm11 = vcmask 458112  }
 0x30a   :  { %v8181_v39 = vpop.xlane.xlu1 %2603  ;;  %v8184_v21 = vadd.f32 %v3776_v44, %v7920_v34  ;;  %3125 = vadd.xlane.f32.xlu0 %v5172_v20  ;;  %vm10253_vm14 = vcmp.eq.s32.totalorder %v5716_v14, %v10252_v4  ;;  %v2780_v34 = vsub.f32 %v7130_v0, %v7983_v13  ;;  %v10255_v20 = vld [vmem:[#allocation61_spill] sm:$0xff]  ;;  %v5174_v0 = vpop.eup %5173  ;;  %vm10259_vm1 = vcmp.eq.s32.totalorder %v5716_v14, %v10258_v18  ;;  %v10260_v44 = vld [vmem:[#allocation62_spill] sm:$0xff] }
 0x30b   :  { %10251 = vst [vmem:[#allocation83_spill] sm:$0xff] %v8181_v39  ;;  %v8190_v49 = vadd.f32 %v8181_v39, %v7922_v31  ;;  %v8192_v10 = vpop.xlane.xlu0 %2593  ;;  %v4242_v22 = vsel %vm10253_vm14, 1.0, %v10187_v48  ;;  %vm10256_vm15 = vcmp.eq.s32.totalorder %v5716_v14, %v10255_v20  ;;  %vm10261_vm3 = vcmp.eq.s32.totalorder %v5716_v14, %v10260_v44 }
 0x30c   :  { %v8204_v52 = vadd.f32 %v8192_v10, %v7924_v6  ;;  %v8206_v31 = vpop.f32.mrb[100].mxu1  ;;  %v4240_v63 = vsel %vm10256_vm15, 1.0, %v10187_v48  ;;  %v4241_v6 = vsel %vm10259_vm1, 1.0, %v10187_v48  ;;  %v4243_v4 = vsel %vm10261_vm3, 1.0, %v10187_v48 }
 0x30d   :  { %10254 = vst [vmem:[#allocation63_spill] sm:$0xff] %v8206_v31  ;;  %v3781_v30 = vmul.f32 %v8206_v31, %v4242_v22  ;;  %v8213_v51 = vpop.f32.mrb[101].mxu1  ;;  %2723 = vmax.xlane.f32.xlu1 %v7989_v26  ;;  %5177 = vpow2.f32 %v2903_v9  ;;  %vm4050_vm12 = vcmask 523712   ;;  %vm4057_vm14 = vcmask 589312  }
 0x30e   :  { %10257 = vst [vmem:[#allocation61_spill] sm:$0xff] %v8213_v51  ;;  %v3779_v20 = vmul.f32 %v4240_v63, %v8213_v51  ;;  %v8225_v54 = vpop.xlane.xlu1 %2599  ;;  %v8227_v22 = vpop.f32.mrb[102].mxu1  ;;  %5179 = vpow2.f32 %v2909_v3  ;;  %3121 = vadd.xlane.f32.xlu0 %v5174_v0  ;;  %v2905_v63 = vmul.f32 1.442695, %v2780_v34  ;;  %v10266_v34 = vld [vmem:[#allocation84_spill] sm:$0xff]  ;;  %vm4064_vm15 = vcmask 654912  }
 0x30f   :  { %10262 = vst [vmem:[#allocation60_spill] sm:$0xff] %v8225_v54  ;;  %10263 = vst [vmem:[#allocation62_spill] sm:$0xff] %v8227_v22  ;;  %v8233_v18 = vadd.f32 %v8225_v54, %v7947_v45  ;;  %v3782_v26 = vmul.f32 %v8227_v22, %v4243_v4  ;;  %v8236_v44 = vpop.xlane.xlu0 %2605  ;;  %v8238_v9 = vpop.f32.mrb[103].mxu1  ;;  %v8249_v45 = vadd.f32 %v3781_v30, %v7956_v55  ;;  %v10270_v55 = vld [vmem:[#allocation77_spill] sm:$0xff]  ;;  %vm4071_vm1 = vcmask 720512  }
 0x310   :  { %10264 = vst [vmem:[#allocation113_spill] sm:$0xff] %v8236_v44  ;;  %10265 = vst [vmem:[#allocation114_spill] sm:$0xff] %v8238_v9  ;;  %v8244_v3 = vadd.f32 %v8236_v44, %v7959_v61  ;;  %v3780_v8 = vmul.f32 %v4241_v6, %v8238_v9  ;;  %v8255_v4 = vadd.f32 %v3779_v20, %v7964_v36  ;;  %5181 = vpow2.f32 %v2905_v63  ;;  %v10294_v54 = vld [vmem:[#allocation45_spill] sm:$0xff] }
 0x311   :  { %2719 = vmax.xlane.f32.xlu1 %v7996_v60  ;;  %v8252_v0 = vadd.f32 %v3782_v26, %v7968_v56  ;;  %v2785_v39 = vsub.f32 %v10266_v34, %v7976_v19  ;;  %v5176_v36 = vpop.eup %5175  ;;  %v10272_v19 = vld [vmem:[#allocation67_spill] sm:$0xff]  ;;  %vm4078_vm3 = vcmask 786112  }
 0x312   :  { %v8259_v46 = vpop.xlane.xlu1 %2611  ;;  %v8262_v61 = vadd.f32 %v3780_v8, %v7974_v38  ;;  %2725 = vmax.xlane.f32.xlu0 %v8003_v40  ;;  %vm10273_vm2 = vcmp.eq.s32.totalorder %v5716_v14, %v10272_v19  ;;  %v10278_v40 = vld [vmem:[#allocation65_spill] sm:$0xff] }
 0x313   :  { %10267 = vst [vmem:[#allocation84_spill] sm:$0xff] %v8259_v46  ;;  %v8268_v30 = vadd.f32 %v10270_v55, %v8259_v46  ;;  %v8271_v56 = vpop.xlane.xlu0 %2601  ;;  %v4246_v26 = vsel %vm10273_vm2, 1.0, %v10187_v48  ;;  %v10276_v55 = vld [vmem:[#allocation64_spill] sm:$0xff]  ;;  %vm10279_vm10 = vcmp.eq.s32.totalorder %v5716_v14, %v10278_v40  ;;  %v2915_v6 = vmul.f32 1.442695, %v2785_v39  ;;  %v10284_v38 = vld [vmem:[#allocation85_spill] sm:$0xff] }
 0x314   :  { %10268 = vst [vmem:[#allocation115_spill] sm:$0xff] %v8262_v61  ;;  %10271 = vst [vmem:[#allocation77_spill] sm:$0xff] %v8271_v56  ;;  %v8281_v20 = vadd.f32 %v8271_v56, %v7983_v13  ;;  %v8283_v34 = vpop.f32.mrb[104].mxu1  ;;  %vm10277_vm5 = vcmp.eq.s32.totalorder %v5716_v14, %v10276_v55  ;;  %v4244_v19 = vsel %vm10279_vm10, 1.0, %v10187_v48  ;;  %v10281_v13 = vld [vmem:[#allocation66_spill] sm:$0xff]  ;;  %v10283_v56 = vld [vmem:[#allocation47_spill] sm:$0xff] }
 0x315   :  { %10275 = vst [vmem:[#allocation67_spill] sm:$0xff] %v8283_v34  ;;  %v4245_v60 = vsel %vm10277_vm5, 1.0, %v10187_v48  ;;  %v3785_v63 = vmul.f32 %v8283_v34, %v4246_v26  ;;  %v8294_v46 = vpop.f32.mrb[105].mxu1  ;;  %3131 = vadd.xlane.f32.xlu1 %v5176_v36  ;;  %vm10282_vm13 = vcmp.eq.s32.totalorder %v5716_v14, %v10281_v13  ;;  %v2783_v55 = vsub.f32 %v10284_v38, %v10283_v56  ;;  %v10287_v26 = vld [vmem:[#allocation86_spill] sm:$0xff] }
 0x316   :  { %10280 = vst [vmem:[#allocation64_spill] sm:$0xff] %v8294_v46  ;;  %v4247_v8 = vsel %vm10282_vm13, 1.0, %v10187_v48  ;;  %v3783_v44 = vmul.f32 %v4244_v19, %v8294_v46  ;;  %v8303_v61 = vpop.xlane.xlu1 %2607  ;;  %v8305_v40 = vpop.f32.mrb[106].mxu1  ;;  %v2786_v34 = vsub.f32 %v10287_v26, %v8017_v59  ;;  %2721 = vmax.xlane.f32.xlu0 %v8019_v58  ;;  %v10292_v46 = vld [vmem:[#allocation101_spill] sm:$0xff]  ;;  %5183 = vpow2.f32 %v2915_v6  ;;  %v10300_v6 = vld [vmem:[#allocation87_spill] sm:$0xff] }
 0x317   :  { %10285 = vst [vmem:[#allocation65_spill] sm:$0xff] %v8303_v61  ;;  %10286 = vst [vmem:[#allocation66_spill] sm:$0xff] %v8305_v40  ;;  %v8313_v13 = vadd.f32 %v10289_v28, %v8303_v61  ;;  %v3786_v39 = vmul.f32 %v8305_v40, %v4247_v8  ;;  %v8317_v56 = vpop.xlane.xlu0 %2613  ;;  %v8319_v38 = vpop.f32.mrb[107].mxu1  ;;  %v8332_v58 = vadd.f32 %v3785_v63, %v10294_v54  ;;  %v2911_v36 = vmul.f32 1.442695, %v2783_v55 }
 0x318   :  { %10290 = vst [vmem:[#allocation47_spill] sm:$0xff] %v8317_v56  ;;  %10291 = vst [vmem:[#allocation85_spill] sm:$0xff] %v8319_v38  ;;  %v5178_v19 = vpop.eup %5177  ;;  %v8325_v59 = vadd.f32 %v8033_v1, %v8317_v56  ;;  %v3784_v26 = vmul.f32 %v4245_v60, %v8319_v38  ;;  %v8329_v8 = vadd.f32 %v3783_v44, %v8028_v43  ;;  %v2917_v56 = vmul.f32 1.442695, %v2786_v34  ;;  %v10298_v60 = vld [vmem:[#allocation103_spill] sm:$0xff]  ;;  %v10301_v34 = vld [vmem:[#allocation102_spill] sm:$0xff] }
 0x319   :  { %v5180_v28 = vpop.eup %5179  ;;  %3127 = vadd.xlane.f32.xlu1 %v5178_v19  ;;  %10295 = vst [vmem:[#allocation46_spill] sm:$0xff] %v8332_v58  ;;  %v8335_v61 = vadd.f32 %v3786_v39, %v8037_v41  ;;  %v4250_v44 = vsel %vm659_vm0, 1.0, %v10187_v48  ;;  %v4251_v19 = vsel %vm660_vm7, 1.0, %v10187_v48  ;;  %5185 = vpow2.f32 %v2911_v36 }
 0x31a   :  { %10293 = vst [vmem:[#allocation86_spill] sm:$0xff] %v8329_v8  ;;  %v8337_v29 = vpop.xlane.xlu1 %2619  ;;  %v8340_v1 = vadd.f32 %v3784_v26, %v8042_v23  ;;  %3133 = vadd.xlane.f32.xlu0 %v5180_v28  ;;  %v2784_v23 = vsub.f32 %v10300_v6, %v8048_v33  ;;  %v4248_v26 = vsel %vm657_vm4, 1.0, %v10187_v48  ;;  %v5182_v33 = vpop.eup %5181  ;;  %v10305_v6 = vld [vmem:[#allocation68_spill] sm:$0xff]  ;;  %5187 = vpow2.f32 %v2917_v56 }
 0x31b   :  { %10296 = vst [vmem:[#allocation101_spill] sm:$0xff] %v8335_v61  ;;  %v8346_v43 = vadd.f32 %v8046_v25, %v8337_v29  ;;  %v8348_v54 = vpop.xlane.xlu0 %2609  ;;  %vm10306_vm0 = vcmp.eq.s32.totalorder %v5716_v14, %v10305_v6  ;;  %vm4008_vm4 = vcmask 130112   ;;  %vm4015_vm7 = vcmask 195712  }
 0x31c   :  { %10297 = vst [vmem:[#allocation45_spill] sm:$0xff] %v8340_v1  ;;  %v8360_v55 = vadd.f32 %v8058_v42, %v8348_v54  ;;  %v8362_v25 = vpop.f32.mrb[108].mxu1  ;;  %v4249_v42 = vsel %vm10306_vm0, 1.0, %v10187_v48  ;;  %v10309_v1 = vld [vmem:[#allocation104_spill] sm:$0xff]  ;;  %v2913_v36 = vmul.f32 1.442695, %v2784_v23 }
 0x31d   :  { %10302 = vst [vmem:[#allocation103_spill] sm:$0xff] %v8362_v25  ;;  %v3789_v28 = vmul.f32 %v8362_v25, %v4250_v44  ;;  %v8369_v41 = vpop.f32.mrb[109].mxu1  ;;  %2731 = vmax.xlane.f32.xlu1 %v8060_v2  ;;  %v10313_v2 = vld [vmem:[#allocation49_spill] sm:$0xff]  ;;  %vm4085_vm2 = vcmask 851712   ;;  %vm4092_vm5 = vcmask 917312   ;;  %vm4099_vm10 = vcmask 982912  }
 0x31e   :  { %10304 = vst [vmem:[#allocation71_spill] sm:$0xff] %v8369_v41  ;;  %v3787_v39 = vmul.f32 %v4248_v26, %v8369_v41  ;;  %v8381_v61 = vpop.xlane.xlu1 %2615  ;;  %v8383_v44 = vpop.f32.mrb[110].mxu1  ;;  %3129 = vadd.xlane.f32.xlu0 %v5182_v33  ;;  %v10312_v26 = vld [vmem:[#allocation105_spill] sm:$0xff]  ;;  %5189 = vpow2.f32 %v2913_v36  ;;  %vm4106_vm13 = vcmask 1048512  }
 0x31f   :  { %10308 = vst [vmem:[#allocation87_spill] sm:$0xff] %v8383_v44  ;;  %v8389_v6 = vadd.f32 %v8088_v15, %v8381_v61  ;;  %v3790_v8 = vmul.f32 %v8383_v44, %v4251_v19  ;;  %v8392_v63 = vpop.xlane.xlu0 %2621  ;;  %v8394_v48 = vpop.f32.mrb[111].mxu1  ;;  %v8408_v19 = vadd.f32 %v3789_v28, %v8084_v12  ;;  %v10321_v28 = vld [vmem:[#allocation80_spill] sm:$0xff] }
 0x320   :  { %10310 = vst [vmem:[#allocation102_spill] sm:$0xff] %v8392_v63  ;;  %10311 = vst [vmem:[#allocation69_spill] sm:$0xff] %v8394_v48  ;;  %v8400_v56 = vadd.f32 %v8100_v32, %v8392_v63  ;;  %v3788_v58 = vmul.f32 %v4249_v42, %v8394_v48  ;;  %v8405_v15 = vadd.f32 %v3787_v39, %v8095_v27  ;;  %v10318_v32 = vld [vmem:[#allocation107_spill] sm:$0xff]  ;;  %v5184_v12 = vpop.eup %5183  ;;  %v10322_v39 = vld [vmem:[#allocation88_spill] sm:$0xff] }
 0x321   :  { %2727 = vmax.xlane.f32.xlu1 %v10313_v2  ;;  %10315 = vst [vmem:[#allocation70_spill] sm:$0xff] %v8408_v19  ;;  %v8411_v33 = vadd.f32 %v3790_v8, %v8107_v11  ;;  %v10320_v11 = vld [vmem:[#allocation106_spill] sm:$0xff]  ;;  %v2789_v63 = vsub.f32 %v10322_v39, %v10321_v28 }
 0x322   :  { %10314 = vst [vmem:[#allocation68_spill] sm:$0xff] %v8405_v15  ;;  %v8413_v23 = vpop.xlane.xlu1 %2627  ;;  %v8416_v14 = vadd.f32 %v3788_v58, %v8112_v62  ;;  %2733 = vmax.xlane.f32.xlu0 %v8073_v47  ;;  %v10325_v15 = vld [vmem:[#allocation53_spill] sm:$0xff]  ;;  %v10328_v47 = vld [vmem:[#allocation50_spill] sm:$0xff] }
 0x323   :  { %10316 = vst [vmem:[#allocation104_spill] sm:$0xff] %v8411_v33  ;;  %v8422_v42 = vadd.f32 %v8116_v16, %v8413_v23  ;;  %v8425_v27 = vpop.xlane.xlu0 %2617  ;;  %v2923_v19 = vmul.f32 1.442695, %v2789_v63 }
 0x324   :  { %10317 = vst [vmem:[#allocation105_spill] sm:$0xff] %v8416_v14  ;;  %10319 = vst [vmem:[#allocation107_spill] sm:$0xff] %v8425_v27  ;;  %v8431_v58 = vadd.f32 %v8127_v53, %v8425_v27 }
 0x325   :  { %v4863_v62 = vpop.f32.mrb[112].mxu1  ;;  %3139 = vadd.xlane.f32.xlu1 %v5184_v12  ;;  %v10327_v12 = vld [vmem:[#allocation109_spill] sm:$0xff]  ;;  %5191 = vpow2.f32 %v2923_v19  ;;  %v10340_v19 = vld [vmem:[#allocation7_spill] sm:$0xff] }
 0x326   :  { %v2496_v16 = vpop.f32.mrb[113].mxu1  ;;  %v8435_v33 = vpop.xlane.xlu1 %2623  ;;  %2729 = vmax.xlane.f32.xlu0 %v10325_v15 }
 0x327   :  { %10323 = vst [vmem:[#allocation106_spill] sm:$0xff] %v8435_v33  ;;  %v8441_v36 = vadd.f32 %v8159_v57, %v8435_v33  ;;  %v4864_v8 = vpop.f32.mrb[114].mxu1  ;;  %v8444_v53 = vpop.xlane.xlu0 %2629  ;;  %v10329_v57 = vld [vmem:[#allocation89_spill] sm:$0xff] }
 0x328   :  { %10326 = vst [vmem:[#allocation80_spill] sm:$0xff] %v8444_v53  ;;  %v5186_v62 = vpop.eup %5185  ;;  %v8450_v28 = vadd.f32 %v8169_v37, %v8444_v53  ;;  %v2498_v39 = vpop.f32.mrb[115].mxu1  ;;  %v2787_v33 = vsub.f32 %v10329_v57, %v10328_v47 }
 0x329   :  { %v5188_v16 = vpop.eup %5187  ;;  %3135 = vadd.xlane.f32.xlu1 %v5186_v62  ;;  %v10334_v62 = vld [vmem:[#allocation81_spill] sm:$0xff] }
 0x32a   :  { %v8454_v8 = vpop.xlane.xlu1 %2635  ;;  %3141 = vadd.xlane.f32.xlu0 %v5188_v16  ;;  %v5190_v57 = vpop.eup %5189  ;;  %v2919_v14 = vmul.f32 1.442695, %v2787_v33  ;;  %v10341_v16 = vld [vmem:[#allocation59_spill] sm:$0xff] }
 0x32b   :  { %10330 = vst [vmem:[#allocation88_spill] sm:$0xff] %v8454_v8  ;;  %v8460_v27 = vadd.f32 %v8190_v49, %v8454_v8  ;;  %v8462_v2 = vpop.xlane.xlu0 %2625  ;;  %v10336_v49 = vld [vmem:[#allocation112_spill] sm:$0xff]  ;;  %v10345_v33 = vld [vmem:[#allocation91_spill] sm:$0xff] }
 0x32c   :  { %10332 = vst [vmem:[#allocation109_spill] sm:$0xff] %v8462_v2  ;;  %v8468_v63 = vadd.f32 %v8204_v52, %v8462_v2  ;;  %v10339_v2 = vld [vmem:[#allocation90_spill] sm:$0xff]  ;;  %5193 = vpow2.f32 %v2919_v14 }
 0x32d   :  { %v4867_v47 = vpop.f32.mrb[116].mxu1  ;;  %2739 = vmax.xlane.f32.xlu1 %v10334_v62 }
 0x32e   :  { %v2508_v15 = vpop.f32.mrb[117].mxu1  ;;  %v8471_v53 = vpop.xlane.xlu1 %2631  ;;  %3137 = vadd.xlane.f32.xlu0 %v5190_v57  ;;  %v10338_v47 = vld [vmem:[#allocation55_spill] sm:$0xff] }
 0x32f   :  { %10335 = vst [vmem:[#allocation50_spill] sm:$0xff] %v8471_v53  ;;  %v8477_v8 = vadd.f32 %v8233_v18, %v8471_v53  ;;  %v4868_v39 = vpop.f32.mrb[118].mxu1  ;;  %v8479_v52 = vpop.xlane.xlu0 %2637  ;;  %v2790_v62 = vsub.f32 %v10339_v2, %v10338_v47 }
 0x330   :  { %10337 = vst [vmem:[#allocation89_spill] sm:$0xff] %v8479_v52  ;;  %v8487_v15 = vadd.f32 %v8244_v3, %v8479_v52  ;;  %v2510_v37 = vpop.f32.mrb[119].mxu1  ;;  %v10344_v3 = vld [vmem:[#allocation54_spill] sm:$0xff] }
 0x331   :  { %2735 = vmax.xlane.f32.xlu1 %v10341_v16  ;;  %v2925_v47 = vmul.f32 1.442695, %v2790_v62  ;;  %v2788_v37 = vsub.f32 %v10345_v33, %v10344_v3  ;;  %v10346_v16 = vld [vmem:[#allocation6_spill] sm:$0xff] }
 0x332   :  { %v8490_v18 = vpop.xlane.xlu1 %2643  ;;  %2741 = vmax.xlane.f32.xlu0 %v8151_v17 }
 0x333   :  { %10342 = vst [vmem:[#allocation112_spill] sm:$0xff] %v8490_v18  ;;  %v8496_v53 = vadd.f32 %v8268_v30, %v8490_v18  ;;  %v8499_v2 = vpop.xlane.xlu0 %2633  ;;  %5195 = vpow2.f32 %v2925_v47 }
 0x334   :  { %v8507_v52 = vadd.f32 %v8281_v20, %v8499_v2  ;;  %v5192_v20 = vpop.eup %5191 }
 0x335   :  { %v4871_v57 = vpop.f32.mrb[120].mxu1  ;;  %3843 = vadd.xlane.f32.xlu1 %v8173_v50 }
 0x336   :  { %v2520_v30 = vpop.f32.mrb[121].mxu1  ;;  %v8510_v18 = vpop.xlane.xlu1 %2639  ;;  %2737 = vmax.xlane.f32.xlu0 %v8165_v24  ;;  %v2921_v57 = vmul.f32 1.442695, %v2788_v37 }
 0x337   :  { %v8516_v62 = vadd.f32 %v8313_v13, %v8510_v18  ;;  %v4872_v33 = vpop.f32.mrb[122].mxu1  ;;  %v8519_v3 = vpop.xlane.xlu0 %2645  ;;  %v10354_v13 = vld [vmem:[#allocation92_spill] sm:$0xff] }
 0x338   :  { %10348 = vst [vmem:[#allocation55_spill] sm:$0xff] %v8519_v3  ;;  %v8525_v14 = vadd.f32 %v8325_v59, %v8519_v3  ;;  %v2522_v39 = vpop.f32.mrb[123].mxu1  ;;  %v5194_v37 = vpop.eup %5193  ;;  %5197 = vpow2.f32 %v2921_v57  ;;  %v10352_v59 = vld [vmem:[#allocation8_spill] sm:$0xff] }
 0x339   :  { %3147 = vadd.xlane.f32.xlu1 %v5192_v20  ;;  %v10353_v33 = vld [vmem:[#allocation52_spill] sm:$0xff] }
 0x33a   :  { %v8527_v17 = vpop.xlane.xlu1 %2651  ;;  %3839 = vadd.xlane.f32.xlu0 %v8176_v35  ;;  %v2793_v3 = vsub.f32 %v10354_v13, %v10353_v33 }
 0x33b   :  { %10350 = vst [vmem:[#allocation90_spill] sm:$0xff] %v8527_v17  ;;  %v8533_v24 = vadd.f32 %v8346_v43, %v8527_v17  ;;  %v8536_v47 = vpop.xlane.xlu0 %2641 }
 0x33c   :  { %v8542_v39 = vadd.f32 %v8360_v55, %v8536_v47  ;;  %v2931_v50 = vmul.f32 1.442695, %v2793_v3 }
 0x33d   :  { %v4875_v20 = vpop.f32.mrb[124].mxu1  ;;  %3143 = vadd.xlane.f32.xlu1 %v5194_v37  ;;  %v10361_v37 = vld [vmem:[#allocation58_spill] sm:$0xff] }
 0x33e   :  { %v2532_v43 = vpop.f32.mrb[125].mxu1  ;;  %v8546_v17 = vpop.xlane.xlu1 %2647  ;;  %3845 = vadd.xlane.f32.xlu0 %v8179_v5  ;;  %5199 = vpow2.f32 %v2931_v50  ;;  %v10366_v50 = vld [vmem:[#allocation93_spill] sm:$0xff] }
 0x33f   :  { %v8552_v57 = vadd.f32 %v8389_v6, %v8546_v17  ;;  %v4876_v30 = vpop.f32.mrb[126].mxu1  ;;  %v8555_v55 = vpop.xlane.xlu0 %2653 }
 0x340   :  { %10356 = vst [vmem:[#allocation7_spill] sm:$0xff] %v8555_v55  ;;  %v8561_v13 = vadd.f32 %v8400_v56, %v8555_v55  ;;  %v2534_v33 = vpop.f32.mrb[127].mxu1  ;;  %v5196_v43 = vpop.eup %5195  ;;  %v10362_v56 = vld [vmem:[#allocation94_spill] sm:$0xff] }
 0x341   :  { %3841 = vadd.xlane.f32.xlu1 %v8184_v21  ;;  %v2794_v55 = vsub.f32 %v10362_v56, %v10361_v37 }
 0x342   :  { %v8564_v35 = vpop.xlane.xlu1 %2659  ;;  %3149 = vadd.xlane.f32.xlu0 %v5196_v43  ;;  %v5198_v30 = vpop.eup %5197 }
 0x343   :  { %10358 = vst [vmem:[#allocation54_spill] sm:$0xff] %v8564_v35  ;;  %v8570_v5 = vadd.f32 %v8422_v42, %v8564_v35  ;;  %v8572_v20 = vpop.xlane.xlu0 %2649  ;;  %v2933_v56 = vmul.f32 1.442695, %v2794_v55 }
 0x344   :  { %10360 = vst [vmem:[#allocation91_spill] sm:$0xff] %v8572_v20  ;;  %v8580_v3 = vadd.f32 %v8431_v58, %v8572_v20  ;;  %v10365_v58 = vld [vmem:[#allocation18_spill] sm:$0xff]  ;;  %v10367_v20 = vld [vmem:[#allocation56_spill] sm:$0xff] }
 0x345   :  { %2747 = vmax.xlane.f32.xlu1 %v8206_v31  ;;  %v10368_v43 = vsub.f32 %v10366_v50, %v10367_v20  ;;  %5201 = vpow2.f32 %v2933_v56 }
 0x346   :  { %v8583_v6 = vpop.xlane.xlu1 %2655  ;;  %3145 = vadd.xlane.f32.xlu0 %v5198_v30 }
 0x347   :  { %v8589_v35 = vadd.f32 %v8441_v36, %v8583_v6  ;;  %v8591_v37 = vpop.xlane.xlu0 %2661  ;;  %v2927_v42 = vmul.f32 1.442695, %v10368_v43  ;;  %v10369_v36 = vld [vmem:[#allocation23_spill] sm:$0xff] }
 0x348   :  { %v8597_v31 = vadd.f32 %v8450_v28, %v8591_v37  ;;  %v10371_v28 = vld [vmem:[#allocation16_spill] sm:$0xff] }
 0x349   :  { %2743 = vmax.xlane.f32.xlu1 %v8213_v51  ;;  %5203 = vpow2.f32 %v2927_v42  ;;  %v5200_v51 = vpop.eup %5199  ;;  %v10382_v42 = vld [vmem:[#allocation83_spill] sm:$0xff] }
 0x34a   :  { %v8603_v33 = vpop.xlane.xlu1 %2667  ;;  %2749 = vmax.xlane.f32.xlu0 %v8227_v22 }
 0x34b   :  { %v8609_v55 = vadd.f32 %v8460_v27, %v8603_v33  ;;  %v8612_v21 = vpop.xlane.xlu0 %2657  ;;  %v10373_v27 = vld [vmem:[#allocation21_spill] sm:$0xff] }
 0x34c   :  { %10370 = vst [vmem:[#allocation6_spill] sm:$0xff] %v8612_v21  ;;  %v8618_v20 = vadd.f32 %v8468_v63, %v8612_v21  ;;  %v10375_v63 = vsub.f32 %v7259_v7, %v8192_v10 }
 0x34d   :  { %3851 = vadd.xlane.f32.xlu1 %v8249_v45  ;;  %v10376_v45 = vld [vmem:[#allocation22_spill] sm:$0xff] }
 0x34e   :  { %v8621_v43 = vpop.xlane.xlu1 %2663  ;;  %2745 = vmax.xlane.f32.xlu0 %v8238_v9  ;;  %v2929_v22 = vmul.f32 1.442695, %v10375_v63  ;;  %v10381_v9 = vld [vmem:[#allocation95_spill] sm:$0xff] }
 0x34f   :  { %10372 = vst [vmem:[#allocation8_spill] sm:$0xff] %v8621_v43  ;;  %v8627_v30 = vadd.f32 %v8477_v8, %v8621_v43  ;;  %v8630_v56 = vpop.xlane.xlu0 %2669  ;;  %v10383_v8 = vsub.f32 %v10381_v9, %v10382_v42  ;;  %v10388_v42 = vld [vmem:[#allocation96_spill] sm:$0xff] }
 0x350   :  { %10374 = vst [vmem:[#allocation52_spill] sm:$0xff] %v8630_v56  ;;  %v8639_v21 = vadd.f32 %v8487_v15, %v8630_v56  ;;  %5205 = vpow2.f32 %v2929_v22  ;;  %v5202_v15 = vpop.eup %5201 }
 0x351   :  { %3155 = vadd.xlane.f32.xlu1 %v5200_v51 }
 0x352   :  { %v8641_v50 = vpop.xlane.xlu1 %2675  ;;  %3853 = vadd.xlane.f32.xlu0 %v8252_v0 }
 0x353   :  { %10377 = vst [vmem:[#allocation92_spill] sm:$0xff] %v8641_v50  ;;  %v8647_v43 = vadd.f32 %v8496_v53, %v8641_v50  ;;  %v8650_v7 = vpop.xlane.xlu0 %2665  ;;  %v2939_v53 = vmul.f32 1.442695, %v10383_v8  ;;  %v10389_v8 = vld [vmem:[#allocation60_spill] sm:$0xff] }
 0x354   :  { %10379 = vst [vmem:[#allocation58_spill] sm:$0xff] %v8650_v7  ;;  %v8656_v51 = vadd.f32 %v8507_v52, %v8650_v7  ;;  %v5204_v52 = vpop.eup %5203  ;;  %v10390_v56 = vsub.f32 %v10388_v42, %v10389_v8  ;;  %v10393_v7 = vld [vmem:[#allocation115_spill] sm:$0xff] }
 0x355   :  { %3847 = vadd.xlane.f32.xlu1 %v8255_v4  ;;  %5207 = vpow2.f32 %v2939_v53 }
 0x356   :  { %v8662_v50 = vpop.xlane.xlu1 %2671  ;;  %3157 = vadd.xlane.f32.xlu0 %v5202_v15  ;;  %v2935_v0 = vmul.f32 1.442695, %v10390_v56  ;;  %v10399_v15 = vld [vmem:[#allocation67_spill] sm:$0xff] }
 0x357   :  { %10384 = vst [vmem:[#allocation94_spill] sm:$0xff] %v8662_v50  ;;  %v8668_v22 = vadd.f32 %v8516_v62, %v8662_v50  ;;  %v8670_v63 = vpop.xlane.xlu0 %2677 }
 0x358   :  { %10386 = vst [vmem:[#allocation18_spill] sm:$0xff] %v8670_v63  ;;  %v8676_v9 = vadd.f32 %v8525_v14, %v8670_v63  ;;  %v10395_v14 = vld [vmem:[#allocation97_spill] sm:$0xff]  ;;  %5209 = vpow2.f32 %v2935_v0 }
 0x359   :  { %3151 = vadd.xlane.f32.xlu1 %v5204_v52  ;;  %v10396_v52 = vld [vmem:[#allocation113_spill] sm:$0xff] }
 0x35a   :  { %v8681_v10 = vpop.xlane.xlu1 %2683  ;;  %3849 = vadd.xlane.f32.xlu0 %v10393_v7  ;;  %v10397_v53 = vsub.f32 %v10395_v14, %v10396_v52  ;;  %v5206_v62 = vpop.eup %5205 }
 0x35b   :  { %10391 = vst [vmem:[#allocation93_spill] sm:$0xff] %v8681_v10  ;;  %v8687_v50 = vadd.f32 %v8533_v24, %v8681_v10  ;;  %v8690_v4 = vpop.xlane.xlu0 %2673  ;;  %v10406_v10 = vld [vmem:[#allocation64_spill] sm:$0xff] }
 0x35c   :  { %10394 = vst [vmem:[#allocation56_spill] sm:$0xff] %v8690_v4  ;;  %v2941_v63 = vmul.f32 1.442695, %v10397_v53  ;;  %v8699_v8 = vadd.f32 %v8542_v39, %v8690_v4  ;;  %v10402_v53 = vld [vmem:[#allocation98_spill] sm:$0xff]  ;;  %v10403_v39 = vld [vmem:[#allocation77_spill] sm:$0xff] }
 0x35d   :  { %2755 = vmax.xlane.f32.xlu1 %v10399_v15  ;;  %v10404_v56 = vsub.f32 %v10402_v53, %v10403_v39 }
 0x35e   :  { %v8702_v24 = vpop.xlane.xlu1 %2679  ;;  %3153 = vadd.xlane.f32.xlu0 %v5206_v62  ;;  %5211 = vpow2.f32 %v2941_v63  ;;  %v10412_v62 = vld [vmem:[#allocation84_spill] sm:$0xff] }
 0x35f   :  { %v8708_v14 = vadd.f32 %v8552_v57, %v8702_v24  ;;  %v8710_v52 = vpop.xlane.xlu0 %2685  ;;  %v2937_v4 = vmul.f32 1.442695, %v10404_v56  ;;  %v5208_v53 = vpop.eup %5207 }
 0x360   :  { %10401 = vst [vmem:[#allocation23_spill] sm:$0xff] %v8710_v52  ;;  %v8719_v42 = vadd.f32 %v8561_v13, %v8710_v52 }
 0x361   :  { %2751 = vmax.xlane.f32.xlu1 %v10406_v10  ;;  %5213 = vpow2.f32 %v2937_v4  ;;  %v10411_v10 = vld [vmem:[#allocation99_spill] sm:$0xff] }
 0x362   :  { %v8722_v7 = vpop.xlane.xlu1 %2691  ;;  %2757 = vmax.xlane.f32.xlu0 %v8305_v40  ;;  %v10413_v57 = vsub.f32 %v10411_v10, %v10412_v62  ;;  %v10418_v62 = vld [vmem:[#allocation100_spill] sm:$0xff] }
 0x363   :  { %10407 = vst [vmem:[#allocation16_spill] sm:$0xff] %v8722_v7  ;;  %v8728_v63 = vadd.f32 %v8570_v5, %v8722_v7  ;;  %v8731_v56 = vpop.xlane.xlu0 %2681  ;;  %v10419_v7 = vld [vmem:[#allocation65_spill] sm:$0xff] }
 0x364   :  { %10409 = vst [vmem:[#allocation21_spill] sm:$0xff] %v8731_v56  ;;  %v8737_v0 = vadd.f32 %v8580_v3, %v8731_v56  ;;  %v2947_v52 = vmul.f32 1.442695, %v10413_v57  ;;  %v5210_v3 = vpop.eup %5209  ;;  %v10420_v40 = vsub.f32 %v10418_v62, %v10419_v7 }
 0x365   :  { %3163 = vadd.xlane.f32.xlu1 %v5208_v53  ;;  %v10417_v53 = vld [vmem:[#allocation33_spill] sm:$0xff] }
 0x366   :  { %v8742_v5 = vpop.xlane.xlu1 %2687  ;;  %2753 = vmax.xlane.f32.xlu0 %v8319_v38  ;;  %5215 = vpow2.f32 %v2947_v52  ;;  %v10421_v38 = vld [vmem:[#allocation32_spill] sm:$0xff] }
 0x367   :  { %10414 = vst [vmem:[#allocation22_spill] sm:$0xff] %v8742_v5  ;;  %v8748_v4 = vadd.f32 %v8589_v35, %v8742_v5  ;;  %v8751_v39 = vpop.xlane.xlu0 %2693  ;;  %v2943_v35 = vmul.f32 1.442695, %v10420_v40 }
 0x368   :  { %10416 = vst [vmem:[#allocation95_spill] sm:$0xff] %v8751_v39  ;;  %v8757_v10 = vadd.f32 %v8597_v31, %v8751_v39  ;;  %v5212_v57 = vpop.eup %5211  ;;  %v10422_v31 = vld [vmem:[#allocation47_spill] sm:$0xff]  ;;  %v10424_v39 = vld [vmem:[#allocation34_spill] sm:$0xff] }
 0x369   :  { %3159 = vadd.xlane.f32.xlu1 %v5210_v3  ;;  %v10423_v3 = vsub.f32 %v10292_v46, %v10422_v31  ;;  %5217 = vpow2.f32 %v2943_v35  ;;  %v10426_v46 = vld [vmem:[#allocation73_spill] sm:$0xff]  ;;  %v10427_v35 = vsub.f32 %v10301_v34, %v8348_v54 }
 0x36a   :  { %v8762_v5 = vpop.xlane.xlu1 %2699  ;;  %3165 = vadd.xlane.f32.xlu0 %v5212_v57 }
 0x36b   :  { %v8768_v15 = vadd.f32 %v8609_v55, %v8762_v5  ;;  %v8770_v56 = vpop.xlane.xlu0 %2689  ;;  %v2949_v52 = vmul.f32 1.442695, %v10423_v3  ;;  %v5214_v62 = vpop.eup %5213  ;;  %v10425_v55 = vsub.f32 %v10298_v60, %v8337_v29  ;;  %v2945_v7 = vmul.f32 1.442695, %v10427_v35  ;;  %v10428_v29 = vld [vmem:[#allocation74_spill] sm:$0xff]  ;;  %v10432_v60 = vld [vmem:[#allocation39_spill] sm:$0xff] }
 0x36c   :  { %v8779_v40 = vadd.f32 %v8618_v20, %v8770_v56 }
 0x36d   :  { %2763 = vmax.xlane.f32.xlu1 %v8362_v25  ;;  %v2955_v57 = vmul.f32 1.442695, %v10425_v55  ;;  %5219 = vpow2.f32 %v2949_v52  ;;  %v10430_v52 = vld [vmem:[#allocation102_spill] sm:$0xff] }
 0x36e   :  { %v8785_v13 = vpop.xlane.xlu1 %2695  ;;  %3161 = vadd.xlane.f32.xlu0 %v5214_v62  ;;  %v10431_v35 = vsub.f32 %v10312_v26, %v10430_v52  ;;  %v10434_v26 = vld [vmem:[#allocation107_spill] sm:$0xff] }
 0x36f   :  { %v8791_v3 = vadd.f32 %v8627_v30, %v8785_v13  ;;  %v8793_v20 = vpop.xlane.xlu0 %2701  ;;  %5221 = vpow2.f32 %v2955_v57  ;;  %v10429_v30 = vsub.f32 %v10309_v1, %v8381_v61  ;;  %v10433_v61 = vsub.f32 %v10318_v32, %v8413_v23 }
 0x370   :  { %v8802_v55 = vadd.f32 %v8639_v21, %v8793_v20  ;;  %v5216_v34 = vpop.eup %5215  ;;  %5223 = vpow2.f32 %v2945_v7  ;;  %v2957_v21 = vmul.f32 1.442695, %v10431_v35  ;;  %v10435_v52 = vsub.f32 %v10320_v11, %v10434_v26 }
 0x371   :  { %2759 = vmax.xlane.f32.xlu1 %v8369_v41  ;;  %v2951_v62 = vmul.f32 1.442695, %v10429_v30  ;;  %v2963_v1 = vmul.f32 1.442695, %v10433_v61 }
 0x372   :  { %v8808_v31 = vpop.xlane.xlu1 %3107  ;;  %2765 = vmax.xlane.f32.xlu0 %v8383_v44  ;;  %v2953_v35 = vmul.f32 1.442695, %v10435_v52 }
 0x373   :  { %v8811_v54 = vpop.xlane.xlu0 %2697  ;;  %5225 = vpow2.f32 %v2951_v62  ;;  %v5218_v7 = vpop.eup %5217  ;;  %v10436_v62 = vld [vmem:[#allocation108_spill] sm:$0xff] }
 0x374   :  { %v8820_v57 = vadd.f32 %v8656_v51, %v8811_v54  ;;  %5227 = vpow2.f32 %v2957_v21 }
 0x375   :  { %3171 = vadd.xlane.f32.xlu1 %v5216_v34  ;;  %5229 = vpow2.f32 %v2963_v1  ;;  %v10437_v34 = vld [vmem:[#allocation106_spill] sm:$0xff] }
 0x376   :  { %v8825_v30 = vpop.xlane.xlu1 %3103  ;;  %2761 = vmax.xlane.f32.xlu0 %v8394_v48  ;;  %v10438_v44 = vsub.f32 %v10436_v62, %v10437_v34  ;;  %5231 = vpow2.f32 %v2953_v35  ;;  %v10443_v62 = vld [vmem:[#allocation111_spill] sm:$0xff]  ;;  %v10444_v34 = vld [vmem:[#allocation88_spill] sm:$0xff] }
 0x377   :  { %v8831_v41 = vpop.xlane.xlu0 %3109  ;;  %v5220_v51 = vpop.eup %5219  ;;  %v10445_v25 = vsub.f32 %v10443_v62, %v10444_v34 }
 0x378   :  { %v2959_v23 = vmul.f32 1.442695, %v10438_v44 }
 0x379   :  { %3167 = vadd.xlane.f32.xlu1 %v5218_v7  ;;  %v5222_v11 = vpop.eup %5221  ;;  %v10441_v7 = vld [vmem:[#allocation80_spill] sm:$0xff]  ;;  %v2971_v48 = vmul.f32 1.442695, %v10445_v25 }
 0x37a   :  { %v8836_v32 = vpop.xlane.xlu1 %2707  ;;  %3173 = vadd.xlane.f32.xlu0 %v5220_v51  ;;  %v10442_v26 = vsub.f32 %v10327_v12, %v10441_v7  ;;  %v5224_v44 = vpop.eup %5223  ;;  %5233 = vpow2.f32 %v2959_v23  ;;  %v10448_v7 = vld [vmem:[#allocation110_spill] sm:$0xff] }
 0x37b   :  { %10439 = vst [vmem:[#allocation83_spill] sm:$0xff] %v8836_v32  ;;  %v8842_v21 = vadd.f32 %v8647_v43, %v8836_v32  ;;  %v8847_v52 = vpop.xlane.xlu0 %3105  ;;  %v10447_v43 = vld [vmem:[#allocation37_spill] sm:$0xff] }
 0x37c   :  { %v2965_v1 = vmul.f32 1.442695, %v10442_v26 }
 0x37d   :  { %3179 = vadd.xlane.f32.xlu1 %v5222_v11  ;;  %v5226_v12 = vpop.eup %5225  ;;  %v10449_v11 = vld [vmem:[#allocation109_spill] sm:$0xff] }
 0x37e   :  { %v8852_v61 = vpop.xlane.xlu1 %2703  ;;  %3169 = vadd.xlane.f32.xlu0 %v5224_v44  ;;  %5235 = vpow2.f32 %v2965_v1  ;;  %v10450_v26 = vsub.f32 %v10448_v7, %v10449_v11  ;;  %v5228_v51 = vpop.eup %5227  ;;  %v10455_v11 = vld [vmem:[#allocation89_spill] sm:$0xff] }
 0x37f   :  { %10446 = vst [vmem:[#allocation96_spill] sm:$0xff] %v8852_v61  ;;  %v8858_v35 = vadd.f32 %v8668_v22, %v8852_v61  ;;  %v8863_v32 = vpop.xlane.xlu0 %2709  ;;  %5237 = vpow2.f32 %v2971_v48  ;;  %v10452_v22 = vld [vmem:[#allocation50_spill] sm:$0xff]  ;;  %v5230_v7 = vpop.eup %5229 }
 0x380   :  { %v2961_v23 = vmul.f32 1.442695, %v10450_v26  ;;  %v8869_v34 = vadd.f32 %v8676_v9, %v8863_v32  ;;  %v10453_v44 = vsub.f32 %v10336_v49, %v10452_v22  ;;  %v10456_v26 = vsub.f32 %v10340_v19, %v10455_v11  ;;  %v10458_v9 = vld [vmem:[#allocation36_spill] sm:$0xff]  ;;  %v5232_v49 = vpop.eup %5231  ;;  %v10459_v22 = vld [vmem:[#allocation11_spill] sm:$0xff] }
 0x381   :  { %3175 = vadd.xlane.f32.xlu1 %v5226_v12  ;;  %v10463_v11 = vsub.f32 %v10346_v16, %v8499_v2  ;;  %v10468_v2 = vld [vmem:[#allocation10_spill] sm:$0xff] }
 0x382   :  { %v2967_v1 = vmul.f32 1.442695, %v10453_v44  ;;  %v8874_v61 = vpop.xlane.xlu1 %3115  ;;  %3181 = vadd.xlane.f32.xlu0 %v5228_v51  ;;  %5239 = vpow2.f32 %v2961_v23  ;;  %v2973_v62 = vmul.f32 1.442695, %v10456_v26  ;;  %v10460_v51 = vld [vmem:[#allocation112_spill] sm:$0xff] }
 0x383   :  { %10454 = vst [vmem:[#allocation60_spill] sm:$0xff] %v8874_v61  ;;  %v8879_v25 = vpop.xlane.xlu0 %2705  ;;  %v10461_v44 = vsub.f32 %v10459_v22, %v10460_v51  ;;  %v2969_v26 = vmul.f32 1.442695, %v10463_v11  ;;  %v10467_v51 = vld [vmem:[#allocation76_spill] sm:$0xff] }
 0x384   :  { %10457 = vst [vmem:[#allocation115_spill] sm:$0xff] %v8879_v25  ;;  %v8885_v48 = vadd.f32 %v8699_v8, %v8879_v25  ;;  %5241 = vpow2.f32 %v2967_v1  ;;  %v5234_v19 = vpop.eup %5233 }
 0x385   :  { %3187 = vadd.xlane.f32.xlu1 %v5230_v7  ;;  %v2979_v23 = vmul.f32 1.442695, %v10461_v44  ;;  %5243 = vpow2.f32 %v2973_v62  ;;  %v10465_v7 = vld [vmem:[#allocation9_spill] sm:$0xff]  ;;  %v10469_v44 = vld [vmem:[#allocation55_spill] sm:$0xff] }
 0x386   :  { %v8890_v61 = vpop.xlane.xlu1 %3111  ;;  %3177 = vadd.xlane.f32.xlu0 %v5232_v49  ;;  %v10466_v1 = vsub.f32 %v10465_v7, %v8510_v18  ;;  %v10472_v7 = vld [vmem:[#allocation15_spill] sm:$0xff] }
 0x387   :  { %10462 = vst [vmem:[#allocation97_spill] sm:$0xff] %v8890_v61  ;;  %v8895_v12 = vpop.xlane.xlu0 %3117  ;;  %5245 = vpow2.f32 %v2979_v23 }
 0x388   :  { %10464 = vst [vmem:[#allocation113_spill] sm:$0xff] %v8895_v12  ;;  %v5236_v8 = vpop.eup %5235  ;;  %v2975_v25 = vmul.f32 1.442695, %v10466_v1  ;;  %5247 = vpow2.f32 %v2969_v26  ;;  %v10473_v1 = vld [vmem:[#allocation90_spill] sm:$0xff] }
 0x389   :  { %3183 = vadd.xlane.f32.xlu1 %v5234_v19  ;;  %v5238_v16 = vpop.eup %5237  ;;  %v10470_v19 = vsub.f32 %v10468_v2, %v10469_v44  ;;  %v10474_v12 = vsub.f32 %v10472_v7, %v10473_v1  ;;  %v10478_v7 = vld [vmem:[#allocation13_spill] sm:$0xff] }
 0x38a   :  { %v8900_v22 = vpop.xlane.xlu1 %2715  ;;  %3189 = vadd.xlane.f32.xlu0 %v5236_v8  ;;  %5249 = vpow2.f32 %v2975_v25 }
 0x38b   :  { %v8906_v62 = vadd.f32 %v8687_v50, %v8900_v22  ;;  %v2981_v23 = vmul.f32 1.442695, %v10470_v19  ;;  %v8911_v11 = vpop.xlane.xlu0 %3113  ;;  %v2987_v49 = vmul.f32 1.442695, %v10474_v12  ;;  %v10475_v50 = vld [vmem:[#allocation43_spill] sm:$0xff] }
 0x38c   :  { %10471 = vst [vmem:[#allocation98_spill] sm:$0xff] %v8911_v11  ;;  %v5240_v18 = vpop.eup %5239 }
 0x38d   :  { %3195 = vadd.xlane.f32.xlu1 %v5238_v16  ;;  %5251 = vpow2.f32 %v2981_v23  ;;  %v10476_v16 = vsub.f32 %v10352_v59, %v8536_v47  ;;  %v10481_v47 = vld [vmem:[#allocation14_spill] sm:$0xff]  ;;  %v10482_v59 = vld [vmem:[#allocation7_spill] sm:$0xff] }
 0x38e   :  { %v8916_v61 = vpop.xlane.xlu1 %2711  ;;  %3185 = vadd.xlane.f32.xlu0 %v5240_v18  ;;  %v5242_v2 = vpop.eup %5241  ;;  %5253 = vpow2.f32 %v2987_v49 }
 0x38f   :  { %v8922_v26 = vadd.f32 %v8708_v14, %v8916_v61  ;;  %v2977_v25 = vmul.f32 1.442695, %v10476_v16  ;;  %v8927_v44 = vpop.xlane.xlu0 %2717  ;;  %v5244_v19 = vpop.eup %5243  ;;  %v10479_v14 = vsub.f32 %v10478_v7, %v8546_v17  ;;  %v10483_v16 = vsub.f32 %v10481_v47, %v10482_v59  ;;  %v10485_v17 = vld [vmem:[#allocation19_spill] sm:$0xff]  ;;  %v10489_v47 = vld [vmem:[#allocation12_spill] sm:$0xff] }
 0x390   :  { %v8931_v12 = vadd.f32 %v8719_v42, %v8927_v44  ;;  %v10490_v59 = vld [vmem:[#allocation91_spill] sm:$0xff] }
 0x391   :  { %3191 = vadd.xlane.f32.xlu1 %v5242_v2  ;;  %v2983_v1 = vmul.f32 1.442695, %v10479_v14  ;;  %v5246_v23 = vpop.eup %5245  ;;  %5255 = vpow2.f32 %v2977_v25  ;;  %v2989_v8 = vmul.f32 1.442695, %v10483_v16  ;;  %v10486_v2 = vld [vmem:[#allocation54_spill] sm:$0xff]  ;;  %v10491_v16 = vsub.f32 %v10489_v47, %v10490_v59 }
 0x392   :  { %10477 = vst [vmem:[#allocation77_spill] sm:$0xff] %v8931_v12  ;;  %v8936_v18 = vpop.xlane.xlu1 %3123  ;;  %3197 = vadd.xlane.f32.xlu0 %v5244_v19  ;;  %v5248_v49 = vpop.eup %5247  ;;  %v10487_v7 = vsub.f32 %v10485_v17, %v10486_v2  ;;  %v10495_v2 = vld [vmem:[#allocation40_spill] sm:$0xff]  ;;  %v10498_v59 = vsub.f32 %v10369_v36, %v8603_v33 }
 0x393   :  { %10480 = vst [vmem:[#allocation99_spill] sm:$0xff] %v8936_v18  ;;  %v8941_v11 = vpop.xlane.xlu0 %2713  ;;  %5257 = vpow2.f32 %v2983_v1  ;;  %v2985_v18 = vmul.f32 1.442695, %v10491_v16 }
 0x394   :  { %v8945_v42 = vadd.f32 %v8737_v0, %v8941_v11  ;;  %v2995_v14 = vmul.f32 1.442695, %v10487_v7  ;;  %v5250_v25 = vpop.eup %5249  ;;  %5259 = vpow2.f32 %v2989_v8  ;;  %v3003_v16 = vmul.f32 1.442695, %v10498_v59 }
 0x395   :  { %3203 = vadd.xlane.f32.xlu1 %v5246_v23  ;;  %v10493_v23 = vld [vmem:[#allocation17_spill] sm:$0xff] }
 0x396   :  { %10484 = vst [vmem:[#allocation84_spill] sm:$0xff] %v8945_v42  ;;  %v8950_v19 = vpop.xlane.xlu1 %3119  ;;  %3193 = vadd.xlane.f32.xlu0 %v5248_v49  ;;  %5261 = vpow2.f32 %v2995_v14  ;;  %v10494_v1 = vsub.f32 %v10493_v23, %v8583_v6 }
 0x397   :  { %10488 = vst [vmem:[#allocation33_spill] sm:$0xff] %v8950_v19  ;;  %v8955_v12 = vpop.xlane.xlu0 %3125  ;;  %v5252_v0 = vpop.eup %5251  ;;  %5263 = vpow2.f32 %v2985_v18  ;;  %v10538_v19 = vld [vmem:[#allocation72_spill] sm:$0xff] }
 0x398   :  { %10492 = vst [vmem:[#allocation100_spill] sm:$0xff] %v8955_v12  ;;  %v2991_v42 = vmul.f32 1.442695, %v10494_v1  ;;  %v5254_v7 = vpop.eup %5253 }
 0x399   :  { %3199 = vadd.xlane.f32.xlu1 %v5250_v25  ;;  %v10496_v25 = vsub.f32 %v10365_v58, %v8591_v37  ;;  %v10500_v58 = vld [vmem:[#allocation6_spill] sm:$0xff] }
 0x39a   :  { %v8960_v17 = vpop.xlane.xlu1 %2723  ;;  %3205 = vadd.xlane.f32.xlu0 %v5252_v0  ;;  %5265 = vpow2.f32 %v2991_v42  ;;  %v10501_v1 = vsub.f32 %v10371_v28, %v10500_v58  ;;  %v10505_v28 = vld [vmem:[#allocation52_spill] sm:$0xff] }
 0x39b   :  { %v8966_v8 = vadd.f32 %v8728_v63, %v8960_v17  ;;  %v2997_v14 = vmul.f32 1.442695, %v10496_v25  ;;  %v8971_v47 = vpop.xlane.xlu0 %3121  ;;  %v5256_v6 = vpop.eup %5255  ;;  %v10499_v63 = vld [vmem:[#allocation78_spill] sm:$0xff]  ;;  %v10502_v25 = vld [vmem:[#allocation8_spill] sm:$0xff]  ;;  %v10506_v58 = vsub.f32 %v10376_v45, %v10505_v28 }
 0x39c   :  { %10497 = vst [vmem:[#allocation65_spill] sm:$0xff] %v8971_v47  ;;  %v2993_v42 = vmul.f32 1.442695, %v10501_v1  ;;  %v10511_v45 = vld [vmem:[#allocation20_spill] sm:$0xff]  ;;  %v10512_v28 = vld [vmem:[#allocation58_spill] sm:$0xff] }
 0x39d   :  { %3211 = vadd.xlane.f32.xlu1 %v5254_v7  ;;  %v5258_v37 = vpop.eup %5257  ;;  %5267 = vpow2.f32 %v2997_v14  ;;  %v3005_v1 = vmul.f32 1.442695, %v10506_v58  ;;  %v10513_v58 = vsub.f32 %v10511_v45, %v10512_v28 }
 0x39e   :  { %v8976_v23 = vpop.xlane.xlu1 %2719  ;;  %3201 = vadd.xlane.f32.xlu0 %v5256_v6  ;;  %v5260_v36 = vpop.eup %5259  ;;  %5269 = vpow2.f32 %v3003_v16 }
 0x39f   :  { %v8982_v18 = vadd.f32 %v8748_v4, %v8976_v23  ;;  %v8987_v7 = vpop.xlane.xlu0 %2725  ;;  %v10503_v4 = vsub.f32 %v10373_v27, %v10502_v25  ;;  %5271 = vpow2.f32 %v2993_v42  ;;  %v10507_v27 = vld [vmem:[#allocation27_spill] sm:$0xff]  ;;  %v3001_v49 = vmul.f32 1.442695, %v10513_v58 }
 0x3a0   :  { %v8991_v33 = vadd.f32 %v8757_v10, %v8987_v7  ;;  %v5262_v14 = vpop.eup %5261  ;;  %v10522_v58 = vld [vmem:[#allocation31_spill] sm:$0xff] }
 0x3a1   :  { %3207 = vadd.xlane.f32.xlu1 %v5258_v37  ;;  %v2999_v59 = vmul.f32 1.442695, %v10503_v4  ;;  %v5264_v16 = vpop.eup %5263  ;;  %v10508_v37 = vld [vmem:[#allocation92_spill] sm:$0xff] }
 0x3a2   :  { %v8996_v6 = vpop.xlane.xlu1 %3131  ;;  %3213 = vadd.xlane.f32.xlu0 %v5260_v36  ;;  %v10509_v25 = vsub.f32 %v10507_v27, %v10508_v37  ;;  %v10518_v37 = vld [vmem:[#allocation26_spill] sm:$0xff] }
 0x3a3   :  { %10504 = vst [vmem:[#allocation32_spill] sm:$0xff] %v8996_v6  ;;  %v9001_v0 = vpop.xlane.xlu0 %2721  ;;  %5273 = vpow2.f32 %v2999_v59  ;;  %v10516_v59 = vld [vmem:[#allocation94_spill] sm:$0xff] }
 0x3a4   :  { %v9005_v10 = vadd.f32 %v8779_v40, %v9001_v0  ;;  %v3011_v4 = vmul.f32 1.442695, %v10509_v25  ;;  %v5266_v42 = vpop.eup %5265  ;;  %5275 = vpow2.f32 %v3005_v1  ;;  %v10519_v25 = vld [vmem:[#allocation18_spill] sm:$0xff] }
 0x3a5   :  { %3219 = vadd.xlane.f32.xlu1 %v5262_v14  ;;  %v10515_v14 = vld [vmem:[#allocation25_spill] sm:$0xff]  ;;  %v10520_v45 = vsub.f32 %v10518_v37, %v10519_v25  ;;  %v10526_v37 = vld [vmem:[#allocation56_spill] sm:$0xff] }
 0x3a6   :  { %v9010_v36 = vpop.xlane.xlu1 %3127  ;;  %3209 = vadd.xlane.f32.xlu0 %v5264_v16  ;;  %5277 = vpow2.f32 %v3011_v4  ;;  %v10517_v6 = vsub.f32 %v10515_v14, %v10516_v59 }
 0x3a7   :  { %10510 = vst [vmem:[#allocation47_spill] sm:$0xff] %v9010_v36  ;;  %v9015_v47 = vpop.xlane.xlu0 %3133  ;;  %v5268_v40 = vpop.eup %5267  ;;  %5279 = vpow2.f32 %v3001_v49  ;;  %v3013_v28 = vmul.f32 1.442695, %v10520_v45 }
 0x3a8   :  { %10514 = vst [vmem:[#allocation34_spill] sm:$0xff] %v9015_v47  ;;  %v3007_v12 = vmul.f32 1.442695, %v10517_v6  ;;  %v5270_v1 = vpop.eup %5269  ;;  %v10523_v6 = vld [vmem:[#allocation93_spill] sm:$0xff] }
 0x3a9   :  { %3215 = vadd.xlane.f32.xlu1 %v5266_v42  ;;  %v5272_v4 = vpop.eup %5271  ;;  %v10524_v14 = vsub.f32 %v10522_v58, %v10523_v6  ;;  %v10528_v6 = vld [vmem:[#allocation29_spill] sm:$0xff] }
 0x3aa   :  { %v9020_v27 = vpop.xlane.xlu1 %2731  ;;  %3221 = vadd.xlane.f32.xlu0 %v5268_v40  ;;  %5281 = vpow2.f32 %v3007_v12  ;;  %v10525_v40 = vld [vmem:[#allocation24_spill] sm:$0xff] }
 0x3ab   :  { %v9024_v16 = vadd.f32 %v8768_v15, %v9020_v27  ;;  %v9029_v42 = vpop.xlane.xlu0 %3129  ;;  %v3019_v59 = vmul.f32 1.442695, %v10524_v14  ;;  %5283 = vpow2.f32 %v3013_v28  ;;  %v10527_v25 = vsub.f32 %v10525_v40, %v10526_v37  ;;  %v10530_v37 = vld [vmem:[#allocation30_spill] sm:$0xff] }
 0x3ac   :  { %10521 = vst [vmem:[#allocation73_spill] sm:$0xff] %v9029_v42 }
 0x3ad   :  { %3227 = vadd.xlane.f32.xlu1 %v5270_v1  ;;  %v5274_v49 = vpop.eup %5273  ;;  %v3009_v45 = vmul.f32 1.442695, %v10527_v25  ;;  %5285 = vpow2.f32 %v3019_v59  ;;  %v10531_v25 = vld [vmem:[#allocation23_spill] sm:$0xff] }
 0x3ae   :  { %v9034_v47 = vpop.xlane.xlu1 %2727  ;;  %3217 = vadd.xlane.f32.xlu0 %v5272_v4  ;;  %v5276_v58 = vpop.eup %5275  ;;  %v10532_v42 = vsub.f32 %v10530_v37, %v10531_v25 }
 0x3af   :  { %v9038_v15 = vadd.f32 %v8791_v3, %v9034_v47  ;;  %v9043_v1 = vpop.xlane.xlu0 %2733  ;;  %v10529_v3 = vsub.f32 %v10528_v6, %v8702_v24  ;;  %5287 = vpow2.f32 %v3009_v45  ;;  %v10534_v6 = vld [vmem:[#allocation21_spill] sm:$0xff] }
 0x3b0   :  { %v9047_v12 = vadd.f32 %v8802_v55, %v9043_v1  ;;  %v5278_v40 = vpop.eup %5277  ;;  %v3021_v36 = vmul.f32 1.442695, %v10532_v42  ;;  %v10536_v42 = vld [vmem:[#allocation95_spill] sm:$0xff] }
 0x3b1   :  { %3223 = vadd.xlane.f32.xlu1 %v5274_v49  ;;  %v3015_v14 = vmul.f32 1.442695, %v10529_v3  ;;  %v5280_v24 = vpop.eup %5279  ;;  %v10533_v49 = vld [vmem:[#allocation28_spill] sm:$0xff]  ;;  %v10537_v37 = vsub.f32 %v10417_v53, %v10536_v42  ;;  %v10543_v42 = vld [vmem:[#allocation22_spill] sm:$0xff] }
 0x3b2   :  { %v3140_v4 = vpop.xlane.xlu1 %3139  ;;  %3229 = vadd.xlane.f32.xlu0 %v5276_v58 }
 0x3b3   :  { %v9053_v28 = vmul.f32 %v3140_v4, %v8808_v31  ;;  %v9058_v55 = vpop.xlane.xlu0 %2729  ;;  %5289 = vpow2.f32 %v3015_v14  ;;  %v10535_v31 = vsub.f32 %v10533_v49, %v10534_v6  ;;  %v3029_v25 = vmul.f32 1.442695, %v10537_v37  ;;  %v10539_v49 = vld [vmem:[#allocation16_spill] sm:$0xff] }
 0x3b4   :  { %v9062_v59 = vadd.f32 %v8820_v57, %v9058_v55  ;;  %v5282_v4 = vpop.eup %5281  ;;  %5291 = vpow2.f32 %v3021_v36  ;;  %v10540_v6 = vsub.f32 %v10538_v19, %v10539_v49 }
 0x3b5   :  { %3235 = vadd.xlane.f32.xlu1 %v5278_v40  ;;  %v3017_v3 = vmul.f32 1.442695, %v10535_v31  ;;  %v5284_v14 = vpop.eup %5283 }
 0x3b6   :  { %v3136_v58 = vpop.xlane.xlu1 %3135  ;;  %3225 = vadd.xlane.f32.xlu0 %v5280_v24  ;;  %v3027_v31 = vmul.f32 1.442695, %v10540_v6 }
 0x3b7   :  { %v9068_v45 = vmul.f32 %v3136_v58, %v8825_v30  ;;  %v3142_v57 = vpop.xlane.xlu0 %3141  ;;  %5293 = vpow2.f32 %v3017_v3  ;;  %v5286_v53 = vpop.eup %5285  ;;  %v10542_v3 = vld [vmem:[#allocation35_spill] sm:$0xff] }
 0x3b8   :  { %v9074_v40 = vmul.f32 %v3142_v57, %v8831_v41  ;;  %5295 = vpow2.f32 %v3029_v25  ;;  %v10541_v41 = vsub.f32 %v10424_v39, %v8770_v56  ;;  %v10544_v37 = vsub.f32 %v10542_v3, %v10543_v42 }
 0x3b9   :  { %3231 = vadd.xlane.f32.xlu1 %v5282_v4  ;;  %v5288_v19 = vpop.eup %5287  ;;  %5297 = vpow2.f32 %v3027_v31  ;;  %v10545_v39 = vsub.f32 %v10428_v29, %v8793_v20  ;;  %v10547_v29 = vsub.f32 %v10432_v60, %v8811_v54  ;;  %v10549_v60 = vld [vmem:[#allocation75_spill] sm:$0xff] }
 0x3ba   :  { %v9079_v30 = vpop.xlane.xlu1 %2739  ;;  %3237 = vadd.xlane.f32.xlu0 %v5284_v14  ;;  %v3025_v24 = vmul.f32 1.442695, %v10541_v41  ;;  %v3023_v57 = vmul.f32 1.442695, %v10544_v37  ;;  %v10550_v54 = vld [vmem:[#allocation83_spill] sm:$0xff] }
 0x3bb   :  { %v9083_v36 = vadd.f32 %v8842_v21, %v9079_v30  ;;  %v3138_v58 = vpop.xlane.xlu0 %3137  ;;  %v10551_v37 = vsub.f32 %v10549_v60, %v10550_v54 }
 0x3bc   :  { %v9089_v4 = vmul.f32 %v3138_v58, %v8847_v52  ;;  %5299 = vpow2.f32 %v3025_v24  ;;  %v3037_v52 = vmul.f32 1.442695, %v10545_v39 }
 0x3bd   :  { %3243 = vadd.xlane.f32.xlu1 %v5286_v53  ;;  %v5290_v56 = vpop.eup %5289  ;;  %5301 = vpow2.f32 %v3023_v57  ;;  %v3043_v57 = vmul.f32 1.442695, %v10551_v37 }
 0x3be   :  { %v9094_v21 = vpop.xlane.xlu1 %2735  ;;  %3233 = vadd.xlane.f32.xlu0 %v5288_v19  ;;  %v5292_v6 = vpop.eup %5291  ;;  %5303 = vpow2.f32 %v3037_v52 }
 0x3bf   :  { %v9098_v25 = vadd.f32 %v8858_v35, %v9094_v21  ;;  %v9103_v14 = vpop.xlane.xlu0 %2741  ;;  %v10546_v35 = vsub.f32 %v10421_v38, %v8762_v5  ;;  %v10548_v5 = vsub.f32 %v10426_v46, %v8785_v13  ;;  %v10552_v13 = vld [vmem:[#allocation96_spill] sm:$0xff] }
 0x3c0   :  { %v9107_v49 = vadd.f32 %v8869_v34, %v9103_v14  ;;  %v3033_v34 = vmul.f32 1.442695, %v10547_v29  ;;  %v10553_v46 = vsub.f32 %v10447_v43, %v10552_v13  ;;  %v10555_v29 = vld [vmem:[#allocation38_spill] sm:$0xff] }
 0x3c1   :  { %3239 = vadd.xlane.f32.xlu1 %v5290_v56  ;;  %v3035_v31 = vmul.f32 1.442695, %v10546_v35  ;;  %v5294_v20 = vpop.eup %5293  ;;  %v3031_v19 = vmul.f32 1.442695, %v10548_v5 }
 0x3c2   :  { %v9112_v53 = vpop.xlane.xlu1 %3843  ;;  %3245 = vadd.xlane.f32.xlu0 %v5292_v6  ;;  %v5296_v38 = vpop.eup %5295  ;;  %v3039_v52 = vmul.f32 1.442695, %v10553_v46  ;;  %v10554_v6 = vld [vmem:[#allocation41_spill] sm:$0xff] }
 0x3c3   :  { %v9119_v24 = vpop.xlane.xlu0 %2737  ;;  %5305 = vpow2.f32 %v3035_v31  ;;  %v5298_v42 = vpop.eup %5297  ;;  %v2854_v35 = vsub.f32 %v10554_v6, %v8927_v44  ;;  %v10557_v44 = vld [vmem:[#allocation42_spill] sm:$0xff] }
 0x3c4   :  { %v9123_v58 = vadd.f32 %v8885_v48, %v9119_v24  ;;  %5307 = vpow2.f32 %v3033_v34  ;;  %v10556_v34 = vsub.f32 %v10555_v29, %v8863_v32  ;;  %v2852_v60 = vsub.f32 %v10557_v44, %v8941_v11  ;;  %v10560_v11 = vld [vmem:[#allocation79_spill] sm:$0xff] }
 0x3c5   :  { %3241 = vadd.xlane.f32.xlu1 %v5294_v20  ;;  %5309 = vpow2.f32 %v3031_v19 }
 0x3c6   :  { %v9128_v3 = vpop.xlane.xlu1 %3147  ;;  %3253 = vadd.xlane.f32.xlu0 %v5296_v38  ;;  %v5300_v39 = vpop.eup %5299  ;;  %5311 = vpow2.f32 %v3043_v57  ;;  %v3045_v38 = vmul.f32 1.442695, %v10556_v34  ;;  %v10558_v57 = vld [vmem:[#allocation115_spill] sm:$0xff]  ;;  %v3049_v6 = vmul.f32 1.442695, %v2852_v60 }
 0x3c7   :  { %v9133_v56 = vpop.xlane.xlu0 %3839  ;;  %v5302_v20 = vpop.eup %5301  ;;  %5313 = vpow2.f32 %v3039_v52 }
 0x3c8   :  { %v5304_v43 = vpop.eup %5303  ;;  %5315 = vpow2.f32 %v3045_v38 }
 0x3c9   :  { %3251 = vadd.xlane.f32.xlu1 %v5298_v42  ;;  %v3053_v42 = vmul.f32 1.442695, %v2854_v35  ;;  %v2858_v35 = vsub.f32 %v10560_v11, %v8987_v7  ;;  %v10562_v7 = vld [vmem:[#allocation44_spill] sm:$0xff] }
 0x3ca   :  { %v9142_v31 = vpop.xlane.xlu1 %3143  ;;  %3249 = vadd.xlane.f32.xlu0 %v5300_v39  ;;  %v10559_v39 = vsub.f32 %v10458_v9, %v10558_v57  ;;  %v10561_v9 = vsub.f32 %v10467_v51, %v8900_v22  ;;  %v2856_v60 = vsub.f32 %v10562_v7, %v9001_v0  ;;  %v10564_v22 = vsub.f32 %v10475_v50, %v8916_v61 }
 0x3cb   :  { %v9147_v5 = vpop.xlane.xlu0 %3845  ;;  %5317 = vpow2.f32 %v3053_v42  ;;  %v3061_v44 = vmul.f32 1.442695, %v2858_v35  ;;  %v10567_v50 = vsub.f32 %v10495_v2, %v8960_v17  ;;  %v10570_v17 = vsub.f32 %v10499_v63, %v8976_v23 }
 0x3cc   :  { %v3041_v13 = vmul.f32 1.442695, %v10559_v39  ;;  %v3051_v38 = vmul.f32 1.442695, %v10561_v9  ;;  %v3047_v51 = vmul.f32 1.442695, %v10564_v22 }
 0x3cd   :  { %3247 = vadd.xlane.f32.xlu1 %v5302_v20  ;;  %v5306_v32 = vpop.eup %5305  ;;  %v3059_v9 = vmul.f32 1.442695, %v10567_v50  ;;  %v3055_v2 = vmul.f32 1.442695, %v10570_v17 }
 0x3ce   :  { %v9153_v54 = vpop.xlane.xlu1 %3841  ;;  %3261 = vadd.xlane.f32.xlu0 %v5304_v43  ;;  %v5308_v52 = vpop.eup %5307  ;;  %5319 = vpow2.f32 %v3041_v13  ;;  %v10565_v13 = vld [vmem:[#allocation77_spill] sm:$0xff] }
 0x3cf   :  { %v9160_v46 = vpop.xlane.xlu0 %3149  ;;  %v5310_v34 = vpop.eup %5309  ;;  %5321 = vpow2.f32 %v3049_v6  ;;  %v3057_v6 = vmul.f32 1.442695, %v2856_v60  ;;  %v10569_v60 = vld [vmem:[#allocation48_spill] sm:$0xff] }
 0x3d0   :  { %v5312_v42 = vpop.eup %5311  ;;  %5323 = vpow2.f32 %v3051_v38 }
 0x3d1   :  { %3259 = vadd.xlane.f32.xlu1 %v5306_v32  ;;  %v5314_v57 = vpop.eup %5313  ;;  %5325 = vpow2.f32 %v3061_v44 }
 0x3d2   :  { %v9164_v20 = vpop.xlane.xlu1 %2747  ;;  %3257 = vadd.xlane.f32.xlu0 %v5308_v52  ;;  %v5316_v0 = vpop.eup %5315  ;;  %5327 = vpow2.f32 %v3047_v51 }
 0x3d3   :  { %v9168_v29 = vadd.f32 %v8906_v62, %v9164_v20  ;;  %v9173_v43 = vpop.xlane.xlu0 %3145  ;;  %5329 = vpow2.f32 %v3057_v6 }
 0x3d4   :  { %5331 = vpow2.f32 %v3059_v9 }
 0x3d5   :  { %3255 = vadd.xlane.f32.xlu1 %v5310_v34  ;;  %v5318_v61 = vpop.eup %5317 }
 0x3d6   :  { %v9177_v32 = vpop.xlane.xlu1 %2743  ;;  %3267 = vadd.xlane.f32.xlu0 %v5312_v42  ;;  %v10568_v42 = vld [vmem:[#allocation84_spill] sm:$0xff] }
 0x3d7   :  { %v9181_v62 = vadd.f32 %v8922_v26, %v9177_v32  ;;  %v9186_v39 = vpop.xlane.xlu0 %2749  ;;  %v10566_v26 = vld [vmem:[#allocation51_spill] sm:$0xff] }
 0x3d8   :  { %v9190_v52 = vadd.f32 %v10565_v13, %v9186_v39  ;;  %v2861_v11 = vsub.f32 %v10566_v26, %v9020_v27  ;;  %v5320_v27 = vpop.eup %5319  ;;  %v10571_v13 = vld [vmem:[#allocation49_spill] sm:$0xff] }
 0x3d9   :  { %10563 = vst [vmem:[#allocation74_spill] sm:$0xff] %v9181_v62  ;;  %3263 = vadd.xlane.f32.xlu1 %v5314_v57  ;;  %v2862_v57 = vsub.f32 %v10569_v60, %v9043_v1  ;;  %v5322_v51 = vpop.eup %5321 }
 0x3da   :  { %v9194_v35 = vpop.xlane.xlu1 %3851  ;;  %3269 = vadd.xlane.f32.xlu0 %v5316_v0  ;;  %v3067_v7 = vmul.f32 1.442695, %v2861_v11  ;;  %v2859_v0 = vsub.f32 %v10571_v13, %v9034_v47  ;;  %v5324_v11 = vpop.eup %5323 }
 0x3db   :  { %v9201_v38 = vpop.xlane.xlu0 %2745  ;;  %v3069_v1 = vmul.f32 1.442695, %v2862_v57  ;;  %v5326_v63 = vpop.eup %5325 }
 0x3dc   :  { %v9205_v44 = vadd.f32 %v10568_v42, %v9201_v38  ;;  %5333 = vpow2.f32 %v3067_v7  ;;  %v3063_v47 = vmul.f32 1.442695, %v2859_v0  ;;  %v10573_v42 = vld [vmem:[#allocation57_spill] sm:$0xff]  ;;  %v5328_v7 = vpop.eup %5327 }
 0x3dd   :  { %3277 = vadd.xlane.f32.xlu1 %v5318_v61  ;;  %v10572_v61 = vld [vmem:[#allocation53_spill] sm:$0xff]  ;;  %5335 = vpow2.f32 %v3055_v2  ;;  %v5330_v13 = vpop.eup %5329  ;;  %v10575_v2 = vld [vmem:[#allocation82_spill] sm:$0xff] }
 0x3de   :  { %v9209_v22 = vpop.xlane.xlu1 %3155  ;;  %3265 = vadd.xlane.f32.xlu0 %v5320_v27  ;;  %v2860_v50 = vsub.f32 %v10572_v61, %v9058_v55  ;;  %v2866_v27 = vsub.f32 %v10573_v42, %v9103_v14  ;;  %5337 = vpow2.f32 %v3069_v1  ;;  %v10574_v55 = vld [vmem:[#allocation81_spill] sm:$0xff]  ;;  %v2864_v0 = vsub.f32 %v10575_v2, %v9119_v24  ;;  %v5332_v1 = vpop.eup %5331 }
 0x3df   :  { %v9216_v26 = vpop.xlane.xlu0 %3853  ;;  %5339 = vpow2.f32 %v3063_v47 }
 0x3e0   :  { %v3065_v57 = vmul.f32 1.442695, %v2860_v50  ;;  %v3073_v24 = vmul.f32 1.442695, %v2864_v0  ;;  %v10581_v0 = vld [vmem:[#allocation114_spill] sm:$0xff] }
 0x3e1   :  { %3273 = vadd.xlane.f32.xlu1 %v5322_v51  ;;  %v2865_v51 = vsub.f32 %v10574_v55, %v9079_v30  ;;  %v10576_v30 = vld [vmem:[#allocation59_spill] sm:$0xff] }
 0x3e2   :  { %v9222_v9 = vpop.xlane.xlu1 %3847  ;;  %3275 = vadd.xlane.f32.xlu0 %v5324_v11  ;;  %v3077_v11 = vmul.f32 1.442695, %v2866_v27  ;;  %5341 = vpow2.f32 %v3065_v57 }
 0x3e3   :  { %v9228_v60 = vpop.xlane.xlu0 %3157  ;;  %v3075_v50 = vmul.f32 1.442695, %v2865_v51  ;;  %v10579_v51 = vld [vmem:[#allocation63_spill] sm:$0xff] }
 0x3e4   :  { %5343 = vpow2.f32 %v3077_v11 }
 0x3e5   :  { %3285 = vadd.xlane.f32.xlu1 %v5326_v63  ;;  %v2863_v63 = vsub.f32 %v10576_v30, %v9094_v21  ;;  %5345 = vpow2.f32 %v3075_v50  ;;  %v2869_v21 = vsub.f32 %v10579_v51, %v9164_v20  ;;  %v10583_v20 = vld [vmem:[#allocation61_spill] sm:$0xff] }
 0x3e6   :  { %v9232_v17 = vpop.xlane.xlu1 %3151  ;;  %3271 = vadd.xlane.f32.xlu0 %v5328_v7  ;;  %v5334_v27 = vpop.eup %5333  ;;  %v10578_v7 = vld [vmem:[#allocation62_spill] sm:$0xff]  ;;  %5347 = vpow2.f32 %v3073_v24  ;;  %v2867_v51 = vsub.f32 %v10583_v20, %v9177_v32 }
 0x3e7   :  { %v9236_v61 = vpop.xlane.xlu0 %3849  ;;  %v2870_v55 = vsub.f32 %v10578_v7, %v9186_v39  ;;  %v3071_v57 = vmul.f32 1.442695, %v2863_v63  ;;  %v2868_v39 = vsub.f32 %v10581_v0, %v9201_v38  ;;  %v3083_v63 = vmul.f32 1.442695, %v2869_v21  ;;  %v10586_v21 = vld [vmem:[#allocation67_spill] sm:$0xff] }
 0x3e9   :  { %3281 = vadd.xlane.f32.xlu1 %v5330_v13  ;;  %v5336_v13 = vpop.eup %5335  ;;  %v3085_v11 = vmul.f32 1.442695, %v2870_v55  ;;  %5349 = vpow2.f32 %v3071_v57  ;;  %v3081_v24 = vmul.f32 1.442695, %v2868_v39  ;;  %v10584_v55 = vld [vmem:[#allocation66_spill] sm:$0xff] }
 0x3ea   :  { %v2756_v42 = vpop.xlane.xlu1 %2755  ;;  %3283 = vadd.xlane.f32.xlu0 %v5332_v1  ;;  %v3079_v57 = vmul.f32 1.442695, %v2867_v51 }
 0x3eb   :  { %v9243_v47 = vadd.f32 %v8966_v8, %v2756_v42  ;;  %v9247_v2 = vpop.xlane.xlu0 %3153  ;;  %v5338_v8 = vpop.eup %5337  ;;  %5351 = vpow2.f32 %v3085_v11  ;;  %v2873_v0 = vsub.f32 %v10586_v21, %v2756_v42  ;;  %v10587_v11 = vld [vmem:[#allocation85_spill] sm:$0xff]  ;;  %v10590_v21 = vld [vmem:[#allocation103_spill] sm:$0xff] }
 0x3ec   :  { %v5340_v50 = vpop.eup %5339  ;;  %5353 = vpow2.f32 %v3083_v63 }
 0x3ed   :  { %10577 = vst [vmem:[#allocation102_spill] sm:$0xff] %v9243_v47  ;;  %3291 = vadd.xlane.f32.xlu1 %v5334_v27  ;;  %5355 = vpow2.f32 %v3081_v24 }
 0x3ee   :  { %v2752_v30 = vpop.xlane.xlu1 %2751  ;;  %3279 = vadd.xlane.f32.xlu0 %v5336_v13  ;;  %v5342_v13 = vpop.eup %5341  ;;  %5357 = vpow2.f32 %v3079_v57 }
 0x3ef   :  { %v9252_v1 = vadd.f32 %v8982_v18, %v2752_v30  ;;  %v2758_v7 = vpop.xlane.xlu0 %2757 }
 0x3f0   :  { %v9257_v27 = vadd.f32 %v8991_v33, %v2758_v7  ;;  %v2874_v23 = vsub.f32 %v10584_v55, %v2758_v7  ;;  %v5344_v33 = vpop.eup %5343 }
 0x3f1   :  { %10580 = vst [vmem:[#allocation39_spill] sm:$0xff] %v9252_v1  ;;  %3293 = vadd.xlane.f32.xlu1 %v5338_v8  ;;  %v5346_v32 = vpop.eup %5345 }
 0x3f2   :  { %10582 = vst [vmem:[#allocation107_spill] sm:$0xff] %v9257_v27  ;;  %v9261_v18 = vpop.xlane.xlu1 %3163  ;;  %3287 = vadd.xlane.f32.xlu0 %v5340_v50  ;;  %v3093_v50 = vmul.f32 1.442695, %v2874_v23  ;;  %v5348_v7 = vpop.eup %5347 }
 0x3f3   :  { %v2754_v38 = vpop.xlane.xlu0 %2753  ;;  %v5350_v42 = vpop.eup %5349 }
 0x3f4   :  { %v9265_v8 = vadd.f32 %v9005_v10, %v2754_v38  ;;  %v2872_v39 = vsub.f32 %v10587_v11, %v2754_v38  ;;  %v3091_v10 = vmul.f32 1.442695, %v2873_v0  ;;  %5359 = vpow2.f32 %v3093_v50  ;;  %v10591_v0 = vld [vmem:[#allocation71_spill] sm:$0xff] }
 0x3f5   :  { %3289 = vadd.xlane.f32.xlu1 %v5342_v13  ;;  %v10588_v13 = vld [vmem:[#allocation64_spill] sm:$0xff]  ;;  %v5352_v23 = vpop.eup %5351 }
 0x3f6   :  { %10585 = vst [vmem:[#allocation108_spill] sm:$0xff] %v9265_v8  ;;  %v9268_v14 = vpop.xlane.xlu1 %3159  ;;  %3301 = vadd.xlane.f32.xlu0 %v5344_v33  ;;  %v2871_v55 = vsub.f32 %v10588_v13, %v2752_v30  ;;  %v3089_v33 = vmul.f32 1.442695, %v2872_v39  ;;  %5361 = vpow2.f32 %v3091_v10  ;;  %v10593_v39 = vld [vmem:[#allocation87_spill] sm:$0xff] }
 0x3f7   :  { %v9271_v20 = vpop.xlane.xlu0 %3165 }
 0x3f8   :  { %v3087_v38 = vmul.f32 1.442695, %v2871_v55  ;;  %5363 = vpow2.f32 %v3089_v33 }
 0x3f9   :  { %3299 = vadd.xlane.f32.xlu1 %v5346_v32 }
 0x3fa   :  { %v2764_v63 = vpop.xlane.xlu1 %2763  ;;  %3297 = vadd.xlane.f32.xlu0 %v5348_v7  ;;  %5365 = vpow2.f32 %v3087_v38 }
 0x3fb   :  { %v9275_v51 = vadd.f32 %v9024_v16, %v2764_v63  ;;  %v9277_v24 = vpop.xlane.xlu0 %3161  ;;  %v2877_v32 = vsub.f32 %v10590_v21, %v2764_v63  ;;  %v5354_v16 = vpop.eup %5353 }
 0x3fc   :  { %v5356_v10 = vpop.eup %5355 }
 0x3fd   :  { %10589 = vst [vmem:[#allocation106_spill] sm:$0xff] %v9275_v51  ;;  %3295 = vadd.xlane.f32.xlu1 %v5350_v42  ;;  %v3099_v55 = vmul.f32 1.442695, %v2877_v32 }
 0x3fe   :  { %v2760_v57 = vpop.xlane.xlu1 %2759  ;;  %3309 = vadd.xlane.f32.xlu0 %v5352_v23 }
 0x3ff   :  { %v2875_v11 = vsub.f32 %v10591_v0, %v2760_v57  ;;  %v9282_v30 = vadd.f32 %v9038_v15, %v2760_v57  ;;  %v2766_v7 = vpop.xlane.xlu0 %2765  ;;  %v5358_v15 = vpop.eup %5357  ;;  %v10595_v57 = vld [vmem:[#allocation69_spill] sm:$0xff] }
 0x400   :  { %v2878_v13 = vsub.f32 %v10593_v39, %v2766_v7  ;;  %v9286_v42 = vadd.f32 %v9047_v12, %v2766_v7  ;;  %v5360_v12 = vpop.eup %5359 }
 0x401   :  { %10592 = vst [vmem:[#allocation80_spill] sm:$0xff] %v9282_v30  ;;  %v3095_v50 = vmul.f32 1.442695, %v2875_v11  ;;  %3307 = vadd.xlane.f32.xlu1 %v5354_v16  ;;  %v5362_v32 = vpop.eup %5361 }
 0x402   :  { %10594 = vst [vmem:[#allocation111_spill] sm:$0xff] %v9286_v42  ;;  %v3172_v63 = vpop.xlane.xlu1 %3171  ;;  %3305 = vadd.xlane.f32.xlu0 %v5356_v10  ;;  %v3101_v23 = vmul.f32 1.442695, %v2878_v13 }
 0x403   :  { %5367 = vpow2.f32 %v3095_v50  ;;  %v9289_v21 = vmul.f32 %v9053_v28, %v3172_v63  ;;  %v2762_v33 = vpop.xlane.xlu0 %2761  ;;  %v10597_v50 = vld [vmem:[#allocation60_spill] sm:$0xff] }
 0x404   :  { %v2876_v0 = vsub.f32 %v10595_v57, %v2762_v33  ;;  %v9293_v11 = vadd.f32 %v9062_v59, %v2762_v33  ;;  %5369 = vpow2.f32 %v3099_v55  ;;  %v3429_v39 = vmul.f32 %v9128_v3, %v10597_v50  ;;  %v5364_v59 = vpop.eup %5363  ;;  %v10598_v33 = vld [vmem:[#allocation97_spill] sm:$0xff] }
 0x405   :  { %3303 = vadd.xlane.f32.xlu1 %v5358_v15  ;;  %5371 = vpow2.f32 %v3101_v23  ;;  %v5366_v55 = vpop.eup %5365  ;;  %v3427_v23 = vmul.f32 %v9142_v31, %v10598_v33 }
 0x406   :  { %10596 = vst [vmem:[#allocation88_spill] sm:$0xff] %v9293_v11  ;;  %v3168_v16 = vpop.xlane.xlu1 %3167  ;;  %3317 = vadd.xlane.f32.xlu0 %v5360_v12  ;;  %v3097_v28 = vmul.f32 1.442695, %v2876_v0  ;;  %v10599_v0 = vld [vmem:[#allocation113_spill] sm:$0xff] }
 0x407   :  { %v9296_v38 = vmul.f32 %v9068_v45, %v3168_v16  ;;  %v3174_v7 = vpop.xlane.xlu0 %3173 }
 0x408   :  { %v9301_v13 = vmul.f32 %v9074_v40, %v3174_v7  ;;  %5373 = vpow2.f32 %v3097_v28  ;;  %v3430_v40 = vmul.f32 %v9160_v46, %v10599_v0  ;;  %v10600_v7 = vld [vmem:[#allocation99_spill] sm:$0xff]  ;;  %v10604_v0 = vld [vmem:[#allocation100_spill] sm:$0xff] }
 0x409   :  { %3315 = vadd.xlane.f32.xlu1 %v5362_v32  ;;  %v3433_v50 = vmul.f32 %v9209_v22, %v10600_v7  ;;  %v3434_v22 = vmul.f32 %v9228_v60, %v10604_v0 }
 0x40a   :  { %v3180_v10 = vpop.xlane.xlu1 %3179  ;;  %3313 = vadd.xlane.f32.xlu0 %v5364_v59 }
 0x40b   :  { %v9303_v63 = vmul.f32 %v3429_v39, %v3180_v10  ;;  %v3170_v45 = vpop.xlane.xlu0 %3169  ;;  %v10601_v10 = vld [vmem:[#allocation98_spill] sm:$0xff] }
 0x40c   :  { %v3504_v57 = vmul.f32 %v9089_v4, %v3170_v45  ;;  %v3428_v31 = vmul.f32 %v9173_v43, %v10601_v10  ;;  %v10602_v45 = vld [vmem:[#allocation33_spill] sm:$0xff] }
 0x40d   :  { %v5368_v15 = vpop.eup %5367  ;;  %3311 = vadd.xlane.f32.xlu1 %v5366_v55  ;;  %v3431_v46 = vmul.f32 %v9232_v17, %v10602_v45  ;;  %v10609_v45 = vld [vmem:[#allocation47_spill] sm:$0xff] }
 0x40e   :  { %v3176_v3 = vpop.xlane.xlu1 %3175  ;;  %3319 = vadd.xlane.f32.xlu0 %v5368_v15  ;;  %v5370_v16 = vpop.eup %5369  ;;  %v10603_v15 = vld [vmem:[#allocation86_spill] sm:$0xff]  ;;  %v3435_v60 = vmul.f32 %v9268_v14, %v10609_v45  ;;  %v10616_v45 = vld [vmem:[#allocation104_spill] sm:$0xff] }
 0x40f   :  { %v3507_v12 = vmul.f32 %v3427_v23, %v3176_v3  ;;  %v3182_v32 = vpop.xlane.xlu0 %3181  ;;  %v5372_v39 = vpop.eup %5371 }
 0x410   :  { %v3510_v28 = vmul.f32 %v3430_v40, %v3182_v32  ;;  %v10605_v32 = vld [vmem:[#allocation32_spill] sm:$0xff] }
 0x411   :  { %3323 = vadd.xlane.f32.xlu1 %v5370_v16  ;;  %v3437_v43 = vmul.f32 %v9261_v18, %v10605_v32 }
 0x412   :  { %v3188_v59 = vpop.xlane.xlu1 %3187  ;;  %3325 = vadd.xlane.f32.xlu0 %v5372_v39  ;;  %v5374_v23 = vpop.eup %5373 }
 0x413   :  { %v3513_v4 = vmul.f32 %v3433_v50, %v3188_v59  ;;  %v3178_v55 = vpop.xlane.xlu0 %3177  ;;  %v10606_v50 = vld [vmem:[#allocation46_spill] sm:$0xff]  ;;  %v10607_v59 = vld [vmem:[#allocation65_spill] sm:$0xff] }
 0x414   :  { %v3508_v33 = vmul.f32 %v3428_v31, %v3178_v55  ;;  %v3432_v17 = vmul.f32 %v9247_v2, %v10607_v59  ;;  %v10608_v31 = vld [vmem:[#allocation45_spill] sm:$0xff]  ;;  %v10613_v2 = vld [vmem:[#allocation70_spill] sm:$0xff] }
 0x415   :  { %3855 = vadd.xlane.f32.xlu1 %v10603_v15  ;;  %v10610_v15 = vld [vmem:[#allocation68_spill] sm:$0xff]  ;;  %v10615_v59 = vld [vmem:[#allocation105_spill] sm:$0xff] }
 0x416   :  { %v3184_v3 = vpop.xlane.xlu1 %3183  ;;  %3321 = vadd.xlane.f32.xlu0 %v5374_v23 }
 0x417   :  { %v3511_v40 = vmul.f32 %v3431_v46, %v3184_v3  ;;  %v3190_v16 = vpop.xlane.xlu0 %3189  ;;  %v10611_v3 = vld [vmem:[#allocation34_spill] sm:$0xff] }
 0x418   :  { %v3514_v7 = vmul.f32 %v3434_v22, %v3190_v16  ;;  %v3438_v18 = vmul.f32 %v9271_v20, %v10611_v3  ;;  %v10612_v22 = vld [vmem:[#allocation101_spill] sm:$0xff] }
 0x419   :  { %3859 = vadd.xlane.f32.xlu1 %v10606_v50  ;;  %v10614_v50 = vld [vmem:[#allocation73_spill] sm:$0xff] }
 0x41a   :  { %v3196_v39 = vpop.xlane.xlu1 %3195  ;;  %3857 = vadd.xlane.f32.xlu0 %v10608_v31 }
 0x41b   :  { %v3517_v10 = vmul.f32 %v3437_v43, %v3196_v39  ;;  %v3186_v55 = vpop.xlane.xlu0 %3185  ;;  %v3436_v39 = vmul.f32 %v9277_v24, %v10614_v50 }
 0x41c   :  { %v3512_v46 = vmul.f32 %v3432_v17, %v3186_v55 }
 0x41d   :  { %3863 = vadd.xlane.f32.xlu1 %v10610_v15 }
 0x41e   :  { %v3192_v23 = vpop.xlane.xlu1 %3191  ;;  %3861 = vadd.xlane.f32.xlu0 %v10612_v22 }
 0x41f   :  { %v3515_v0 = vmul.f32 %v3435_v60, %v3192_v23  ;;  %v3198_v16 = vpop.xlane.xlu0 %3197 }
 0x420   :  { %v3518_v32 = vmul.f32 %v3438_v18, %v3198_v16 }
 0x421   :  { %3867 = vadd.xlane.f32.xlu1 %v10613_v2 }
 0x422   :  { %v3204_v43 = vpop.xlane.xlu1 %3203  ;;  %3865 = vadd.xlane.f32.xlu0 %v10615_v59 }
 0x423   :  { %v3585_v14 = vmul.f32 %v9289_v21, %v3204_v43  ;;  %v3194_v17 = vpop.xlane.xlu0 %3193 }
 0x424   :  { %v3516_v31 = vmul.f32 %v3436_v39, %v3194_v17 }
 0x426   :  { %v3200_v55 = vpop.xlane.xlu1 %3199  ;;  %3869 = vadd.xlane.f32.xlu0 %v10616_v45 }
 0x427   :  { %v3583_v20 = vmul.f32 %v9296_v38, %v3200_v55  ;;  %v3206_v60 = vpop.xlane.xlu0 %3205 }
 0x428   :  { %v3586_v15 = vmul.f32 %v9301_v13, %v3206_v60 }
 0x42a   :  { %v3212_v23 = vpop.xlane.xlu1 %3211 }
 0x42b   :  { %v3589_v3 = vmul.f32 %v9303_v63, %v3212_v23  ;;  %v3202_v18 = vpop.xlane.xlu0 %3201 }
 0x42c   :  { %v3584_v22 = vmul.f32 %v3504_v57, %v3202_v18 }
 0x42e   :  { %v3208_v24 = vpop.xlane.xlu1 %3207 }
 0x42f   :  { %v3587_v16 = vmul.f32 %v3507_v12, %v3208_v24  ;;  %v3214_v21 = vpop.xlane.xlu0 %3213 }
 0x430   :  { %v3590_v2 = vmul.f32 %v3510_v28, %v3214_v21 }
 0x432   :  { %v3220_v43 = vpop.xlane.xlu1 %3219 }
 0x433   :  { %v3593_v50 = vmul.f32 %v3513_v4, %v3220_v43  ;;  %v3210_v39 = vpop.xlane.xlu0 %3209 }
 0x434   :  { %v3588_v59 = vmul.f32 %v3508_v33, %v3210_v39 }
 0x436   :  { %v3216_v17 = vpop.xlane.xlu1 %3215 }
 0x437   :  { %v9340_v38 = vmul.f32 %v3511_v40, %v3216_v17  ;;  %v3222_v55 = vpop.xlane.xlu0 %3221 }
 0x438   :  { %v3594_v45 = vmul.f32 %v3514_v7, %v3222_v55 }
 0x43a   :  { %v3228_v34 = vpop.xlane.xlu1 %3227 }
 0x43b   :  { %v9342_v13 = vmul.f32 %v3517_v10, %v3228_v34  ;;  %v3218_v60 = vpop.xlane.xlu0 %3217 }
 0x43c   :  { %v3592_v63 = vmul.f32 %v3512_v46, %v3218_v60 }
 0x43e   :  { %v3224_v23 = vpop.xlane.xlu1 %3223 }
 0x43f   :  { %v9344_v57 = vmul.f32 %v3515_v0, %v3224_v23  ;;  %v3230_v12 = vpop.xlane.xlu0 %3229 }
 0x440   :  { %v3598_v18 = vmul.f32 %v3518_v32, %v3230_v12 }
 0x442   :  { %v3236_v28 = vpop.xlane.xlu1 %3235 }
 0x443   :  { %v3665_v24 = vmul.f32 %v3585_v14, %v3236_v28  ;;  %v3226_v4 = vpop.xlane.xlu0 %3225 }
 0x444   :  { %v3596_v21 = vmul.f32 %v3516_v31, %v3226_v4 }
 0x446   :  { %v3232_v33 = vpop.xlane.xlu1 %3231 }
 0x447   :  { %v3663_v43 = vmul.f32 %v3583_v20, %v3232_v33  ;;  %v3238_v40 = vpop.xlane.xlu0 %3237 }
 0x448   :  { %v3666_v39 = vmul.f32 %v3586_v15, %v3238_v40 }
 0x44a   :  { %v3244_v17 = vpop.xlane.xlu1 %3243 }
 0x44b   :  { %v3669_v7 = vmul.f32 %v3589_v3, %v3244_v17  ;;  %v3234_v55 = vpop.xlane.xlu0 %3233 }
 0x44c   :  { %v3664_v34 = vmul.f32 %v3584_v22, %v3234_v55 }
 0x44e   :  { %v3240_v10 = vpop.xlane.xlu1 %3239 }
 0x44f   :  { %v9346_v6 = vmul.f32 %v3587_v16, %v3240_v10  ;;  %v3246_v46 = vpop.xlane.xlu0 %3245 }
 0x450   :  { %v3670_v0 = vmul.f32 %v3590_v2, %v3246_v46 }
 0x452   :  { %v3242_v60 = vpop.xlane.xlu1 %3241 }
 0x453   :  { %v3668_v23 = vmul.f32 %v3588_v59, %v3242_v60  ;;  %v3254_v32 = vpop.xlane.xlu0 %3253 }
 0x454   :  { %v9348_v12 = vmul.f32 %v3594_v45, %v3254_v32 }
 0x456   :  { %v3252_v14 = vpop.xlane.xlu1 %3251 }
 0x457   :  { %v9350_v31 = vmul.f32 %v3593_v50, %v3252_v14  ;;  %v3250_v20 = vpop.xlane.xlu0 %3249 }
 0x458   :  { %v9352_v28 = vmul.f32 %v3592_v63, %v3250_v20 }
 0x45a   :  { %v9354_v15 = vpop.xlane.xlu1 %3247 }
 0x45b   :  { %v3262_v3 = vpop.xlane.xlu0 %3261 }
 0x45c   :  { %v9356_v22 = vmul.f32 %v3598_v18, %v3262_v3 }
 0x45e   :  { %v9358_v16 = vpop.xlane.xlu1 %3259 }
 0x45f   :  { %v3258_v4 = vpop.xlane.xlu0 %3257 }
 0x460   :  { %v9360_v2 = vmul.f32 %v3596_v21, %v3258_v4 }
 0x462   :  { %10617 = vst [vmem:[#allocation37_spill] sm:$0xff] %v9360_v2  ;;  %v9362_v59 = vpop.xlane.xlu1 %3255 }
 0x463   :  { %v3268_v45 = vpop.xlane.xlu0 %3267 }
 0x464   :  { %v3745_v37 = vmul.f32 %v3665_v24, %v3268_v45  ;;  %v10619_v24 = vlaneseq }
 0x466   :  { %v3264_v33 = vpop.xlane.xlu1 %3263 }
 0x467   :  { %v3270_v40 = vpop.xlane.xlu0 %3269  ;;  %v3743_v27 = vmul.f32 %v3663_v43, %v3264_v33  ;;  %v3671_v33 = vmul.f32 %v9340_v38, %v9354_v15  ;;  %v3675_v38 = vmul.f32 %v9344_v57, %v9362_v59 }
 0x468   :  { %v3746_v4 = vmul.f32 %v3666_v39, %v3270_v40 }
 0x46a   :  { %v3278_v50 = vpop.xlane.xlu1 %3277 }
 0x46b   :  { %v3266_v17 = vpop.xlane.xlu0 %3265  ;;  %v3750_v1 = vmul.f32 %v3670_v0, %v3278_v50 }
 0x46c   :  { %v3744_v42 = vmul.f32 %v3664_v34, %v3266_v17  ;;  %v9379_v34 = vshrl.u32 %v10619_v24, 7 }
 0x46e   :  { %v3274_v55 = vpop.xlane.xlu1 %3273 }
 0x46f   :  { %v3276_v63 = vpop.xlane.xlu0 %3275  ;;  %v3748_v40 = vmul.f32 %v3668_v23, %v3274_v55  ;;  %v3677_v55 = vmul.f32 %v9342_v13, %v9358_v16  ;;  %v10623_v16 = vsub.f32 %v9153_v54, %v9123_v58 }
 0x470   :  { %v3749_v62 = vmul.f32 %v3669_v7, %v3276_v63  ;;  %v10621_v7 = vsub.f32 %v9147_v5, %v9107_v49  ;;  %v10622_v5 = vsub.f32 %v9112_v53, %v9083_v36 }
 0x472   :  { %v9364_v10 = vpop.xlane.xlu1 %3285 }
 0x473   :  { %v3272_v46 = vpop.xlane.xlu0 %3271 }
 0x476   :  { %v9366_v60 = vpop.xlane.xlu1 %3281 }
 0x477   :  { %v3284_v18 = vpop.xlane.xlu0 %3283  ;;  %v3752_v15 = vmul.f32 %v9352_v28, %v9366_v60  ;;  %v10624_v28 = vsub.f32 %v9133_v56, %v9098_v25 }
 0x478   :  { %v3753_v50 = vmul.f32 %v9350_v31, %v3284_v18  ;;  %v3754_v31 = vmul.f32 %v9348_v12, %v9364_v10 }
 0x47a   :  { %v9368_v32 = vpop.xlane.xlu1 %3291 }
 0x47b   :  { %v9370_v14 = vpop.xlane.xlu0 %3279  ;;  %v3757_v24 = vmul.f32 %v3677_v55, %v9368_v32 }
 0x47c   :  { %v3751_v57 = vmul.f32 %v3671_v33, %v9370_v14 }
 0x47e   :  { %v9372_v21 = vpop.xlane.xlu1 %3293 }
 0x47f   :  { %v9374_v20 = vpop.xlane.xlu0 %3287 }
 0x480   :  { %v3755_v58 = vmul.f32 %v3675_v38, %v9374_v20  ;;  %v10626_v20 = vsub.f32 %v9194_v35, %v9168_v29 }
 0x482   :  { %v9376_v3 = vpop.xlane.xlu1 %3289 }
 0x483   :  { %10618 = vst [vmem:[#allocation110_spill] sm:$0xff] %v9376_v3  ;;  %v3302_v48 = vpop.xlane.xlu0 %3301 }
 0x484   :  { %v3826_v41 = vmul.f32 %v3746_v4, %v3302_v48 }
 0x486   :  { %v3300_v19 = vpop.xlane.xlu1 %3299  ;;  %5375 = vlog2.f32 %v3826_v41  ;;  %v10620_v41 = vld [vmem:[#allocation5_spill] sm:$0xff] }
 0x487   :  { %v3825_v11 = vmul.f32 %v3745_v37, %v3300_v19  ;;  %v3298_v51 = vpop.xlane.xlu0 %3297  ;;  %v9382_v19 = vadd.s32 4294967272, %v10620_v41  ;;  %v9385_v37 = vadd.s32 4294967280, %v10620_v41  ;;  %v4001_v55 = vsub.s32 %v10620_v41, %v9379_v34 }
 0x488   :  { %v3824_v30 = vmul.f32 %v3744_v42, %v3298_v51 }
 0x489   :  { %5377 = vlog2.f32 %v3825_v11  ;;  %v4020_v43 = vsub.s32 %v9382_v19, %v9379_v34 }
 0x48a   :  { %v3296_v8 = vpop.xlane.xlu1 %3295  ;;  %5379 = vlog2.f32 %v3824_v30 }
 0x48b   :  { %v3823_v47 = vmul.f32 %v3743_v27, %v3296_v8  ;;  %v3310_v2 = vpop.xlane.xlu0 %3309  ;;  %v3747_v27 = vmul.f32 %v9346_v6, %v3272_v46  ;;  %v4013_v6 = vsub.s32 %v9385_v37, %v9379_v34 }
 0x48c   :  { %v3830_v3 = vmul.f32 %v3750_v1, %v3310_v2 }
 0x48d   :  { %5381 = vlog2.f32 %v3823_v47  ;;  %v9389_v47 = vadd.s32 4294967288, %v10620_v41 }
 0x48e   :  { %v3308_v39 = vpop.xlane.xlu1 %3307  ;;  %5383 = vlog2.f32 %v3830_v3 }
 0x48f   :  { %v3829_v48 = vmul.f32 %v3749_v62, %v3308_v39  ;;  %v3306_v51 = vpop.xlane.xlu0 %3305  ;;  %v4006_v17 = vsub.s32 %v9389_v47, %v9379_v34 }
 0x490   :  { %v5376_v30 = vpop.eup %5375  ;;  %v3828_v1 = vmul.f32 %v3748_v40, %v3306_v51 }
 0x491   :  { %5385 = vlog2.f32 %v3829_v48  ;;  %v3894_v8 = vmul.f32 0.6931472, %v5376_v30 }
 0x492   :  { %v3304_v62 = vpop.xlane.xlu1 %3303  ;;  %5387 = vlog2.f32 %v3828_v1 }
 0x493   :  { %v5378_v42 = vpop.eup %5377  ;;  %v3827_v11 = vmul.f32 %v3747_v27, %v3304_v62  ;;  %v3922_v0 = vsub.f32 %v10621_v7, %v3894_v8  ;;  %v3318_v2 = vpop.xlane.xlu0 %3317 }
 0x494   :  { %v3892_v23 = vmul.f32 0.6931472, %v5378_v42  ;;  %v5380_v45 = vpop.eup %5379  ;;  %v10625_v42 = vsub.f32 %v9216_v26, %v9190_v52  ;;  %v3834_v7 = vmul.f32 %v3754_v31, %v3318_v2  ;;  %v10627_v2 = vsub.f32 %v9236_v61, %v9205_v44  ;;  %v10630_v61 = vld [vmem:[#allocation110_spill] sm:$0xff] }
 0x495   :  { %5389 = vlog2.f32 %v3827_v11  ;;  %v3938_v49 = vmul.f32 0.14285715, %v3922_v0  ;;  %v3890_v46 = vmul.f32 0.6931472, %v5380_v45 }
 0x496   :  { %v3921_v63 = vsub.f32 %v10622_v5, %v3892_v23  ;;  %v3316_v3 = vpop.xlane.xlu1 %3315 }
 0x497   :  { %v5382_v4 = vpop.eup %5381  ;;  %v3833_v18 = vmul.f32 %v3753_v50, %v3316_v3  ;;  %v3957_v39 = vmul.f32 1.442695, %v3938_v49  ;;  %v3920_v36 = vsub.f32 %v10623_v16, %v3890_v46  ;;  %v3314_v40 = vpop.xlane.xlu0 %3313  ;;  %v3758_v50 = vmul.f32 %v9356_v22, %v9372_v21 }
 0x498   :  { %v3937_v13 = vmul.f32 0.14285715, %v3921_v63  ;;  %v3888_v53 = vmul.f32 0.6931472, %v5382_v4  ;;  %v5384_v48 = vpop.eup %5383  ;;  %v3832_v59 = vmul.f32 %v3752_v15, %v3314_v40  ;;  %v9437_v63 = vadd.s32 4294967248, %v10620_v41  ;;  %v10628_v4 = vld [vmem:[#allocation74_spill] sm:$0xff] }
 0x499   :  { %5391 = vlog2.f32 %v3833_v18  ;;  %v3936_v10 = vmul.f32 0.14285715, %v3920_v36  ;;  %v3902_v54 = vmul.f32 0.6931472, %v5384_v48  ;;  %v9440_v21 = vadd.s32 4294967256, %v10620_v41  ;;  %v10631_v18 = vld [vmem:[#allocation37_spill] sm:$0xff] }
 0x49a   :  { %5393 = vpow2.f32 %v3957_v39  ;;  %v3955_v12 = vmul.f32 1.442695, %v3937_v13  ;;  %v3919_v60 = vsub.f32 %v10624_v28, %v3888_v53  ;;  %v3312_v51 = vpop.xlane.xlu1 %3311  ;;  %v10629_v38 = vsub.f32 %v9222_v9, %v10628_v4 }
 0x49b   :  { %v5386_v30 = vpop.eup %5385  ;;  %5395 = vlog2.f32 %v3832_v59  ;;  %v3831_v27 = vmul.f32 %v3751_v57, %v3312_v51  ;;  %v3953_v32 = vmul.f32 1.442695, %v3936_v10  ;;  %v3320_v8 = vpop.xlane.xlu0 %3319  ;;  %v3926_v11 = vsub.f32 %v10625_v42, %v3902_v54 }
 0x49c   :  { %5397 = vpow2.f32 %v3955_v12  ;;  %v3935_v1 = vmul.f32 0.14285715, %v3919_v60  ;;  %v3900_v14 = vmul.f32 0.6931472, %v5386_v30  ;;  %v5388_v62 = vpop.eup %5387  ;;  %v3835_v25 = vmul.f32 %v3755_v58, %v3320_v8  ;;  %v10632_v58 = vld [vmem:[#allocation102_spill] sm:$0xff] }
 0x49d   :  { %5399 = vlog2.f32 %v3831_v27  ;;  %v3898_v23 = vmul.f32 0.6931472, %v5388_v62  ;;  %v3942_v35 = vmul.f32 0.14285715, %v3926_v11  ;;  %v3756_v39 = vmul.f32 %v10631_v18, %v10630_v61  ;;  %v10636_v61 = vld [vmem:[#allocation107_spill] sm:$0xff] }
 0x49e   :  { %5401 = vpow2.f32 %v3953_v32  ;;  %v3951_v56 = vmul.f32 1.442695, %v3935_v1  ;;  %v3925_v0 = vsub.f32 %v10626_v20, %v3900_v14  ;;  %v3324_v45 = vpop.xlane.xlu1 %3323  ;;  %v9448_v36 = vadd.s32 4294967264, %v10620_v41  ;;  %v10633_v14 = vld [vmem:[#allocation39_spill] sm:$0xff] }
 0x49f   :  { %v5390_v33 = vpop.eup %5389  ;;  %5403 = vlog2.f32 %v3835_v25  ;;  %v3837_v52 = vmul.f32 %v3757_v24, %v3324_v45  ;;  %v3924_v49 = vsub.f32 %v10627_v2, %v3898_v23  ;;  %v3326_v29 = vpop.xlane.xlu0 %3325  ;;  %v9451_v9 = vadd.s32 4294967240, %v10620_v41  ;;  %v10634_v25 = vld [vmem:[#allocation108_spill] sm:$0xff] }
 0x4a0   :  { %5405 = vpow2.f32 %v3951_v56  ;;  %v3941_v26 = vmul.f32 0.14285715, %v3925_v0  ;;  %v3896_v5 = vmul.f32 0.6931472, %v5390_v33  ;;  %v3838_v46 = vmul.f32 %v3758_v50, %v3326_v29 }
 0x4a1   :  { %5407 = vlog2.f32 %v3834_v7  ;;  %v3940_v3 = vmul.f32 0.14285715, %v3924_v49  ;;  %v3965_v24 = vmul.f32 1.442695, %v3942_v35  ;;  %v4041_v12 = vsub.s32 %v9437_v63, %v9379_v34 }
 0x4a2   :  { %v3963_v22 = vmul.f32 1.442695, %v3941_v26  ;;  %v3923_v31 = vsub.f32 %v10629_v38, %v3896_v5  ;;  %v3856_v15 = vpop.xlane.xlu1 %3855  ;;  %5409 = vlog2.f32 %v3837_v52  ;;  %v4034_v10 = vsub.s32 %v9440_v21, %v9379_v34  ;;  %v10635_v5 = vld [vmem:[#allocation80_spill] sm:$0xff] }
 0x4a3   :  { %v5392_v44 = vpop.eup %5391  ;;  %v3961_v16 = vmul.f32 1.442695, %v3940_v3  ;;  %v3322_v40 = vpop.xlane.xlu0 %3321  ;;  %v4027_v32 = vsub.s32 %v9448_v36, %v9379_v34  ;;  %v3879_v8 = vsub.f32 %v3856_v15, %v10633_v14  ;;  %v9466_v45 = vadd.s32 4294967232, %v10620_v41 }
 0x4a4   :  { %v5394_v13 = vpop.eup %5393  ;;  %5411 = vpow2.f32 %v3963_v22  ;;  %v3939_v53 = vmul.f32 0.14285715, %v3923_v31  ;;  %v3836_v57 = vmul.f32 %v3756_v39, %v3322_v40  ;;  %v3908_v30 = vmul.f32 0.6931472, %v5392_v44 }
 0x4a5   :  { %v5396_v48 = vpop.eup %5395  ;;  %5413 = vlog2.f32 %v3838_v46  ;;  %v4021_v47 = vrot.slane %v5394_v13, %v4020_v43  ;;  %v9479_v46 = vadd.s32 4294967216, %v10620_v41  ;;  %v4059_v36 = vadd.s32 4294967224, %v10620_v41 }
 0x4a6   :  { %v5398_v59 = vpop.eup %5397  ;;  %5415 = vpow2.f32 %v3961_v16  ;;  %v3959_v28 = vmul.f32 1.442695, %v3939_v53  ;;  %v3860_v60 = vpop.xlane.xlu1 %3859  ;;  %v3906_v11 = vmul.f32 0.6931472, %v5396_v48 }
 0x4a7   :  { %v5400_v51 = vpop.eup %5399  ;;  %5417 = vlog2.f32 %v3836_v57  ;;  %v3881_v54 = vsub.f32 %v3860_v60, %v10632_v58  ;;  %v3858_v62 = vpop.xlane.xlu0 %3857  ;;  %v10638_v60 = vld [vmem:[#allocation88_spill] sm:$0xff]  ;;  %v4048_v58 = vsub.s32 %v9451_v9, %v9379_v34 }
 0x4a8   :  { %v5402_v27 = vpop.eup %5401  ;;  %5419 = vpow2.f32 %v3959_v28  ;;  %v3904_v1 = vmul.f32 0.6931472, %v5400_v51  ;;  %v3880_v56 = vsub.f32 %v3858_v62, %v10634_v25 }
 0x4a9   :  { %v5404_v42 = vpop.eup %5403  ;;  %5421 = vpow2.f32 %v3965_v24  ;;  %v3929_v7 = vsub.f32 %v3881_v54, %v3908_v30  ;;  %v4007_v0 = vrot.slane %v5402_v27, %v4006_v17  ;;  %v4014_v17 = vrot.slane %v5398_v59, %v4013_v6  ;;  %v10637_v59 = vld [vmem:[#allocation106_spill] sm:$0xff] }
 0x4aa   :  { %v5406_v20 = vpop.eup %5405  ;;  %v3912_v23 = vmul.f32 0.6931472, %v5404_v42  ;;  %v3927_v33 = vsub.f32 %v3879_v8, %v3904_v1  ;;  %v3864_v50 = vpop.xlane.xlu1 %3863  ;;  %v3928_v49 = vsub.f32 %v3880_v56, %v3906_v11 }
 0x4ab   :  { %v5408_v52 = vpop.eup %5407  ;;  %v4002_v26 = vrot.slane %v5406_v20, %v4001_v55  ;;  %v3945_v2 = vmul.f32 0.14285715, %v3929_v7  ;;  %v3883_v29 = vsub.f32 %v3864_v50, %v10635_v5  ;;  %v3862_v22 = vpop.xlane.xlu0 %3861 }
 0x4ac   :  { %v3943_v35 = vmul.f32 0.14285715, %v3927_v33  ;;  %v5410_v3 = vpop.eup %5409  ;;  %v3944_v38 = vmul.f32 0.14285715, %v3928_v49  ;;  %v3910_v19 = vmul.f32 0.6931472, %v5408_v52  ;;  %v3882_v18 = vsub.f32 %v3862_v22, %v10636_v61 }
 0x4ad   :  { %v4009_v55 = vsel %vm4008_vm4, %v4007_v0, %v4002_v26  ;;  %v3971_v4 = vmul.f32 1.442695, %v3945_v2  ;;  %v3931_v31 = vsub.f32 %v3883_v29, %v3912_v23  ;;  %v3916_v57 = vmul.f32 0.6931472, %v5410_v3  ;;  %v10639_v23 = vld [vmem:[#allocation111_spill] sm:$0xff] }
 0x4ae   :  { %v5412_v15 = vpop.eup %5411  ;;  %v4016_v44 = vsel %vm4015_vm7, %v4014_v17, %v4009_v55  ;;  %v3967_v43 = vmul.f32 1.442695, %v3943_v35  ;;  %v3868_v37 = vpop.xlane.xlu1 %3867  ;;  %v3969_v13 = vmul.f32 1.442695, %v3944_v38  ;;  %v3930_v40 = vsub.f32 %v3882_v18, %v3910_v19 }
 0x4af   :  { %v5414_v6 = vpop.eup %5413  ;;  %v4023_v39 = vsel %vm4022_vm8, %v4021_v47, %v4016_v44  ;;  %5423 = vpow2.f32 %v3971_v4  ;;  %v3947_v53 = vmul.f32 0.14285715, %v3931_v31  ;;  %v3866_v48 = vpop.xlane.xlu0 %3865  ;;  %v3885_v28 = vsub.f32 %v3868_v37, %v10637_v59 }
 0x4b0   :  { %v5416_v16 = vpop.eup %5415  ;;  %5425 = vpow2.f32 %v3967_v43  ;;  %v3884_v51 = vsub.f32 %v3866_v48, %v10638_v60  ;;  %v3946_v1 = vmul.f32 0.14285715, %v3930_v40  ;;  %v4042_v8 = vrot.slane %v5412_v15, %v4041_v12 }
 0x4b1   :  { %v5418_v24 = vpop.eup %5417  ;;  %5427 = vpow2.f32 %v3969_v13  ;;  %v3975_v27 = vmul.f32 1.442695, %v3947_v53  ;;  %v3933_v42 = vsub.f32 %v3885_v28, %v3916_v57  ;;  %v4035_v11 = vrot.slane %v5416_v16, %v4034_v10 }
 0x4b2   :  { %v5420_v30 = vpop.eup %5419  ;;  %v3914_v54 = vmul.f32 0.6931472, %v5418_v24  ;;  %v3918_v7 = vmul.f32 0.6931472, %v5414_v6  ;;  %v3973_v25 = vmul.f32 1.442695, %v3946_v1  ;;  %v4062_v26 = vsub.s32 %v4059_v36, %v9379_v34 }
 0x4b3   :  { %v5422_v14 = vpop.eup %5421  ;;  %v4028_v62 = vrot.slane %v5420_v30, %v4027_v32  ;;  %v3870_v20 = vpop.xlane.xlu0 %3869  ;;  %5429 = vpow2.f32 %v3975_v27  ;;  %v3949_v0 = vmul.f32 0.14285715, %v3933_v42  ;;  %v4055_v32 = vsub.s32 %v9466_v45, %v9379_v34 }
 0x4b4   :  { %v3932_v56 = vsub.f32 %v3884_v51, %v3914_v54  ;;  %v3886_v33 = vsub.f32 %v3870_v20, %v10639_v23  ;;  %v4049_v50 = vrot.slane %v5422_v14, %v4048_v58  ;;  %5431 = vpow2.f32 %v3973_v25 }
 0x4b5   :  { %v4030_v9 = vsel %vm4029_vm6, %v4028_v62, %v4023_v39  ;;  %v3979_v21 = vmul.f32 1.442695, %v3949_v0  ;;  %v4073_v2 = vadd.s32 4294967208, %v10620_v41  ;;  %v4069_v47 = vsub.s32 %v9479_v46, %v9379_v34 }
 0x4b6   :  { %v3948_v63 = vmul.f32 0.14285715, %v3932_v56  ;;  %v4037_v12 = vsel %vm4036_vm9, %v4035_v11, %v4030_v9  ;;  %v3934_v10 = vsub.f32 %v3886_v33, %v3918_v7  ;;  %v4080_v45 = vadd.s32 4294967200, %v10620_v41 }
 0x4b7   :  { %v4044_v52 = vsel %vm4043_vm11, %v4042_v8, %v4037_v12  ;;  %5433 = vpow2.f32 %v3979_v21  ;;  %v4076_v38 = vsub.s32 %v4073_v2, %v9379_v34  ;;  %v4087_v46 = vadd.s32 4294967192, %v10620_v41 }
 0x4b8   :  { %v3977_v49 = vmul.f32 1.442695, %v3948_v63  ;;  %v4051_v5 = vsel %vm4050_vm12, %v4049_v50, %v4044_v52  ;;  %v3950_v17 = vmul.f32 0.14285715, %v3934_v10  ;;  %v4083_v19 = vsub.s32 %v4080_v45, %v9379_v34 }
 0x4b9   :  { %v5424_v29 = vpop.eup %5423  ;;  %v4094_v43 = vadd.s32 4294967184, %v10620_v41  ;;  %v4101_v6 = vadd.s32 4294967176, %v10620_v41  ;;  %v4090_v13 = vsub.s32 %v4087_v46, %v9379_v34 }
 0x4ba   :  { %v5426_v35 = vpop.eup %5425  ;;  %5435 = vpow2.f32 %v3977_v49  ;;  %v3981_v55 = vmul.f32 1.442695, %v3950_v17  ;;  %v4070_v31 = vrot.slane %v5424_v29, %v4069_v47 }
 0x4bb   :  { %v5428_v22 = vpop.eup %5427  ;;  %v4056_v3 = vrot.slane %v5426_v35, %v4055_v32  ;;  %v4097_v36 = vsub.s32 %v4094_v43, %v9379_v34  ;;  %v4104_v57 = vsub.s32 %v4101_v6, %v9379_v34 }
 0x4bc   :  { %v4063_v4 = vrot.slane %v5428_v22, %v4062_v26  ;;  %5437 = vpow2.f32 %v3981_v55 }
 0x4bd   :  { %v4058_v15 = vsel %vm4057_vm14, %v4056_v3, %v4051_v5  ;;  %v5430_v61 = vpop.eup %5429 }
 0x4be   :  { %v4065_v44 = vsel %vm4064_vm15, %v4063_v4, %v4058_v15  ;;  %v5432_v37 = vpop.eup %5431  ;;  %v4084_v16 = vrot.slane %v5430_v61, %v4083_v19 }
 0x4bf   :  { %v4072_v18 = vsel %vm4071_vm1, %v4070_v31, %v4065_v44  ;;  %v4077_v39 = vrot.slane %v5432_v37, %v4076_v38 }
 0x4c1   :  { %v5434_v53 = vpop.eup %5433  ;;  %v4079_v40 = vsel %vm4078_vm3, %v4077_v39, %v4072_v18 }
 0x4c2   :  { %v4086_v24 = vsel %vm4085_vm2, %v4084_v16, %v4079_v40  ;;  %v4098_v28 = vrot.slane %v5434_v53, %v4097_v36 }
 0x4c4   :  { %v5436_v48 = vpop.eup %5435 }
 0x4c5   :  { %v4091_v59 = vrot.slane %v5436_v48, %v4090_v13 }
 0x4c6   :  { %v5438_v41 = vpop.eup %5437 }
 0x4c7   :  { %v4093_v60 = vsel %vm4092_vm5, %v4091_v59, %v4086_v24  ;;  %v4105_v30 = vrot.slane %v5438_v41, %v4104_v57 }
 0x4c8   :  { %v4100_v51 = vsel %vm4099_vm10, %v4098_v28, %v4093_v60 }
 0x4c9   :  { %v4107_v58 = vsel %vm4106_vm13, %v4105_v30, %v4100_v51 }
 0x4ca   :  { %4109 = vst [vmem:[#allocation2] sm:$0x1] %v4107_v58 }
 0x4cb   :  { %5451 = shalt.err (!%p5448_p4)
}
 0x4cc   :  { %s5452_s7 = scalar_lea.hbm %s9532_s4, 16 }
 0x4cd   :  { %p5453_p5 = scmp.ne.s32.totalorder %s9532_s4, %s5452_s7  ;;  %p5456_p6 = scmp.lt.u32.totalorder %s5452_s7, %s9532_s4 }
 0x4cf   :  { %p5458_p7 = pnand %p5456_p6, %p5453_p5 }
 0x4d1   :  { %5461 = shalt.err (!%p5458_p7)
}
 0x4d2   :  { %4119 = dma.vmem_to_hbm [thread:$0]  %s4117_s29, 16, %s9532_s4, [#allocation3]  }
 0x4d3   :  { %5462 = dma.done.wait [#allocation3], 16  }
 0x4d4   :  { %5463 = vsyncadd [#allocation3], 4294967280 }
 0x4d5   :  { %4123 = vsyncpa [#allocation3], 1 }

</bundles_post_ra>
